<compile_context>
chip_gen: v5e
topology: v5e:2x2
jax: 0.10.0
libtpu: 0.0.40
codegen_flags: <defaults>
</compile_context>

<pallas_src>
import math
from functools import partial

import jax
import jax.numpy as jnp
from jax import lax
from jax.experimental import pallas as pl
from jax.experimental.pallas import tpu as pltpu


def _beta_fn(a: float, b: float) -> float:
    # Euler beta function B(a, b) = Gamma(a)Gamma(b)/Gamma(a+b)
    return math.exp(math.lgamma(a) + math.lgamma(b) - math.lgamma(a + b))


def _round_up(x: int, m: int) -> int:
    return (x + m - 1) // m * m


def _vmem_capacity_bytes() -> int:
    """Physical VMEM of the local TPU; conservative (v7x-sized) fallback."""
    try:
        return int(pltpu.get_tpu_info().vmem_capacity_bytes)
    except Exception:
        return 64 * 1024 * 1024


def _pick_tile_rows(requested: int, N: int, D: int, Cp: int, itemsize: int,
                    budget_bytes: int) -> int:
    """Largest row tile that (a) leaves >= 2 grid steps when N allows, so the
    'parallel' grid axis can shard across v7x's two TensorCores, and (b) fits the
    VMEM budget (double-buffered in/out, double-buffered weights + constants, and
    ~6 live f32 (tile, max(D, Cp)) temporaries)."""
    tr = min(requested, _round_up(max(8, (N + 1) // 2), 8))
    tr = max(8, (tr // 8) * 8)
    while tr > 8:
        footprint = (
            2 * tr * D * itemsize            # double-buffered input rows
            + 2 * tr * Cp * itemsize         # double-buffered output
            + 2 * (D * Cp + 3 * Cp) * 4      # double-buffered weights + (1,Cp) constants
            + 6 * tr * max(D, Cp) * 4        # live f32 temporaries (xw, inner, p, y, ...)
        )
        if footprint <= budget_bytes:
            break
        tr //= 2
    return max(8, (tr // 8) * 8)


def _unfold_rows_nhwc(x_nchw, kh, kw, stride, padding, out_h, out_w):
    """im2col matching torch.nn.Unfold column ordering (c*(kh*kw) + i*kw + j).

    Built with a single NCHW->NHWC transpose of the un-inflated input, one
    inflating stack on the LAST axis, and contiguous (free) reshapes -- no
    transpose or pad pass over the kh*kw-inflated matrix.
    """
    B, Cin, _, _ = x_nchw.shape
    xt = jnp.transpose(x_nchw, (0, 2, 3, 1))                       # NHWC
    xp = jnp.pad(xt, ((0, 0), (padding, padding), (padding, padding), (0, 0)))
    patches = [
        xp[:, i:i + stride * out_h:stride, j:j + stride * out_w:stride, :]
        for i in range(kh) for j in range(kw)
    ]
    cols = jnp.stack(patches, axis=-1)                             # (B, oh, ow, Cin, kh*kw)
    return cols.reshape(B * out_h * out_w, Cin * kh * kw)          # (N, D), contiguous


def _poincare_conv_kernel(x_ref, w_ref, a_ref, b_ref, k_ref, o_ref, *,
                          c: float, beta_ratio: float):
    """Fused hot path for one tile of unfolded rows.

    x_ref: (TN, D)  raw unfolded patches (beta rescale folded into norm math)
    w_ref: (D, Cp)  MLR hyperplane directions (zero-padded output columns)
    a_ref: (1, Cp)  precomputed  sqrt(c) * cosh(2 sqrt(c) r) / ||z||
    b_ref: (1, Cp)  precomputed  sinh(2 sqrt(c) r)
    k_ref: (1, Cp)  precomputed  2 ||z||   (exponent of the fused sinh∘asinh)
    o_ref: (TN, Cp) output points on the Poincare ball (padded columns are 0)
    """
    eps = 1e-15
    c_sqrt = math.sqrt(c)

    x = x_ref[...].astype(jnp.float32)
    w = w_ref[...].astype(jnp.float32)
    a = a_ref[...]
    b = b_ref[...]
    k_exp = k_ref[...]

    # expmap0 with beta folded in:
    #   xh = tanh(sqrt(c) * beta * ||x||) * x / (sqrt(c) * ||x||)   (beta cancels in the direction)
    x_sq = jnp.maximum(jnp.sum(x * x, axis=-1, keepdims=True), eps)      # (TN, 1)
    inv_norm = lax.rsqrt(x_sq)
    s = (c_sqrt * beta_ratio) * (x_sq * inv_norm)                        # sqrt(c)*beta*||x||
    t = jnp.tanh(s)
    scale = t * inv_norm * (1.0 / c_sqrt)                                # xh = scale * x

    # Conformal factor via the exact identity
    #   lam = 2 / (1 - c||xh||^2) = 2 cosh^2(s) = 1 + cosh(2s)   (bounded, no eps clamp)
    e2s = jnp.exp(2.0 * s)
    lam_m1 = 0.5 * (e2s + 1.0 / e2s)                                     # cosh(2s) = lam - 1

    # Poincare MLR (Shimizu et al., HNN++ / Poincare ResNet):
    #   inner_k = sqrt(c) * lam * <xh, z_k>/||z_k|| * cosh(2 sqrt(c) r_k) - (lam-1) sinh(2 sqrt(c) r_k)
    # MXU consumes raw x; the per-row scale is applied as a (TN,1) column factor.
    xw = jnp.dot(x, w, preferred_element_type=jnp.float32)               # (TN, Cp)  -- MXU
    col = (1.0 + lam_m1) * scale                                         # lam * scale, (TN, 1)
    inner = (col * xw) * a - lam_m1 * b                                  # (TN, Cp)

    # Fused  sinh(k * asinh(u)) / sqrt(c)  via one sqrt+log+exp chain.
    # Odd-symmetric form (work on |u|, restore the sign) avoids cancellation for u < 0.
    au = jnp.abs(inner)
    tt = au + jnp.sqrt(au * au + 1.0)                                    # exp(asinh(|u|)) >= 1
    p = jnp.exp(k_exp * jnp.log(tt))                                     # tt ** k
    sh = 0.5 * (p - 1.0 / p)                                             # sinh(k*asinh(|u|))
    y = jnp.where(inner < 0.0, -sh, sh) * (1.0 / c_sqrt)                 # (TN, Cp)

    # Ball projection: y /= 1 + sqrt(1 + c ||y||^2)   (exact divide; (TN,1) denominator)
    y_sq = jnp.sum(y * y, axis=-1, keepdims=True)                        # padded cols are exactly 0
    y = y / (1.0 + jnp.sqrt(1.0 + c * y_sq))

    o_ref[...] = y.astype(o_ref.dtype)


@partial(jax.jit, static_argnames=("c", "kernel_dims", "stride", "padding",
                                   "tile_rows", "nhwc_output"))
def poincare_convolution2d(x, weights, bias, *, c, kernel_dims, stride=1,
                           padding=0, tile_rows=None, nhwc_output=False):
    """x: (B, Cin, H, W) NCHW. weights: (Cin*kh*kw, Cout). bias: (Cout,)."""
    B, Cin, H, W = x.shape
    kh, kw = kernel_dims
    D, Cout = weights.shape
    assert D == Cin * kh * kw

    # Same output-size arithmetic as the PyTorch module (kept verbatim, even though it
    # differs from Conv2d's floor formula when stride > 1).
    out_h = (H - kh + 1 + 2 * padding) // stride
    out_w = (W - kw + 1 + 2 * padding) // stride

    beta_ratio = _beta_fn(Cin * kh * kw / 2.0, 0.5) / _beta_fn(Cin / 2.0, 0.5)

    # --- im2col (== torch.nn.Unfold ordering), single inflated HBM write ---
    # TODO(synk): for large inputs, fuse the unfold into the kernel with manual
    # make_async_copy (memory_space=pl.ANY) instead of materializing the row matrix.
    rows = _unfold_rows_nhwc(x, kh, kw, stride, padding, out_h, out_w)    # (N, D)
    N = rows.shape[0]

    # Only Cout is padded to 128 (lane-dense, unmasked output store). D is kept at its
    # natural width: block last dim == full array dim, so no HBM inflation of the
    # dominant read stream.
    Cp = _round_up(Cout, 128)

    # Generation-aware tile / VMEM budget.
    vmem_cap = _vmem_capacity_bytes()
    if vmem_cap >= 96 * 1024 * 1024:            # v5e / v6e (128 MiB physical VMEM)
        budget, vmem_limit, requested = 64 << 20, 100 << 20, 2048
    else:                                        # v7x (64 MiB physical VMEM)
        budget, vmem_limit, requested = 20 << 20, 32 << 20, 1024
    if tile_rows is not None:
        requested = tile_rows
    itemsize = jnp.dtype(x.dtype).itemsize
    tr = _pick_tile_rows(requested, N, D, Cp, itemsize, budget)
    Np = _round_up(N, tr)
    rows_p = rows if Np == N else jnp.pad(rows, ((0, Np - N), (0, 0)))

    # Hoisted weight/bias-only quantities (||z||, cosh/sinh(2 sqrt(c) r)) -- computed
    # once per call instead of per tile. Padded output columns get z_norm ~ 0 and
    # r = 0, which yields exactly-zero kernel outputs (sliced away below).
    # TODO(synk): optional bf16 rows/weights for the MXU read stream (v5e) -- kept f32
    # here to preserve the 2e-3 tolerance without re-validation.
    c_sqrt = math.sqrt(float(c))
    w_pad = jnp.pad(weights.astype(jnp.float32), ((0, 0), (0, Cp - Cout)))
    r_pad = jnp.pad(bias.astype(jnp.float32), (0, Cp - Cout)).reshape(1, Cp)
    z_norm = jnp.sqrt(jnp.maximum(jnp.sum(w_pad * w_pad, axis=0, keepdims=True), 1e-15))
    two_cr = (2.0 * c_sqrt) * r_pad
    a_const = (c_sqrt / z_norm) * jnp.cosh(two_cr)     # (1, Cp)
    b_const = jnp.sinh(two_cr)                         # (1, Cp)
    k_const = 2.0 * z_norm                             # (1, Cp)

    kernel = partial(_poincare_conv_kernel, c=float(c), beta_ratio=float(beta_ratio))
    out = pl.pallas_call(
        kernel,
        out_shape=jax.ShapeDtypeStruct((Np, Cp), x.dtype),
        grid=(Np // tr,),
        in_specs=[
            pl.BlockSpec((tr, D), lambda i: (i, 0)),
            # TODO(synk): on v7x, single-buffer the grid-invariant operands below
            # (pipeline_mode=pl.Buffered(1)) once validated; kept default-buffered here.
            pl.BlockSpec((D, Cp), lambda i: (0, 0)),
            pl.BlockSpec((1, Cp), lambda i: (0, 0)),
            pl.BlockSpec((1, Cp), lambda i: (0, 0)),
            pl.BlockSpec((1, Cp), lambda i: (0, 0)),
        ],
        out_specs=pl.BlockSpec((tr, Cp), lambda i: (i, 0)),
        compiler_params=pltpu.CompilerParams(
            dimension_semantics=("parallel",),
            vmem_limit_bytes=vmem_limit,
        ),
    )(rows_p, w_pad, a_const, b_const, k_const)

    out = out[:N, :Cout].reshape(B, out_h, out_w, Cout)
    if nhwc_output:
        return out                      # avoids the output-side transpose for NHWC consumers
    return out.transpose(0, 3, 1, 2)    # NCHW, matching the PyTorch module


def _reference(x, weights, bias, *, c, kernel_dims, stride, padding):
    """Pure-JAX reference mirroring the PyTorch forward."""
    B, Cin, H, W = x.shape
    kh, kw = kernel_dims
    D, Cout = weights.shape
    out_h = (H - kh + 1 + 2 * padding) // stride
    out_w = (W - kw + 1 + 2 * padding) // stride
    beta_ratio = _beta_fn(Cin * kh * kw / 2.0, 0.5) / _beta_fn(Cin / 2.0, 0.5)
    c_sqrt = math.sqrt(c)

    u = _unfold_rows_nhwc(x * beta_ratio, kh, kw, stride, padding, out_h, out_w)  # (N, D)
    xn = jnp.sqrt(jnp.maximum(jnp.sum(u * u, -1, keepdims=True), 1e-15))
    xh = jnp.tanh(c_sqrt * xn) * u / (c_sqrt * xn)
    lam = 2.0 / jnp.maximum(1.0 - c * jnp.sum(xh * xh, -1, keepdims=True), 1e-15)
    zn = jnp.sqrt(jnp.maximum(jnp.sum(weights * weights, 0, keepdims=True), 1e-15))
    xw = xh @ weights
    two_cr = 2.0 * c_sqrt * bias.reshape(1, Cout)
    inner = (c_sqrt * lam * xw / zn) * jnp.cosh(two_cr) - (lam - 1.0) * jnp.sinh(two_cr)
    v = (2.0 * zn / c_sqrt) * jnp.arcsinh(inner)
    y = jnp.sinh(c_sqrt * v) / c_sqrt
    y = y / (1.0 + jnp.sqrt(1.0 + c * jnp.sum(y * y, -1, keepdims=True)))
    return y.reshape(B, out_h, out_w, Cout).transpose(0, 3, 1, 2)


if __name__ == "__main__":
    key = jax.random.PRNGKey(0)

    # Small shapes consistent with the module's forward.
    B, Cin, H, W = 2, 4, 16, 16
    Cout, kh, kw = 8, 3, 3
    padding, stride = 1, 1
    c = 1.0

    x = 0.1 * jax.random.normal(key, (B, Cin, H, W), dtype=jnp.float32)

    # Deterministic parameter init matching reset_parameters() defaults:
    #   id_init=True -> weights = 0.5 * eye(kernel_size*in_channels, out_channels)
    #   bias -> zeros
    D = Cin * kh * kw
    weights = 0.5 * jnp.eye(D, Cout, dtype=jnp.float32)
    bias = jnp.zeros((Cout,), dtype=jnp.float32)

    y = poincare_convolution2d(x, weights, bias, c=c, kernel_dims=(kh, kw),
                               stride=stride, padding=padding)
    y = jax.block_until_ready(y)

    out_h = (H - kh + 1 + 2 * padding) // stride
    out_w = (W - kw + 1 + 2 * padding) // stride
    assert y.shape == (B, Cout, out_h, out_w), y.shape
    assert bool(jnp.all(jnp.isfinite(y)))

    # Numerical check vs. pure-JAX reference.
    y_ref = _reference(x, weights, bias, c=c, kernel_dims=(kh, kw),
                       stride=stride, padding=padding)
    max_err = float(jnp.max(jnp.abs(y - y_ref)))
    assert max_err < 2e-3, f"max abs err vs reference: {max_err}"

    print("KERNEL_OK")
</pallas_src>

<mosaic_0001>
module attributes {stable_mosaic.version = 11 : i64} {
  func.func @_poincare_conv_kernel(%arg0: i32, %arg1: memref<256x36xf32, #tpu.memory_space<vmem>>, %arg2: memref<36x128xf32, #tpu.memory_space<vmem>>, %arg3: memref<1x128xf32, #tpu.memory_space<vmem>>, %arg4: memref<1x128xf32, #tpu.memory_space<vmem>>, %arg5: memref<1x128xf32, #tpu.memory_space<vmem>>, %arg6: memref<256x128xf32, #tpu.memory_space<vmem>>) attributes {dimension_semantics = [#tpu.dimension_semantics<parallel>], iteration_bounds = array<i64: 2>, scalar_prefetch = 0 : i64, scratch_operands = 0 : i64, tpu.core_type = #tpu.core_type<tc>, window_params = [{transform_indices = @transform_0, window_bounds = array<i64: 256, 36>}, {pipeline_mode = #tpu.pipeline_mode<synchronous>, transform_indices = @transform_1, window_bounds = array<i64: 36, 128>}, {pipeline_mode = #tpu.pipeline_mode<synchronous>, transform_indices = @transform_2, window_bounds = array<i64: 1, 128>}, {pipeline_mode = #tpu.pipeline_mode<synchronous>, transform_indices = @transform_3, window_bounds = array<i64: 1, 128>}, {pipeline_mode = #tpu.pipeline_mode<synchronous>, transform_indices = @transform_4, window_bounds = array<i64: 1, 128>}, {transform_indices = @transform_5, window_bounds = array<i64: 256, 128>}]} {
    %c0 = arith.constant 0 : index
    %c0_0 = arith.constant 0 : index
    %0 = vector.load %arg1[%c0, %c0_0] : memref<256x36xf32, #tpu.memory_space<vmem>>, vector<256x36xf32>
    %c0_1 = arith.constant 0 : index
    %c0_2 = arith.constant 0 : index
    %1 = vector.load %arg2[%c0_1, %c0_2] : memref<36x128xf32, #tpu.memory_space<vmem>>, vector<36x128xf32>
    %c0_3 = arith.constant 0 : index
    %c0_4 = arith.constant 0 : index
    %2 = vector.load %arg3[%c0_3, %c0_4] : memref<1x128xf32, #tpu.memory_space<vmem>>, vector<1x128xf32>
    %c0_5 = arith.constant 0 : index
    %c0_6 = arith.constant 0 : index
    %3 = vector.load %arg4[%c0_5, %c0_6] : memref<1x128xf32, #tpu.memory_space<vmem>>, vector<1x128xf32>
    %c0_7 = arith.constant 0 : index
    %c0_8 = arith.constant 0 : index
    %4 = vector.load %arg5[%c0_7, %c0_8] : memref<1x128xf32, #tpu.memory_space<vmem>>, vector<1x128xf32>
    %5 = arith.mulf %0, %0 : vector<256x36xf32>
    %cst = arith.constant dense<0.000000e+00> : vector<256xf32>
    %6 = vector.multi_reduction <add>, %5, %cst [1] : vector<256x36xf32> to vector<256xf32>
    %7 = vector.shape_cast %6 : vector<256xf32> to vector<256x1xf32>
    %cst_9 = arith.constant 1.000000e-15 : f32
    %8 = vector.broadcast %cst_9 : f32 to vector<256x1xf32>
    %9 = arith.maximumf %7, %8 : vector<256x1xf32>
    %10 = math.rsqrt %9 : vector<256x1xf32>
    %11 = arith.mulf %9, %10 : vector<256x1xf32>
    %cst_10 = arith.constant 0.315511703 : f32
    %12 = vector.broadcast %cst_10 : f32 to vector<256x1xf32>
    %13 = arith.mulf %12, %11 : vector<256x1xf32>
    %14 = math.tanh %13 : vector<256x1xf32>
    %15 = arith.mulf %14, %10 : vector<256x1xf32>
    %cst_11 = arith.constant 1.000000e+00 : f32
    %16 = vector.broadcast %cst_11 : f32 to vector<256x1xf32>
    %17 = arith.mulf %15, %16 : vector<256x1xf32>
    %cst_12 = arith.constant 2.000000e+00 : f32
    %18 = vector.broadcast %cst_12 : f32 to vector<256x1xf32>
    %19 = arith.mulf %18, %13 : vector<256x1xf32>
    %20 = math.exp %19 : vector<256x1xf32>
    %cst_13 = arith.constant 1.000000e+00 : f32
    %21 = vector.broadcast %cst_13 : f32 to vector<256x1xf32>
    %22 = arith.divf %21, %20 : vector<256x1xf32>
    %23 = arith.addf %20, %22 : vector<256x1xf32>
    %cst_14 = arith.constant 5.000000e-01 : f32
    %24 = vector.broadcast %cst_14 : f32 to vector<256x1xf32>
    %25 = arith.mulf %24, %23 : vector<256x1xf32>
    %cst_15 = arith.constant dense<0.000000e+00> : vector<256x128xf32>
    %26 = tpu.matmul %0, %1, %cst_15 {dimension_numbers = #tpu.dot_dimension_numbers<[1], [0], [0], [1], [0, 0, 1, 1], [], []>} : vector<256x36xf32>, vector<36x128xf32>, vector<256x128xf32> -> vector<256x128xf32>
    %cst_16 = arith.constant 1.000000e+00 : f32
    %27 = vector.broadcast %cst_16 : f32 to vector<256x1xf32>
    %28 = arith.addf %27, %25 : vector<256x1xf32>
    %29 = arith.mulf %28, %17 : vector<256x1xf32>
    %30 = vector.broadcast %29 : vector<256x1xf32> to vector<256x128xf32>
    %31 = arith.mulf %30, %26 : vector<256x128xf32>
    %32 = vector.broadcast %2 : vector<1x128xf32> to vector<256x128xf32>
    %33 = arith.mulf %31, %32 : vector<256x128xf32>
    %34 = vector.broadcast %25 : vector<256x1xf32> to vector<256x128xf32>
    %35 = vector.broadcast %3 : vector<1x128xf32> to vector<256x128xf32>
    %36 = arith.mulf %34, %35 : vector<256x128xf32>
    %37 = arith.subf %33, %36 : vector<256x128xf32>
    %38 = math.absf %37 : vector<256x128xf32>
    %39 = arith.mulf %38, %38 : vector<256x128xf32>
    %cst_17 = arith.constant 1.000000e+00 : f32
    %40 = vector.broadcast %cst_17 : f32 to vector<256x128xf32>
    %41 = arith.addf %39, %40 : vector<256x128xf32>
    %42 = math.sqrt %41 : vector<256x128xf32>
    %43 = arith.addf %38, %42 : vector<256x128xf32>
    %44 = math.log %43 : vector<256x128xf32>
    %45 = vector.broadcast %4 : vector<1x128xf32> to vector<256x128xf32>
    %46 = arith.mulf %45, %44 : vector<256x128xf32>
    %47 = math.exp %46 : vector<256x128xf32>
    %cst_18 = arith.constant 1.000000e+00 : f32
    %48 = vector.broadcast %cst_18 : f32 to vector<256x128xf32>
    %49 = arith.divf %48, %47 : vector<256x128xf32>
    %50 = arith.subf %47, %49 : vector<256x128xf32>
    %cst_19 = arith.constant 5.000000e-01 : f32
    %51 = vector.broadcast %cst_19 : f32 to vector<256x128xf32>
    %52 = arith.mulf %51, %50 : vector<256x128xf32>
    %cst_20 = arith.constant 0.000000e+00 : f32
    %53 = vector.broadcast %cst_20 : f32 to vector<256x128xf32>
    %54 = arith.cmpf olt, %37, %53 : vector<256x128xf32>
    %cst_21 = arith.constant 0.000000e+00 : f32
    %55 = vector.broadcast %cst_21 : f32 to vector<256x128xf32>
    %56 = arith.subf %55, %52 : vector<256x128xf32>
    %57 = arith.select %54, %56, %52 : vector<256x128xi1>, vector<256x128xf32>
    %cst_22 = arith.constant 1.000000e+00 : f32
    %58 = vector.broadcast %cst_22 : f32 to vector<256x128xf32>
    %59 = arith.mulf %57, %58 : vector<256x128xf32>
    %60 = arith.mulf %59, %59 : vector<256x128xf32>
    %cst_23 = arith.constant dense<0.000000e+00> : vector<256xf32>
    %61 = vector.multi_reduction <add>, %60, %cst_23 [1] : vector<256x128xf32> to vector<256xf32>
    %62 = vector.shape_cast %61 : vector<256xf32> to vector<256x1xf32>
    %cst_24 = arith.constant 1.000000e+00 : f32
    %63 = vector.broadcast %cst_24 : f32 to vector<256x1xf32>
    %64 = arith.mulf %63, %62 : vector<256x1xf32>
    %cst_25 = arith.constant 1.000000e+00 : f32
    %65 = vector.broadcast %cst_25 : f32 to vector<256x1xf32>
    %66 = arith.addf %65, %64 : vector<256x1xf32>
    %67 = math.sqrt %66 : vector<256x1xf32>
    %cst_26 = arith.constant 1.000000e+00 : f32
    %68 = vector.broadcast %cst_26 : f32 to vector<256x1xf32>
    %69 = arith.addf %68, %67 : vector<256x1xf32>
    %70 = vector.broadcast %69 : vector<256x1xf32> to vector<256x128xf32>
    %71 = arith.divf %59, %70 : vector<256x128xf32>
    %c0_27 = arith.constant 0 : index
    %c0_28 = arith.constant 0 : index
    %72 = vector.load %arg6[%c0_27, %c0_28] : memref<256x128xf32, #tpu.memory_space<vmem>>, vector<256x128xf32>
    tpu.vector_store %arg6[%c0_27, %c0_28], %71 {strides = array<i32>} : memref<256x128xf32, #tpu.memory_space<vmem>>, vector<256x128xf32>,
    return
  }
  func.func @transform_0(%arg0: i32) -> (i32, i32) {
    %c0_i32 = arith.constant 0 : i32
    %c0_i32_0 = arith.constant 0 : i32
    return %arg0, %c0_i32 : i32, i32
  }
  func.func @transform_1(%arg0: i32) -> (i32, i32) {
    %c0_i32 = arith.constant 0 : i32
    %c0_i32_0 = arith.constant 0 : i32
    %c0_i32_1 = arith.constant 0 : i32
    return %c0_i32, %c0_i32_0 : i32, i32
  }
  func.func @transform_2(%arg0: i32) -> (i32, i32) {
    %c0_i32 = arith.constant 0 : i32
    %c0_i32_0 = arith.constant 0 : i32
    %c0_i32_1 = arith.constant 0 : i32
    return %c0_i32, %c0_i32_0 : i32, i32
  }
  func.func @transform_3(%arg0: i32) -> (i32, i32) {
    %c0_i32 = arith.constant 0 : i32
    %c0_i32_0 = arith.constant 0 : i32
    %c0_i32_1 = arith.constant 0 : i32
    return %c0_i32, %c0_i32_0 : i32, i32
  }
  func.func @transform_4(%arg0: i32) -> (i32, i32) {
    %c0_i32 = arith.constant 0 : i32
    %c0_i32_0 = arith.constant 0 : i32
    %c0_i32_1 = arith.constant 0 : i32
    return %c0_i32, %c0_i32_0 : i32, i32
  }
  func.func @transform_5(%arg0: i32) -> (i32, i32) {
    %c0_i32 = arith.constant 0 : i32
    %c0_i32_0 = arith.constant 0 : i32
    return %arg0, %c0_i32 : i32, i32
  }
}

</mosaic_0001>

<bundles_post_ra>
// kernel: poincare_convolution2d.1
= control target key start
LH: loop header
LB: loop body
LE: loop exit
PB: predicated region body
PF: predicated region fallthrough
CT: control target
= control target key end

     0   :  { %s5112_s18 = smov 0   ;;  %s8635_s0 = inlined_call_operand.vmem [shape: f32[512,36], index: 0, kind: input, shape index: {}]   ;;  %s8636_s1 = inlined_call_operand.vmem [shape: f32[36,128], index: 1, kind: input, shape index: {}]   ;;  %s8637_s2 = inlined_call_operand.vmem [shape: f32[1,128], index: 2, kind: input, shape index: {}]   ;;  %s8638_s3 = inlined_call_operand.vmem [shape: f32[1,128], index: 3, kind: input, shape index: {}]   ;;  %s8639_s4 = inlined_call_operand.vmem [shape: f32[1,128], index: 4, kind: input, shape index: {}]   ;;  %s8640_s5 = inlined_call_operand.vmem [shape: f32[512,128], index: 5, kind: output, shape index: {}]  }
   0x1 LB: > { %s4355_s19 = sadd.s32 4294967295, %s5080_s18   ;;  %p4359_p0 = scmp.ge.s32.totalorder %s5080_s18, 1  ;;  %s5080_s18 = sphi %s5112_s18, %s15_s18  }
   0x2   : > { %p188_p1 = scmp.lt.s32.totalorder %s5080_s18, 3 }
   0x4   : > { %p189_p2 = pnand %p4359_p0, %p188_p1 }
   0x6   : > { %192 = sbr.rel (%p189_p2) target bundleno = 1081 (0x439), region = 40 }
   0xb   : > { %s4360_s20 = sshll.u32 %s4355_s19, 5  ;;  %v264_v0 = vld [vmem:[%s8636_s1 + $0x20] sm:$0xf]  ;;  %vm1613_vm0 = vcmask 1043456   ;;  %v263_v1 = vld [vmem:[%s8636_s1 + $0x18] sm:$0xff]  ;;  %v262_v2 = vld [vmem:[%s8636_s1 + $0x10] sm:$0xff] }
   0xc   : > { %p217_p3 = scmp.lt.s32.totalorder %s4360_s20, 63  ;;  %4364 = vmatpush.msk.msra.mxu0 %vm1613_vm0, %v264_v0  ;;  %4399 = vmatpush.msk.msra.mxu1 %vm1613_vm0, %v264_v0  ;;  %v261_v3 = vld [vmem:[%s8636_s1 + $0x8] sm:$0xff]  ;;  %v260_v4 = vld [vmem:[%s8636_s1] sm:$0xff]  ;;  %vm300_vm1 = vcmask 293888  }
   0xd   : > { %4400 = vmatpush.msk.msra.mxu2 %vm1613_vm0, %v264_v0  ;;  %4401 = vmatpush.msk.msra.mxu3 %vm1613_vm0, %v264_v0 }
   0xe   : > { %s8962_s20 = smov (!%p217_p3, %s4360_s20), 63  ;;  %1629 = vmatpush.msra.mxu0 %v263_v1  ;;  %4402 = vmatpush.msra.mxu1 %v263_v1 }
   0xf   : > { %4403 = vmatpush.msra.mxu2 %v263_v1  ;;  %4404 = vmatpush.msra.mxu3 %v263_v1  ;;  %s4361_s29 = sshll.u32 %s8962_s20, 3 }
  0x10   : > { %1630 = vmatpush.msra.mxu0 %v262_v2  ;;  %4405 = vmatpush.msra.mxu1 %v262_v2  ;;  %s5140_s7 = scalar_lea.vmem %s8635_s0, %s4361_s29  ;;  %s8095_s14 = scalar_lea.vmem %s8640_s5, %s4361_s29 }
  0x11   : > { %4406 = vmatpush.msra.mxu2 %v262_v2  ;;  %4407 = vmatpush.msra.mxu3 %v262_v2  ;;  %v5146_v5 = vld [vmem:[%s5140_s7 + $0x20] sm:$0xff]  ;;  %v230_v6 = vld [vmem:[%s5140_s7 + $0x10] sm:$0xff]  ;;  %v5153_v11 = vld [vmem:[%s5140_s7 + $0x28] sm:$0xff] }
  0x12   : > { %v228_v7 = vld [vmem:[%s5140_s7] sm:$0xff]  ;;  %1631 = vmatpush.msra.mxu0 %v261_v3  ;;  %4408 = vmatpush.msra.mxu1 %v261_v3  ;;  %v272_v8 = vmul.f32 %v5146_v5, %v5146_v5  ;;  %v270_v9 = vmul.f32 %v230_v6, %v230_v6  ;;  %v231_v12 = vld [vmem:[%s5140_s7 + $0x18] sm:$0xff]  ;;  %v229_v17 = vld [vmem:[%s5140_s7 + $0x8] sm:$0xff]  ;;  %v273_v18 = vmul.f32 %v5153_v11, %v5153_v11 }
  0x13   : > { %v268_v10 = vmul.f32 %v228_v7, %v228_v7  ;;  %4409 = vmatpush.msra.mxu2 %v261_v3  ;;  %4410 = vmatpush.msra.mxu3 %v261_v3  ;;  %v236_v13 = vld [vmem:[%s5140_s7 + $0x40] sm:$0xff]  ;;  %v271_v19 = vmul.f32 %v231_v12, %v231_v12  ;;  %v269_v20 = vmul.f32 %v229_v17, %v229_v17  ;;  %v5170_v25 = vld [vmem:[%s5140_s7 + $0x38] sm:$0xff]  ;;  %v237_v26 = vld [vmem:[%s5140_s7 + $0x48] sm:$0xff] }
  0x14   : > { %1632 = vmatpush.msra.mxu0 %v260_v4  ;;  %4411 = vmatpush.msra.mxu1 %v260_v4  ;;  %v313_v14 = vsel %vm300_vm1, %v272_v8, 0.0  ;;  %v307_v15 = vsel %vm300_vm1, %v270_v9, 0.0  ;;  %v316_v21 = vsel %vm300_vm1, %v273_v18, 0.0  ;;  %v244_v23 = vld [vmem:[%s5140_s7 + $0x80] sm:$0xff]  ;;  %v5175_v27 = vld [vmem:[%s5140_s7 + $0x30] sm:$0xff]  ;;  %v276_v28 = vmul.f32 %v236_v13, %v236_v13  ;;  %v245_v33 = vld [vmem:[%s5140_s7 + $0x88] sm:$0xff] }
  0x15   : > { %v301_v16 = vsel %vm300_vm1, %v268_v10, 0.0  ;;  %4365 = vmatmul.msk.f32.vlgmr.msra.gmra.mxu0 %vm300_vm1, %v228_v7  ;;  %4373 = vmatmul.msk.f32.vlgmr.msra.gmra.mxu1 %vm300_vm1, %v236_v13  ;;  %v310_v22 = vsel %vm300_vm1, %v271_v19, 0.0  ;;  %v304_v24 = vsel %vm300_vm1, %v269_v20, 0.0  ;;  %v275_v29 = vmul.f32 %v5170_v25, %v5170_v25  ;;  %v239_v35 = vld [vmem:[%s5140_s7 + $0x58] sm:$0xff]  ;;  %v238_v36 = vld [vmem:[%s5140_s7 + $0x50] sm:$0xff]  ;;  %v241_v45 = vld [vmem:[%s5140_s7 + $0x68] sm:$0xff] }
  0x16   : > { %314 = vadd.xlane.f32.xlu2 %v313_v14  ;;  %308 = vadd.xlane.f32.xlu1 %v307_v15  ;;  %v274_v30 = vmul.f32 %v5175_v27, %v5175_v27  ;;  %v325_v31 = vsel %vm300_vm1, %v276_v28, 0.0  ;;  %v279_v37 = vmul.f32 %v239_v35, %v239_v35  ;;  %v278_v38 = vmul.f32 %v238_v36, %v238_v36  ;;  %v246_v42 = vld [vmem:[%s5140_s7 + $0x90] sm:$0xff]  ;;  %v240_v46 = vld [vmem:[%s5140_s7 + $0x60] sm:$0xff]  ;;  %v247_v52 = vld [vmem:[%s5140_s7 + $0x98] sm:$0xff] }
  0x17   : > { %302 = vadd.xlane.f32.xlu0 %v301_v16  ;;  %4412 = vmatpush.msra.mxu2 %v260_v4  ;;  %v322_v32 = vsel %vm300_vm1, %v275_v29, 0.0  ;;  %v277_v39 = vmul.f32 %v237_v26, %v237_v26  ;;  %v242_v44 = vld [vmem:[%s5140_s7 + $0x70] sm:$0xff]  ;;  %v281_v48 = vmul.f32 %v241_v45, %v241_v45  ;;  %v280_v49 = vmul.f32 %v240_v46, %v240_v46  ;;  %v252_v53 = vld [vmem:[%s5140_s7 + $0xc0] sm:$0xff]  ;;  %v243_v55 = vld [vmem:[%s5140_s7 + $0x78] sm:$0xff] }
  0x18   : > { %4413 = vmatpush.msra.mxu3 %v260_v4  ;;  %4381 = vmatmul.msk.f32.vlgmr.msra.gmra.mxu2 %vm300_vm1, %v244_v23  ;;  %v319_v34 = vsel %vm300_vm1, %v274_v30, 0.0  ;;  %v334_v40 = vsel %vm300_vm1, %v279_v37, 0.0  ;;  %v331_v41 = vsel %vm300_vm1, %v278_v38, 0.0  ;;  %v282_v47 = vmul.f32 %v242_v44, %v242_v44  ;;  %v248_v61 = vld [vmem:[%s5140_s7 + $0xa0] sm:$0xff]  ;;  %v253_v62 = vld [vmem:[%s5140_s7 + $0xc8] sm:$0xff]  ;;  %v251_v8 = vld [vmem:[%s5140_s7 + $0xb8] sm:$0xff] }
  0x19   : > { %v328_v43 = vsel %vm300_vm1, %v277_v39, 0.0  ;;  %v340_v51 = vsel %vm300_vm1, %v281_v48, 0.0  ;;  %v337_v54 = vsel %vm300_vm1, %v280_v49, 0.0  ;;  %4389 = vmatmul.msk.f32.vlgmr.msra.gmra.mxu3 %vm300_vm1, %v252_v53  ;;  %v285_v56 = vmul.f32 %v245_v33, %v245_v33  ;;  %v250_v9 = vld [vmem:[%s5140_s7 + $0xb0] sm:$0xff]  ;;  %v255_v15 = vld [vmem:[%s5140_s7 + $0xd8] sm:$0xff] }
  0x1a   : > { %v343_v50 = vsel %vm300_vm1, %v282_v47, 0.0  ;;  %v284_v57 = vmul.f32 %v244_v23, %v244_v23  ;;  %v283_v58 = vmul.f32 %v243_v55, %v243_v55  ;;  %v288_v0 = vmul.f32 %v248_v61, %v248_v61 }
  0x1b   : > { %v352_v59 = vsel %vm300_vm1, %v285_v56, 0.0  ;;  %v287_v1 = vmul.f32 %v247_v52, %v247_v52  ;;  %v286_v2 = vmul.f32 %v246_v42, %v246_v42  ;;  %v291_v10 = vmul.f32 %v251_v8, %v251_v8 }
  0x1c   : > { %v349_v60 = vsel %vm300_vm1, %v284_v57, 0.0  ;;  %v346_v63 = vsel %vm300_vm1, %v283_v58, 0.0  ;;  %v361_v3 = vsel %vm300_vm1, %v288_v0, 0.0  ;;  %v293_v18 = vmul.f32 %v253_v62, %v253_v62 }
  0x1d   : > { %4366 = vmatmul.msk.f32.gmra.mxu0 %vm300_vm1, %v229_v17  ;;  %4374 = vmatmul.msk.f32.gmra.mxu1 %vm300_vm1, %v237_v26  ;;  %v358_v4 = vsel %vm300_vm1, %v287_v1, 0.0  ;;  %v355_v7 = vsel %vm300_vm1, %v286_v2, 0.0  ;;  %v370_v13 = vsel %vm300_vm1, %v291_v10, 0.0  ;;  %v292_v19 = vmul.f32 %v252_v53, %v252_v53 }
  0x1e   : > { %317 = vadd.xlane.f32.xlu2 %v316_v21  ;;  %311 = vadd.xlane.f32.xlu1 %v310_v22  ;;  %v376_v21 = vsel %vm300_vm1, %v293_v18, 0.0  ;;  %v256_v22 = vld [vmem:[%s5140_s7 + $0xe0] sm:$0xff] }
  0x1f   : > { %305 = vadd.xlane.f32.xlu0 %v304_v24  ;;  %v373_v23 = vsel %vm300_vm1, %v292_v19, 0.0  ;;  %v257_v24 = vld [vmem:[%s5140_s7 + $0xe8] sm:$0xff]  ;;  %v296_v26 = vmul.f32 %v256_v22, %v256_v22 }
  0x20   : > { %4382 = vmatmul.msk.f32.gmra.mxu2 %vm300_vm1, %v245_v33 }
  0x21   : > { %4390 = vmatmul.msk.f32.gmra.mxu3 %vm300_vm1, %v253_v62  ;;  %v385_v29 = vsel %vm300_vm1, %v296_v26, 0.0 }
  0x25   : > { %4367 = vmatmul.msk.f32.gmra.mxu0 %vm300_vm1, %v230_v6  ;;  %4375 = vmatmul.msk.f32.gmra.mxu1 %vm300_vm1, %v238_v36  ;;  %v254_v6 = vld [vmem:[%s5140_s7 + $0xd0] sm:$0xff] }
  0x26   : > { %326 = vadd.xlane.f32.xlu2 %v325_v31  ;;  %323 = vadd.xlane.f32.xlu1 %v322_v32  ;;  %v294_v17 = vmul.f32 %v254_v6, %v254_v6  ;;  %v259_v31 = vld [vmem:[%s5140_s7 + $0xf8] sm:$0xff]  ;;  %v258_v32 = vld [vmem:[%s5140_s7 + $0xf0] sm:$0xff] }
  0x27   : > { %320 = vadd.xlane.f32.xlu0 %v319_v34  ;;  %v299_v33 = vmul.f32 %v259_v31, %v259_v31  ;;  %v298_v34 = vmul.f32 %v258_v32, %v258_v32 }
  0x28   : > { %4383 = vmatmul.msk.f32.gmra.mxu2 %vm300_vm1, %v246_v42  ;;  %v379_v20 = vsel %vm300_vm1, %v294_v17, 0.0 }
  0x29   : > { %4391 = vmatmul.msk.f32.gmra.mxu3 %vm300_vm1, %v254_v6  ;;  %v391_v36 = vsel %vm300_vm1, %v298_v34, 0.0 }
  0x2d   : > { %4368 = vmatmul.msk.f32.gmra.mxu0 %vm300_vm1, %v231_v12  ;;  %4376 = vmatmul.msk.f32.gmra.mxu1 %vm300_vm1, %v239_v35  ;;  %v394_v35 = vsel %vm300_vm1, %v299_v33, 0.0 }
  0x2e   : > { %335 = vadd.xlane.f32.xlu2 %v334_v40  ;;  %332 = vadd.xlane.f32.xlu1 %v331_v41 }
  0x2f   : > { %329 = vadd.xlane.f32.xlu0 %v328_v43 }
  0x30   : > { %4384 = vmatmul.msk.f32.gmra.mxu2 %vm300_vm1, %v247_v52 }
  0x31   : > { %4392 = vmatmul.msk.f32.gmra.mxu3 %vm300_vm1, %v255_v15 }
  0x35   : > { %4369 = vmatmul.msk.f32.gmra.mxu0 %vm300_vm1, %v5146_v5  ;;  %4377 = vmatmul.msk.f32.gmra.mxu1 %vm300_vm1, %v240_v46  ;;  %v249_v5 = vld [vmem:[%s5140_s7 + $0xa8] sm:$0xff] }
  0x36   : > { %344 = vadd.xlane.f32.xlu2 %v343_v50  ;;  %341 = vadd.xlane.f32.xlu1 %v340_v51  ;;  %v289_v12 = vmul.f32 %v249_v5, %v249_v5 }
  0x37   : > { %338 = vadd.xlane.f32.xlu0 %v337_v54 }
  0x38   : > { %4385 = vmatmul.msk.f32.gmra.mxu2 %vm300_vm1, %v248_v61  ;;  %v364_v16 = vsel %vm300_vm1, %v289_v12, 0.0 }
  0x39   : > { %4393 = vmatmul.msk.f32.gmra.mxu3 %vm300_vm1, %v256_v22 }
  0x3d   : > { %4370 = vmatmul.msk.f32.gmra.mxu0 %vm300_vm1, %v5153_v11  ;;  %4378 = vmatmul.msk.f32.gmra.mxu1 %vm300_vm1, %v241_v45  ;;  %v290_v11 = vmul.f32 %v250_v9, %v250_v9 }
  0x3e   : > { %353 = vadd.xlane.f32.xlu2 %v352_v59  ;;  %350 = vadd.xlane.f32.xlu1 %v349_v60 }
  0x3f   : > { %347 = vadd.xlane.f32.xlu0 %v346_v63  ;;  %v367_v14 = vsel %vm300_vm1, %v290_v11, 0.0 }
  0x40   : > { %4386 = vmatmul.msk.f32.gmra.mxu2 %vm300_vm1, %v249_v5 }
  0x41   : > { %4394 = vmatmul.msk.f32.gmra.mxu3 %vm300_vm1, %v257_v24 }
  0x45   : > { %4371 = vmatmul.msk.f32.gmra.mxu0 %vm300_vm1, %v5175_v27  ;;  %4379 = vmatmul.msk.f32.gmra.mxu1 %vm300_vm1, %v242_v44  ;;  %v295_v27 = vmul.f32 %v255_v15, %v255_v15 }
  0x46   : > { %362 = vadd.xlane.f32.xlu2 %v361_v3  ;;  %359 = vadd.xlane.f32.xlu1 %v358_v4 }
  0x47   : > { %356 = vadd.xlane.f32.xlu0 %v355_v7  ;;  %v382_v30 = vsel %vm300_vm1, %v295_v27, 0.0 }
  0x48   : > { %4387 = vmatmul.msk.f32.gmra.mxu2 %vm300_vm1, %v250_v9 }
  0x49   : > { %4395 = vmatmul.msk.f32.gmra.mxu3 %vm300_vm1, %v258_v32 }
  0x4d   : > { %4372 = vmatmul.msk.f32.gmra.mxu0 %vm300_vm1, %v5170_v25  ;;  %4380 = vmatmul.msk.f32.gmra.mxu1 %vm300_vm1, %v243_v55  ;;  %v297_v25 = vmul.f32 %v257_v24, %v257_v24 }
  0x4e   : > { %371 = vadd.xlane.f32.xlu2 %v370_v13  ;;  %368 = vadd.xlane.f32.xlu1 %v367_v14 }
  0x4f   : > { %365 = vadd.xlane.f32.xlu0 %v364_v16  ;;  %v388_v28 = vsel %vm300_vm1, %v297_v25, 0.0 }
  0x50   : > { %4388 = vmatmul.msk.f32.gmra.mxu2 %vm300_vm1, %v251_v8 }
  0x51   : > { %4396 = vmatmul.msk.f32.gmra.mxu3 %vm300_vm1, %v259_v31 }
  0x56   : > { %380 = vadd.xlane.f32.xlu2 %v379_v20  ;;  %377 = vadd.xlane.f32.xlu1 %v376_v21 }
  0x57   : > { %374 = vadd.xlane.f32.xlu0 %v373_v23 }
  0x5e   : > { %389 = vadd.xlane.f32.xlu2 %v388_v28  ;;  %386 = vadd.xlane.f32.xlu1 %v385_v29 }
  0x5f   : > { %383 = vadd.xlane.f32.xlu0 %v382_v30 }
  0x66   : > { %395 = vadd.xlane.f32.xlu1 %v394_v35 }
  0x67   : > { %392 = vadd.xlane.f32.xlu0 %v391_v36 }
  0x89   : > { %v309_v37 = vpop.xlane.xlu1 %308  ;;  %v315_v38 = vpop.xlane.xlu2 %314 }
  0x8a   : > { %v399_v39 = vmax.f32 %v309_v37, 1e-15  ;;  %v303_v40 = vpop.xlane.xlu0 %302  ;;  %v5261_v46 = vmax.f32 %v315_v38, 1e-15 }
  0x8b   : > { %v397_v41 = vmax.f32 %v303_v40, 1e-15 }
  0x8c   : > { %4425 = vrsqrt.f32 %v399_v39  ;;  %vm455_vm6 = vweird.f32 %v399_v39  ;;  %vm475_vm11 = vweird.f32 %v5261_v46 }
  0x8d   : > { %4427 = vrsqrt.f32 %v397_v41  ;;  %vm435_vm2 = vweird.f32 %v397_v41 }
  0x91   : > { %v318_v48 = vpop.xlane.xlu2 %317  ;;  %v312_v51 = vpop.xlane.xlu1 %311 }
  0x92   : > { %v306_v42 = vpop.xlane.xlu0 %305  ;;  %v4426_v43 = vpop.eup %4425  ;;  %v5264_v55 = vmax.f32 %v312_v51, 1e-15  ;;  %v5269_v0 = vmax.f32 %v318_v48, 1e-15 }
  0x93   : > { %v398_v44 = vmax.f32 %v306_v42, 1e-15  ;;  %v4428_v45 = vpop.eup %4427  ;;  %v450_v47 = vmul.f32 %v4426_v43, %v399_v39  ;;  %vm456_vm5 = vweird.f32 %v4426_v43 }
  0x94   : > { %v430_v49 = vmul.f32 %v4428_v45, %v397_v41  ;;  %vm436_vm3 = vweird.f32 %v4428_v45  ;;  %vm457_vm7 = vmor %vm455_vm6, %vm456_vm5  ;;  %vm465_vm15 = vweird.f32 %v5264_v55 }
  0x95   : > { %v451_v50 = vmul.f32 %v4426_v43, %v450_v47  ;;  %4429 = vrsqrt.f32 %v398_v44  ;;  %vm437_vm4 = vmor %vm435_vm2, %vm436_vm3  ;;  %vm445_vm8 = vweird.f32 %v398_v44 }
  0x96   : > { %v431_v52 = vmul.f32 %v4428_v45, %v430_v49  ;;  %4431 = vrsqrt.f32 %v5261_v46 }
  0x97   : > { %v452_v53 = vmul.f32 0.5, %v451_v50  ;;  %4433 = vrsqrt.f32 %v5264_v55 }
  0x98   : > { %v432_v54 = vmul.f32 0.5, %v431_v52  ;;  %4435 = vrsqrt.f32 %v5269_v0 }
  0x99   : > { %v453_v58 = vsub.f32 1.5, %v452_v53  ;;  %v327_v61 = vpop.xlane.xlu2 %326  ;;  %v324_v9 = vpop.xlane.xlu1 %323 }
  0x9a   : > { %v433_v56 = vsub.f32 1.5, %v432_v54  ;;  %v5275_v5 = vmax.f32 %v327_v61, 1e-15  ;;  %v321_v11 = vpop.xlane.xlu0 %320  ;;  %v5290_v16 = vmax.f32 %v324_v9, 1e-15 }
  0x9b   : > { %v4430_v57 = vpop.eup %4429  ;;  %v454_v2 = vmul.f32 %v4426_v43, %v453_v58  ;;  %v5292_v18 = vmax.f32 %v321_v11, 1e-15 }
  0x9c   : > { %v440_v59 = vmul.f32 %v4430_v57, %v398_v44  ;;  %v5267_v60 = vpop.eup %4431  ;;  %v434_v62 = vmul.f32 %v4428_v45, %v433_v56  ;;  %vm446_vm9 = vweird.f32 %v4430_v57  ;;  %4437 = vrsqrt.f32 %v5275_v5  ;;  %8740 = vst [vmem:[#allocation2_spill] sm:$0xff] %v5290_v16 }
  0x9d   : > { %v470_v3 = vmul.f32 %v5267_v60, %v5261_v46  ;;  %v5278_v7 = vpop.eup %4433  ;;  %v5283_v12 = vsel %vm457_vm7, %v4426_v43, %v454_v2  ;;  %vm447_vm10 = vmor %vm445_vm8, %vm446_vm9  ;;  %vm476_vm12 = vweird.f32 %v5267_v60  ;;  %vm515_vm0 = vweird.f32 %v5275_v5 }
  0x9e   : > { %v441_v63 = vmul.f32 %v4430_v57, %v440_v59  ;;  %v5271_v1 = vsel %vm437_vm4, %v4428_v45, %v434_v62  ;;  %v460_v15 = vmul.f32 %v5278_v7, %v5264_v55  ;;  %v751_v20 = vmul.f32 %v5283_v12, %v399_v39  ;;  %v5298_v24 = vpop.eup %4435  ;;  %vm477_vm13 = vmor %vm475_vm11, %vm476_vm12 }
  0x9f   : > { %v749_v6 = vmul.f32 %v5271_v1, %v397_v41  ;;  %v471_v13 = vmul.f32 %v5267_v60, %v470_v3  ;;  %v480_v30 = vmul.f32 %v5298_v24, %v5269_v0  ;;  %vm466_vm14 = vweird.f32 %v5278_v7 }
  0xa0   : > { %v442_v4 = vmul.f32 0.5, %v441_v63  ;;  %v461_v25 = vmul.f32 %v5278_v7, %v460_v15  ;;  %v5307_v28 = vmul.f32 0.3155117, %v751_v20  ;;  %vm467_vm1 = vmor %vm465_vm15, %vm466_vm14 }
  0xa1   : > { %v5280_v10 = vmul.f32 0.3155117, %v749_v6  ;;  %v472_v22 = vmul.f32 0.5, %v471_v13  ;;  %v336_v35 = vpop.xlane.xlu2 %335  ;;  %v333_v39 = vpop.xlane.xlu1 %332  ;;  %v481_v41 = vmul.f32 %v5298_v24, %v480_v30 }
  0xa2   : > { %v443_v8 = vsub.f32 1.5, %v442_v4  ;;  %v5302_v26 = vpop.eup %4437  ;;  %v462_v32 = vmul.f32 0.5, %v461_v25  ;;  %v879_v37 = vmul.f32 2.0, %v5307_v28  ;;  %v5327_v45 = vmax.f32 %v336_v35, 1e-15  ;;  %v330_v50 = vpop.xlane.xlu0 %329 }
  0xa3   : > { %v877_v14 = vmul.f32 2.0, %v5280_v10  ;;  %v473_v29 = vsub.f32 1.5, %v472_v22  ;;  %v510_v33 = vmul.f32 %v5302_v26, %v5275_v5  ;;  %v5335_v51 = vmul.f32 0.5, %v481_v41 }
  0xa4   : > { %v444_v17 = vmul.f32 %v4430_v57, %v443_v8  ;;  %v463_v43 = vsub.f32 1.5, %v462_v32  ;;  %v913_v47 = vmul.f32 1.442695, %v879_v37  ;;  %v5342_v56 = vmax.f32 %v333_v39, 1e-15 }
  0xa5   : > { %v909_v19 = vmul.f32 1.442695, %v877_v14  ;;  %v474_v42 = vmul.f32 %v5267_v60, %v473_v29  ;;  %v5349_v61 = vmax.f32 %v330_v50, 1e-15  ;;  %vm516_vm5 = vweird.f32 %v5302_v26 }
  0xa6   : > { %v5295_v21 = vsel %vm447_vm10, %v4430_v57, %v444_v17  ;;  %v464_v57 = vmul.f32 %v5278_v7, %v463_v43  ;;  %vm517_vm7 = vmor %vm515_vm0, %vm516_vm5  ;;  %v1634_v43 = vpop.f32.mrf.mxu0 }
  0xa7   : > { %4439 = vpow2.f32 %v909_v19  ;;  %v750_v23 = vmul.f32 %v5295_v21, %v398_v44  ;;  %v511_v44 = vmul.f32 %v5302_v26, %v510_v33  ;;  %v5339_v52 = vsel %vm477_vm13, %v5267_v60, %v474_v42 }
  0xa8   : > { %4441 = vrsqrt.f32 %v5290_v16  ;;  %v5361_v4 = vmul.f32 %v5339_v52, %v5261_v46  ;;  %v5366_v11 = vsel %vm467_vm1, %v5278_v7, %v464_v57  ;;  %vm525_vm0 = vweird.f32 %v5349_v61 }
  0xa9   : > { %4443 = vrsqrt.f32 %v5292_v18  ;;  %v5305_v27 = vmul.f32 0.3155117, %v750_v23  ;;  %v512_v54 = vmul.f32 0.5, %v511_v44  ;;  %v345_v3 = vpop.xlane.xlu2 %344  ;;  %v342_v9 = vpop.xlane.xlu1 %341  ;;  %v752_v22 = vmul.f32 %v5366_v11, %v5264_v55 }
  0xaa   : > { %v5378_v19 = vmax.f32 %v345_v3, 1e-15  ;;  %v5382_v20 = vmax.f32 %v342_v9, 1e-15  ;;  %v339_v29 = vpop.xlane.xlu0 %338 }
  0xab   : > { %v878_v31 = vmul.f32 2.0, %v5305_v27  ;;  %v513_v6 = vsub.f32 1.5, %v512_v54  ;;  %v5397_v37 = vmul.f32 0.3155117, %v752_v22 }
  0xac   : > { %8742 = vst [vmem:[#allocation4_spill] sm:$0xff] %v5378_v19 }
  0xad   : > { %v5314_v34 = vpop.eup %4439  ;;  %v911_v36 = vmul.f32 1.442695, %v878_v31  ;;  %8743 = vst [vmem:[#allocation5_spill] sm:$0xff] %v5382_v20  ;;  %v514_v30 = vmul.f32 %v5302_v26, %v513_v6 }
  0xae   : > { %v5319_v38 = vpop.eup %4441  ;;  %4445 = vrcp.f32 %v5314_v34  ;;  %v984_v8 = vand.u32 2147483648, %v5314_v34  ;;  %v982_v14 = vand.u32 2147483647, %v5314_v34  ;;  %vm978_vm3 = vweird.f32 %v5314_v34 }
  0xaf   : > { %8741 = vst [vmem:[#allocation3_spill] sm:$0xff] %v5319_v38  ;;  %v5322_v40 = vpop.eup %4443  ;;  %4447 = vpow2.f32 %v911_v36  ;;  %v500_v48 = vmul.f32 %v5319_v38, %v5290_v16  ;;  %v5400_v39 = vsel %vm517_vm7, %v5302_v26, %v514_v30 }
  0xb0   : > { %v490_v49 = vmul.f32 %v5322_v40, %v5292_v18  ;;  %4449 = vpow2.f32 %v913_v47  ;;  %v985_v25 = vor.u32 1.1754944e-38, %v984_v8  ;;  %vm983_vm6 = vcmp.eq.f32.partialorder %v982_v14, 8.507059e+37  ;;  %v5431_v14 = vld [vmem:[%s8637_s2] ss:$0 sm:$0xff] }
  0xb1   : > { %4451 = vrsqrt.f32 %v5327_v45  ;;  %v501_v60 = vmul.f32 %v5319_v38, %v500_v48  ;;  %v5406_v48 = vmax.f32 %v339_v29, 1e-15  ;;  %v757_v26 = vmul.f32 %v5400_v39, %v5275_v5  ;;  %v354_v29 = vpop.xlane.xlu2 %353 }
  0xb2   : > { %v491_v62 = vmul.f32 %v5322_v40, %v490_v49 }
  0xb3   : > { %v5374_v46 = vmul.f32 0.5, %v501_v60  ;;  %8744 = vst [vmem:[#allocation6_spill] sm:$0xff] %v5406_v48 }
  0xb4   : > { %v4446_v53 = vpop.eup %4445  ;;  %v5376_v17 = vmul.f32 0.5, %v491_v62 }
  0xb5   : > { %v5345_v58 = vpop.eup %4447  ;;  %v974_v59 = vmul.f32 %v4446_v53, %v5314_v34  ;;  %vm979_vm2 = vweird.f32 %v4446_v53 }
  0xb6   : > { %4453 = vrcp.f32 %v5345_v58  ;;  %v5368_v13 = vpop.eup %4449  ;;  %vm980_vm4 = vmor %vm978_vm3, %vm979_vm2  ;;  %v999_v47 = vand.u32 2147483648, %v5345_v58  ;;  %vm993_vm9 = vweird.f32 %v5345_v58 }
  0xb7   : > { %4455 = vtanh.f32 %v5280_v10  ;;  %v975_v2 = vsub.f32 1.0, %v974_v59  ;;  %v5372_v15 = vpop.eup %4451  ;;  %v1012_v8 = vand.u32 2147483647, %v5368_v13  ;;  %v1014_v9 = vand.u32 2147483648, %v5368_v13 }
  0xb8   : > { %4457 = vrsqrt.f32 %v5342_v56  ;;  %v540_v33 = vmul.f32 %v5372_v15, %v5327_v45  ;;  %v1000_v3 = vor.u32 1.1754944e-38, %v999_v47  ;;  %vm1008_vm13 = vweird.f32 %v5368_v13 }
  0xb9   : > { %v976_v10 = vmul.f32 %v4446_v53, %v975_v2  ;;  %4459 = vrsqrt.f32 %v5349_v61  ;;  %vm1013_vm15 = vcmp.eq.f32.partialorder %v1012_v8, 8.507059e+37  ;;  %v5450_v47 = vmax.f32 %v354_v29, 1e-15 }
  0xba   : > { %4461 = vrcp.f32 %v5368_v13 }
  0xbb   : > { %v977_v7 = vadd.f32 %v4446_v53, %v976_v10  ;;  %4463 = vtanh.f32 %v5307_v28  ;;  %v997_v28 = vand.u32 2147483647, %v5345_v58 }
  0xbc   : > { %v4454_v23 = vpop.eup %4453  ;;  %4465 = vrsqrt.f32 %v5378_v19 }
  0xbd   : > { %v4456_v31 = vpop.eup %4455  ;;  %v981_v32 = vsel %vm980_vm4, %v4446_v53, %v977_v7  ;;  %v989_v35 = vmul.f32 %v4454_v23, %v5345_v58  ;;  %v880_v53 = vmul.f32 2.0, %v5397_v37  ;;  %vm994_vm8 = vweird.f32 %v4454_v23  ;;  %v5436_v7 = vld [vmem:[%s8638_s3] ss:$0 sm:$0xff] }
  0xbe   : > { %v5394_v55 = vpop.eup %4457  ;;  %v986_v36 = vsel %vm983_vm6, %v985_v25, %v981_v32  ;;  %v845_v50 = vmul.f32 %v4456_v31, %v5271_v1  ;;  %4467 = vtanh.f32 %v5305_v27  ;;  %vm5416_vm10 = vcmp.eq.f32.partialorder %v997_v28, 8.507059e+37  ;;  %vm5420_vm11 = vmor %vm993_vm9, %vm994_vm8 }
  0xbf   : > { %v5402_v41 = vpop.eup %4459  ;;  %v1453_v42 = vadd.f32 %v5314_v34, %v986_v36  ;;  %v990_v44 = vsub.f32 1.0, %v989_v35  ;;  %v915_v1 = vmul.f32 1.442695, %v880_v53  ;;  %v5426_v27 = vmul.f32 0.3155117, %v757_v26 }
  0xc0   : > { %v4462_v49 = vpop.eup %4461  ;;  %v541_v31 = vmul.f32 %v5372_v15, %v540_v33  ;;  %v520_v32 = vmul.f32 %v5402_v41, %v5349_v61  ;;  %vm526_vm2 = vweird.f32 %v5402_v41 }
  0xc1   : > { %v1485_v54 = vmul.f32 0.5, %v1453_v42  ;;  %v991_v57 = vmul.f32 %v4454_v23, %v990_v44  ;;  %v1004_v34 = vmul.f32 %v4462_v49, %v5368_v13  ;;  %v4464_v59 = vpop.eup %4463  ;;  %4469 = vpow2.f32 %v915_v1  ;;  %vm527_vm6 = vmor %vm525_vm0, %vm526_vm2 }
  0xc2   : > { %vm1009_vm12 = vweird.f32 %v4462_v49  ;;  %v5440_v30 = vpop.eup %4465  ;;  %4471 = vrsqrt.f32 %v5382_v20  ;;  %v1015_v44 = vor.u32 1.1754944e-38, %v1014_v9  ;;  %v885_v33 = vmul.f32 2.0, %v5426_v27 }
  0xc3   : > { %v1730_v62 = vadd.f32 1.0, %v1485_v54  ;;  %v992_v2 = vadd.f32 %v4454_v23, %v991_v57  ;;  %v1005_v6 = vsub.f32 1.0, %v1004_v34  ;;  %8749 = vst [vmem:[#allocation7_spill] sm:$0xff] %v5440_v30  ;;  %vm1010_vm14 = vmor %vm1008_vm13, %vm1009_vm12  ;;  %v1864_v53 = vmul.f32 %v5436_v7, %v1485_v54  ;;  %v1637_v57 = vpop.f32.mrf.mxu0  ;;  %v351_v54 = vpop.xlane.xlu1 %350 }
  0xc4   : > { %4473 = vrsqrt.f32 %v5406_v48  ;;  %v925_v1 = vmul.f32 1.442695, %v885_v33  ;;  %v521_v8 = vmul.f32 %v5402_v41, %v520_v32  ;;  %v570_v9 = vmul.f32 %v5440_v30, %v5378_v19 }
  0xc5   : > { %v1762_v10 = vmul.f32 %v1730_v62, %v845_v50  ;;  %v996_v22 = vsel %vm5420_vm11, %v4454_v23, %v992_v2  ;;  %v1006_v25 = vmul.f32 %v4462_v49, %v1005_v6  ;;  %v4468_v23 = vpop.eup %4467  ;;  %v847_v29 = vmul.f32 %v4464_v59, %v5283_v12 }
  0xc6   : > { %v1001_v35 = vsel %vm5416_vm10, %v1000_v3, %v996_v22  ;;  %v846_v2 = vmul.f32 %v4468_v23, %v5295_v21  ;;  %v571_v33 = vmul.f32 %v5440_v30, %v570_v9 }
  0xc7   : > { %v1794_v36 = vmul.f32 %v1762_v10, %v1634_v43  ;;  %v1454_v28 = vadd.f32 %v5345_v58, %v1001_v35  ;;  %v1007_v42 = vadd.f32 %v4462_v49, %v1006_v25  ;;  %v5455_v34 = vpop.eup %4469  ;;  %v530_v58 = vmul.f32 %v5394_v55, %v5342_v56 }
  0xc8   : > { %v5464_v5 = vpop.eup %4471  ;;  %4475 = vrcp.f32 %v5455_v34  ;;  %vm1023_vm3 = vweird.f32 %v5455_v34 }
  0xc9   : > { %v1829_v50 = vmul.f32 %v5431_v14, %v1794_v36  ;;  %v1486_v26 = vmul.f32 0.5, %v1454_v28  ;;  %v1011_v43 = vsel %vm1010_vm14, %v4462_v49, %v1007_v42  ;;  %8751 = vst [vmem:[#allocation9_spill] sm:$0xff] %v5464_v5  ;;  %v5466_v49 = vmul.f32 0.5, %v541_v31 }
  0xca   : > { %v1016_v60 = vsel %vm1013_vm15, %v1015_v44, %v1011_v43  ;;  %4477 = vrsqrt.f32 %v5450_v47  ;;  %v531_v25 = vmul.f32 %v5394_v55, %v530_v58  ;;  %v5478_v31 = vmax.f32 %v351_v54, 1e-15  ;;  %v5484_v42 = vpop.eup %4473 }
  0xcb   : > { %v5460_v62 = vsub.f32 %v1829_v50, %v1864_v53  ;;  %v1731_v3 = vadd.f32 1.0, %v1486_v26  ;;  %v1455_v6 = vadd.f32 %v5368_v13, %v1016_v60  ;;  %v348_v13 = vpop.xlane.xlu0 %347  ;;  %4479 = vpow2.f32 %v925_v1  ;;  %8752 = vst [vmem:[#allocation10_spill] sm:$0xff] %v5484_v42  ;;  %v1640_v54 = vpop.f32.mrf.mxu0 }
  0xcc   : > { %v560_v36 = vmul.f32 %v5464_v5, %v5382_v20  ;;  %v522_v44 = vmul.f32 0.5, %v521_v8  ;;  %v5488_v50 = vmax.f32 %v348_v13, 1e-15  ;;  %v1865_v1 = vmul.f32 %v5436_v7, %v1486_v26 }
  0xcd   : > { %8750 = vst [vmem:[#allocation8_spill] sm:$0xff] %v5460_v62  ;;  %v5473_v10 = vand.u32 2147483647, %v5460_v62  ;;  %v1763_v22 = vmul.f32 %v1731_v3, %v846_v2  ;;  %v1487_v21 = vmul.f32 0.5, %v1455_v6  ;;  %4481 = vrsqrt.f32 %v5478_v31 }
  0xce   : > { %8753 = vst [vmem:[#allocation11_spill] sm:$0xff] %v5488_v50  ;;  %v5496_v43 = vpop.eup %4475  ;;  %v5506_v3 = vmul.f32 0.5, %v531_v25  ;;  %v550_v6 = vmul.f32 %v5484_v42, %v5406_v48  ;;  %v523_v13 = vsub.f32 1.5, %v522_v44  ;;  %vm485_vm15 = vweird.f32 %v5269_v0 }
  0xcf   : > { %v1960_v32 = vmul.f32 %v5473_v10, %v5473_v10  ;;  %v1795_v35 = vmul.f32 %v1763_v22, %v1637_v57  ;;  %v1732_v28 = vadd.f32 1.0, %v1487_v21  ;;  %v5494_v57 = vmul.f32 0.3155117, %v5361_v4 }
  0xd0   : > { %v5503_v2 = vpop.eup %4477  ;;  %v561_v4 = vmul.f32 %v5464_v5, %v560_v36  ;;  %v1019_v26 = vmul.f32 %v5496_v43, %v5455_v34  ;;  %v1866_v36 = vmul.f32 %v5436_v7, %v1487_v21  ;;  %v1029_v21 = vand.u32 2147483648, %v5455_v34 }
  0xd1   : > { %v5490_v12 = vadd.f32 1.0, %v1960_v32  ;;  %v1830_v59 = vmul.f32 %v5431_v14, %v1795_v35  ;;  %v1764_v53 = vmul.f32 %v1732_v28, %v847_v29  ;;  %v5511_v8 = vpop.eup %4479  ;;  %v5518_v29 = vmul.f32 0.5, %v571_v33 }
  0xd2   : > { %v881_v25 = vmul.f32 2.0, %v5494_v57  ;;  %v1020_v28 = vsub.f32 1.0, %v1019_v26  ;;  %v600_v44 = vmul.f32 %v5503_v2, %v5450_v47  ;;  %vm1024_vm1 = vweird.f32 %v5496_v43 }
  0xd3   : > { %4483 = vrsqrt.f32 %v5490_v12  ;;  %v5513_v9 = vsub.f32 %v1830_v59, %v1865_v1  ;;  %v1796_v22 = vmul.f32 %v1764_v53, %v1640_v54  ;;  %8755 = vst [vmem:[#allocation13_spill] sm:$0xff] %v5518_v29  ;;  %v5527_v59 = vmul.f32 0.5, %v561_v4  ;;  %v5533_v33 = vpop.eup %4481  ;;  %vm1025_vm4 = vmor %vm1023_vm3, %vm1024_vm1  ;;  %v1643_v48 = vpop.f32.mrf.mxu0 }
  0xd4   : > { %4485 = vrsqrt.f32 %v5488_v50  ;;  %v551_v53 = vmul.f32 %v5484_v42, %v550_v6  ;;  %v1027_v6 = vand.u32 2147483647, %v5455_v34  ;;  %v917_v26 = vmul.f32 1.442695, %v881_v25  ;;  %v363_v25 = vpop.xlane.xlu2 %362 }
  0xd5   : > { %8754 = vst [vmem:[#allocation12_spill] sm:$0xff] %v5513_v9  ;;  %4487 = vrcp.f32 %v5511_v8  ;;  %v5523_v32 = vand.u32 2147483647, %v5513_v9  ;;  %v1831_v35 = vmul.f32 %v5431_v14, %v1796_v22  ;;  %v1021_v22 = vmul.f32 %v5496_v43, %v1020_v28 }
  0xd6   : > { %8756 = vst [vmem:[#allocation14_spill] sm:$0xff] %v5527_v59  ;;  %4489 = vtanh.f32 %v5397_v37  ;;  %v524_v37 = vmul.f32 %v5402_v41, %v523_v13  ;;  %vm1028_vm5 = vcmp.eq.f32.partialorder %v1027_v6, 8.507059e+37  ;;  %v5576_v13 = vmul.f32 0.5, %v551_v53 }
  0xd7   : > { %v1961_v1 = vmul.f32 %v5523_v32, %v5523_v32  ;;  %v5537_v54 = vsub.f32 %v1831_v35, %v1866_v36  ;;  %v1022_v36 = vadd.f32 %v5496_v43, %v1021_v22  ;;  %4491 = vpow2.f32 %v917_v26 }
  0xd8   : > { %v1030_v22 = vor.u32 1.1754944e-38, %v1029_v21  ;;  %8759 = vst [vmem:[#allocation17_spill] sm:$0xff] %v5576_v13  ;;  %v590_v29 = vmul.f32 %v5533_v33, %v5478_v31  ;;  %v5590_v53 = vmax.f32 %v363_v25, 1e-15  ;;  %vm1098_vm8 = vweird.f32 %v5511_v8 }
  0xd9   : > { %8757 = vst [vmem:[#allocation15_spill] sm:$0xff] %v5537_v54  ;;  %v5541_v4 = vpop.eup %4483  ;;  %v5548_v60 = vadd.f32 1.0, %v1961_v1  ;;  %v5551_v35 = vand.u32 2147483647, %v5537_v54  ;;  %v601_v1 = vmul.f32 %v5503_v2, %v600_v44  ;;  %v1026_v62 = vsel %vm1025_vm4, %v5496_v43, %v1022_v36 }
  0xda   : > { %v5546_v23 = vpop.eup %4485  ;;  %v2025_v58 = vmul.f32 %v5541_v4, %v5490_v12  ;;  %v1031_v21 = vsel %vm1028_vm5, %v1030_v22, %v1026_v62  ;;  %v5579_v54 = vsel %vm527_vm6, %v5402_v41, %v524_v37  ;;  %v1102_v41 = vand.u32 2147483647, %v5511_v8 }
  0xdb   : > { %8758 = vst [vmem:[#allocation16_spill] sm:$0xff] %v5546_v23  ;;  %v5555_v28 = vpop.eup %4487  ;;  %4493 = vrsqrt.f32 %v5548_v60  ;;  %v1962_v9 = vmul.f32 %v5551_v35, %v5551_v35  ;;  %v1456_v36 = vadd.f32 %v5455_v34, %v1031_v21  ;;  %v5585_v30 = vmul.f32 0.5, %v601_v1 }
  0xdc   : > { %v4490_v63 = vpop.eup %4489  ;;  %v1094_v26 = vmul.f32 %v5555_v28, %v5511_v8  ;;  %v2026_v43 = vmul.f32 %v5541_v4, %v2025_v58  ;;  %4495 = vtanh.f32 %v5426_v27  ;;  %v1104_v58 = vand.u32 2147483648, %v5511_v8  ;;  %v360_v27 = vpop.xlane.xlu1 %359 }
  0xdd   : > { %v5582_v6 = vadd.f32 1.0, %v1962_v9  ;;  %v5592_v62 = vpop.eup %4491  ;;  %v758_v34 = vmul.f32 %v5579_v54, %v5349_v61  ;;  %v1488_v37 = vmul.f32 0.5, %v1456_v36  ;;  %vm1099_vm7 = vweird.f32 %v5555_v28 }
  0xde   : > { %v1095_v19 = vsub.f32 1.0, %v1094_v26  ;;  %v2027_v25 = vmul.f32 0.5, %v2026_v43  ;;  %v580_v26 = vmul.f32 %v5546_v23, %v5488_v50  ;;  %v848_v21 = vmul.f32 %v4490_v63, %v5366_v11  ;;  %vm1100_vm9 = vmor %vm1098_vm8, %vm1099_vm7 }
  0xdf   : > { %4497 = vrsqrt.f32 %v5582_v6  ;;  %v1733_v61 = vadd.f32 1.0, %v1488_v37  ;;  %v1105_v36 = vor.u32 1.1754944e-38, %v1104_v58  ;;  %v5613_v43 = vmax.f32 %v360_v27, 1e-15 }
  0xe0   : > { %v1096_v1 = vmul.f32 %v5555_v28, %v1095_v19  ;;  %4499 = vrcp.f32 %v5592_v62  ;;  %v5615_v5 = vmul.f32 0.3155117, %v758_v34  ;;  %vm1103_vm10 = vcmp.eq.f32.partialorder %v1102_v41, 8.507059e+37 }
  0xe1   : > { %v5599_v9 = vpop.eup %4493  ;;  %4501 = vrsqrt.f32 %v5590_v53  ;;  %v1765_v20 = vmul.f32 %v1733_v61, %v848_v21  ;;  %v581_v16 = vmul.f32 %v5546_v23, %v580_v26  ;;  %v1867_v61 = vmul.f32 %v5436_v7, %v1488_v37 }
  0xe2   : > { %v2037_v22 = vmul.f32 %v5599_v9, %v5548_v60  ;;  %v1097_v44 = vadd.f32 %v5555_v28, %v1096_v1  ;;  %v4496_v59 = vpop.eup %4495  ;;  %v2028_v1 = vsub.f32 1.5, %v2027_v25  ;;  %4503 = vrsqrt.f32 %v5613_v43 }
  0xe3   : > { %v1797_v50 = vmul.f32 %v1765_v20, %v1643_v48  ;;  %v886_v41 = vmul.f32 2.0, %v5615_v5  ;;  %v357_v48 = vpop.xlane.xlu0 %356  ;;  %v1042_v26 = vand.u32 2147483647, %v5592_v62  ;;  %v1044_v13 = vand.u32 2147483648, %v5592_v62 }
  0xe4   : > { %v2038_v19 = vmul.f32 %v5599_v9, %v2037_v22  ;;  %v1101_v63 = vsel %vm1100_vm9, %v5555_v28, %v1097_v44  ;;  %v591_v22 = vmul.f32 %v5533_v33, %v590_v29  ;;  %v2029_v20 = vmul.f32 %v5541_v4, %v2028_v1 }
  0xe5   : > { %v5619_v11 = vpop.eup %4497  ;;  %v1106_v58 = vsel %vm1103_vm10, %v1105_v36, %v1101_v63  ;;  %v1832_v29 = vmul.f32 %v5431_v14, %v1797_v50  ;;  %v853_v36 = vmul.f32 %v4496_v59, %v5400_v39  ;;  %v5646_v37 = vmax.f32 %v357_v48, 1e-15 }
  0xe6   : > { %v4500_v27 = vpop.eup %4499  ;;  %v2049_v34 = vmul.f32 %v5619_v11, %v5582_v6  ;;  %v1461_v21 = vadd.f32 %v5511_v8, %v1106_v58  ;;  %v2039_v28 = vmul.f32 0.5, %v2038_v19  ;;  %v927_v19 = vmul.f32 1.442695, %v886_v41 }
  0xe7   : > { %v1034_v44 = vmul.f32 %v4500_v27, %v5592_v62  ;;  %v5630_v25 = vpop.eup %4501  ;;  %v5638_v42 = vsub.f32 %v1832_v29, %v1867_v61  ;;  %vm1039_vm11 = vweird.f32 %v4500_v27  ;;  %vm1038_vm12 = vweird.f32 %v5592_v62 }
  0xe8   : > { %v1493_v63 = vmul.f32 0.5, %v1461_v21  ;;  %v2050_v58 = vmul.f32 %v5619_v11, %v2049_v34  ;;  %v2040_v50 = vsub.f32 1.5, %v2039_v28  ;;  %4505 = vpow2.f32 %v927_v19  ;;  %v5648_v1 = vpop.eup %4503  ;;  %v1658_v21 = vpop.f32.mrf.mxu1  ;;  %vm1040_vm13 = vmor %vm1038_vm12, %vm1039_vm11 }
  0xe9   : > { %v1035_v8 = vsub.f32 1.0, %v1034_v44  ;;  %8760 = vst [vmem:[#allocation18_spill] sm:$0xff] %v5638_v42  ;;  %v5642_v39 = vand.u32 2147483647, %v5638_v42  ;;  %v630_v4 = vmul.f32 %v5630_v25, %v5590_v53  ;;  %v2030_v34 = vmul.f32 %v2029_v20, %v5490_v12 }
  0xea   : > { %v1738_v23 = vadd.f32 1.0, %v1493_v63  ;;  %4507 = vtanh.f32 %v5494_v57  ;;  %v2051_v44 = vmul.f32 0.5, %v2050_v58  ;;  %v1045_v29 = vor.u32 1.1754944e-38, %v1044_v13  ;;  %v372_v58 = vpop.xlane.xlu2 %371 }
  0xeb   : > { %v1036_v38 = vmul.f32 %v4500_v27, %v1035_v8  ;;  %v1963_v41 = vmul.f32 %v5642_v39, %v5642_v39  ;;  %v2041_v61 = vmul.f32 %v5599_v9, %v2040_v50  ;;  %vm1043_vm14 = vcmp.eq.f32.partialorder %v1042_v26, 8.507059e+37 }
  0xec   : > { %v1770_v59 = vmul.f32 %v1738_v23, %v853_v36  ;;  %v5657_v36 = vmul.f32 0.5, %v591_v22  ;;  %4509 = vrsqrt.f32 %v5646_v37  ;;  %vm2031_vm0 = vcmp.eq.f32.partialorder %v5490_v12, inf }
  0xed   : > { %v1037_v28 = vadd.f32 %v4500_v27, %v1036_v38  ;;  %v5659_v20 = vadd.f32 1.0, %v1963_v41  ;;  %v1872_v13 = vmul.f32 %v5436_v7, %v1493_v63  ;;  %v631_v9 = vmul.f32 %v5630_v25, %v630_v4 }
  0xee   : > { %v1802_v23 = vmul.f32 %v1770_v59, %v1658_v21  ;;  %v5663_v8 = vpop.eup %4505  ;;  %v2052_v26 = vsub.f32 1.5, %v2051_v44  ;;  %v5671_v19 = vmul.f32 0.5, %v581_v16  ;;  %v2034_v59 = vand.u32 2147483648, %v5490_v12 }
  0xef   : > { %v1041_v48 = vsel %vm1040_vm13, %v4500_v27, %v1037_v28  ;;  %v2032_v27 = vsel %vm2031_vm0, %v5490_v12, %v2030_v34  ;;  %4511 = vrsqrt.f32 %v5659_v20  ;;  %v2042_v21 = vmul.f32 %v2041_v61, %v5548_v60 }
  0xf0   : > { %v1837_v38 = vmul.f32 %v5431_v14, %v1802_v23  ;;  %v1046_v57 = vsel %vm1043_vm14, %v1045_v29, %v1041_v48  ;;  %8761 = vst [vmem:[#allocation19_spill] sm:$0xff] %v5671_v19  ;;  %v4508_v50 = vpop.eup %4507  ;;  %v620_v63 = vmul.f32 %v5648_v1, %v5613_v43  ;;  %vm2033_vm1 = vcmp.eq.f32.partialorder %v5490_v12, 0.0  ;;  %v369_v23 = vpop.xlane.xlu1 %368 }
  0xf1   : > { %v1457_v22 = vadd.f32 %v5592_v62, %v1046_v57  ;;  %4513 = vrcp.f32 %v5663_v8  ;;  %v2035_v16 = vsel %vm2033_vm1, %v2034_v59, %v2032_v27  ;;  %v5686_v44 = vmul.f32 0.5, %v631_v9 }
  0xf2   : > { %v5676_v28 = vsub.f32 %v1837_v38, %v1872_v13  ;;  %v5688_v41 = vmax.f32 %v372_v58, 1e-15  ;;  %v5690_v29 = vpop.eup %4509  ;;  %vm2043_vm2 = vcmp.eq.f32.partialorder %v5548_v60, inf  ;;  %v2053_v12 = vmul.f32 %v5619_v11, %v2052_v26 }
  0xf3   : > { %v1489_v4 = vmul.f32 0.5, %v1457_v22  ;;  %8763 = vst [vmem:[#allocation21_spill] sm:$0xff] %v5686_v44  ;;  %v849_v61 = vmul.f32 %v4508_v50, %v5339_v52  ;;  %vm535_vm3 = vweird.f32 %v5342_v56  ;;  %v2044_v38 = vsel %vm2043_vm2, %v5548_v60, %v2042_v21  ;;  %v1646_v50 = vpop.f32.mrf.mxu0 }
  0xf4   : > { %8762 = vst [vmem:[#allocation20_spill] sm:$0xff] %v5676_v28  ;;  %v5684_v34 = vand.u32 2147483647, %v5676_v28  ;;  %vm2045_vm4 = vcmp.eq.f32.partialorder %v5548_v60, 0.0  ;;  %v5701_v13 = vmul.f32 %v5648_v1, %v620_v63  ;;  %v2408_v22 = vadd.f32 %v2035_v16, %v5473_v10 }
  0xf5   : > { %8764 = vst [vmem:[#allocation22_spill] sm:$0xff] %v5688_v41  ;;  %v1734_v48 = vadd.f32 1.0, %v1489_v4  ;;  %v5703_v9 = vpop.eup %4511  ;;  %v2046_v11 = vand.u32 2147483648, %v5548_v60  ;;  %v5707_v27 = vmax.f32 %v369_v23, 1e-15  ;;  %4515 = vrsqrt.f32 %v5688_v41 }
  0xf6   : > { %v1968_v57 = vmul.f32 %v5684_v34, %v5684_v34  ;;  %v2061_v26 = vmul.f32 %v5703_v9, %v5659_v20  ;;  %vm486_vm5 = vweird.f32 %v5298_v24  ;;  %v2054_v63 = vmul.f32 %v2053_v12, %v5582_v6 }
  0xf7   : > { %v1766_v52 = vmul.f32 %v1734_v48, %v849_v61  ;;  %8765 = vst [vmem:[#allocation23_spill] sm:$0xff] %v5707_v27  ;;  %v4514_v59 = vpop.eup %4513  ;;  %v2047_v21 = vsel %vm2045_vm4, %v2046_v11, %v2044_v38  ;;  %4517 = vtanh.f32 %v5615_v5  ;;  %v610_v16 = vmul.f32 %v5690_v29, %v5646_v37  ;;  %vm487_vm6 = vmor %vm485_vm15, %vm486_vm5 }
  0xf8   : > { %v5711_v58 = vadd.f32 1.0, %v1968_v57  ;;  %v2062_v60 = vmul.f32 %v5703_v9, %v2061_v26  ;;  %v8766_v23 = vsub.f32 1.5, %v5335_v51  ;;  %v1868_v38 = vmul.f32 %v5436_v7, %v1489_v4 }
  0xf9   : > { %v1798_v10 = vmul.f32 %v1766_v52, %v1646_v50  ;;  %v1109_v12 = vmul.f32 %v4514_v59, %v5663_v8  ;;  %v2409_v5 = vadd.f32 %v2047_v21, %v5523_v32  ;;  %vm2055_vm7 = vcmp.eq.f32.partialorder %v5582_v6, inf }
  0xfa   : > { %4519 = vrsqrt.f32 %v5711_v58  ;;  %v484_v61 = vmul.f32 %v5298_v24, %v8766_v23  ;;  %v8767_v51 = vsub.f32 1.5, %v5506_v3  ;;  %v1117_v52 = vand.u32 2147483647, %v5663_v8 }
  0xfb   : > { %4521 = vlog2.f32 %v2408_v22  ;;  %v1833_v48 = vmul.f32 %v5431_v14, %v1798_v10  ;;  %v2056_v22 = vsel %vm2055_vm7, %v5582_v6, %v2054_v63  ;;  %v1110_v4 = vsub.f32 1.0, %v1109_v12  ;;  %v5739_v26 = vpop.eup %4515 }
  0xfc   : > { %4523 = vrsqrt.f32 %v5707_v27  ;;  %v534_v57 = vmul.f32 %v5394_v55, %v8767_v51  ;;  %8769 = vst [vmem:[#allocation25_spill] sm:$0xff] %v5739_v26  ;;  %v2063_v50 = vmul.f32 0.5, %v2062_v60  ;;  %v1119_v32 = vand.u32 2147483648, %v5663_v8 }
  0xfd   : > { %v5736_v11 = vsub.f32 %v1833_v48, %v1868_v38  ;;  %v5743_v21 = vsel %vm487_vm6, %v5298_v24, %v484_v61  ;;  %vm536_vm8 = vweird.f32 %v5394_v55  ;;  %v4518_v3 = vpop.eup %4517  ;;  %v1111_v63 = vmul.f32 %v4514_v59, %v1110_v4 }
  0xfe   : > { %vm1114_vm9 = vweird.f32 %v4514_v59  ;;  %v754_v23 = vmul.f32 %v5743_v21, %v5269_v0  ;;  %vm537_vm10 = vmor %vm535_vm3, %vm536_vm8  ;;  %4525 = vlog2.f32 %v2409_v5  ;;  %vm2057_vm11 = vcmp.eq.f32.partialorder %v5582_v6, 0.0 }
  0xff   : > { %8768 = vst [vmem:[#allocation24_spill] sm:$0xff] %v5736_v11  ;;  %v5747_v10 = vand.u32 2147483647, %v5736_v11  ;;  %v2058_v24 = vand.u32 2147483648, %v5582_v6  ;;  %v5758_v61 = vsel %vm537_vm10, %v5394_v55, %v534_v57  ;;  %vm595_vm12 = vweird.f32 %v5478_v31 }
 0x100   : > { %v5753_v60 = vpop.eup %4519  ;;  %v1112_v0 = vadd.f32 %v4514_v59, %v1111_v63  ;;  %vm1113_vm13 = vweird.f32 %v5663_v8  ;;  %v5764_v12 = vmul.f32 0.3155117, %v754_v23  ;;  %vm1118_vm15 = vcmp.eq.f32.partialorder %v1117_v52, 8.507059e+37  ;;  %v5781_v52 = vld [vmem:[%s8639_s4] ss:$0 sm:$0xff] }
 0x101   : > { %v4522_v48 = vpop.eup %4521  ;;  %v1964_v38 = vmul.f32 %v5747_v10, %v5747_v10  ;;  %v2059_v5 = vsel %vm2057_vm11, %v2058_v24, %v2056_v22  ;;  %v2121_v6 = vmul.f32 %v5753_v60, %v5711_v58  ;;  %vm1115_vm14 = vmor %vm1113_vm13, %vm1114_vm9  ;;  %v1120_v55 = vor.u32 1.1754944e-38, %v1119_v32 }
 0x102   : > { %v5766_v51 = vpop.eup %4523  ;;  %v2064_v57 = vsub.f32 1.5, %v2063_v50  ;;  %v1116_v62 = vsel %vm1115_vm14, %v4514_v59, %v1112_v0  ;;  %v759_v63 = vmul.f32 %v5758_v61, %v5342_v56  ;;  %v882_v22 = vmul.f32 2.0, %v5764_v12  ;;  %v366_v59 = vpop.xlane.xlu0 %365 }
 0x103   : > { %8770 = vst [vmem:[#allocation26_spill] sm:$0xff] %v5766_v51  ;;  %v5771_v4 = vadd.f32 1.0, %v1964_v38  ;;  %v1121_v28 = vsel %vm1118_vm15, %v1120_v55, %v1116_v62  ;;  %v2441_v24 = vmul.f32 0.6931472, %v4522_v48  ;;  %v5784_v50 = vmul.f32 0.5, %v5701_v13 }
 0x104   : > { %v660_v56 = vmul.f32 %v5739_v26, %v5688_v41  ;;  %v4526_v32 = vpop.eup %4525  ;;  %v2410_v62 = vadd.f32 %v2059_v5, %v5551_v35  ;;  %v2122_v38 = vmul.f32 %v5753_v60, %v2121_v6  ;;  %v611_v48 = vmul.f32 %v5690_v29, %v610_v16 }
 0x105   : > { %4527 = vrsqrt.f32 %v5771_v4  ;;  %v1462_v0 = vadd.f32 %v5663_v8, %v1121_v28  ;;  %v2065_v55 = vmul.f32 %v5703_v9, %v2064_v57  ;;  %v919_v23 = vmul.f32 1.442695, %v882_v22 }
 0x106   : > { %v5794_v13 = vmul.f32 0.3155117, %v759_v63  ;;  %v8771_v11 = vsub.f32 1.5, %v5657_v36  ;;  %v854_v41 = vmul.f32 %v4518_v3, %v5579_v54  ;;  %v5800_v44 = vmax.f32 %v366_v59, 1e-15 }
 0x107   : > { %v1494_v19 = vmul.f32 0.5, %v1462_v0  ;;  %vm596_vm0 = vweird.f32 %v5533_v33  ;;  %v2507_v35 = vmul.f32 %v5781_v52, %v2441_v24  ;;  %v661_v8 = vmul.f32 %v5739_v26, %v660_v56  ;;  %v1661_v24 = vpop.f32.mrf.mxu1 }
 0x108   : > { %v594_v42 = vmul.f32 %v5533_v33, %v8771_v11  ;;  %4529 = vpow2.f32 %v919_v23  ;;  %v887_v28 = vmul.f32 2.0, %v5794_v13  ;;  %v2443_v9 = vmul.f32 0.6931472, %v4526_v32  ;;  %vm597_vm1 = vmor %vm595_vm12, %vm596_vm0 }
 0x109   : > { %4531 = vlog2.f32 %v2410_v62  ;;  %v2123_v16 = vmul.f32 0.5, %v2122_v38  ;;  %v1739_v36 = vadd.f32 1.0, %v1494_v19  ;;  %v2066_v11 = vmul.f32 %v2065_v55, %v5659_v20 }
 0x10a   : > { %v650_v3 = vmul.f32 %v5766_v51, %v5707_v27  ;;  %v929_v5 = vmul.f32 1.442695, %v887_v28  ;;  %v5814_v6 = vsel %vm597_vm1, %v5533_v33, %v594_v42  ;;  %4533 = vrsqrt.f32 %v5800_v44  ;;  %v8794_v27 = vld [vmem:[#allocation2_spill] sm:$0xff] }
 0x10b   : > { %v5808_v54 = vpop.eup %4527  ;;  %v1771_v63 = vmul.f32 %v1739_v36, %v854_v41  ;;  %v765_v23 = vmul.f32 %v5814_v6, %v5478_v31  ;;  %vm2067_vm2 = vcmp.eq.f32.partialorder %v5659_v20, inf  ;;  %v5822_v22 = vmul.f32 0.5, %v611_v48 }
 0x10c   : > { %v2073_v57 = vmul.f32 %v5808_v54, %v5771_v4  ;;  %v5824_v56 = vmul.f32 0.5, %v661_v8  ;;  %4535 = vpow2.f32 %v929_v5  ;;  %v2539_v59 = vmul.f32 1.442695, %v2507_v35 }
 0x10d   : > { %v2508_v42 = vmul.f32 %v5781_v52, %v2443_v9  ;;  %v2124_v33 = vsub.f32 1.5, %v2123_v16  ;;  %v1803_v32 = vmul.f32 %v1771_v63, %v1661_v24  ;;  %v2068_v41 = vsel %vm2067_vm2, %v5659_v20, %v2066_v11 }
 0x10e   : > { %8772 = vst [vmem:[#allocation27_spill] sm:$0xff] %v5824_v56  ;;  %v5827_v62 = vpop.eup %4529  ;;  %v2070_v38 = vand.u32 2147483648, %v5659_v20  ;;  %v651_v31 = vmul.f32 %v5766_v51, %v650_v3  ;;  %v5832_v0 = vmul.f32 0.3155117, %v765_v23  ;;  %v2074_v55 = vmul.f32 %v5808_v54, %v2073_v57 }
 0x10f   : > { %v4532_v48 = vpop.eup %4531  ;;  %v1838_v8 = vmul.f32 %v5431_v14, %v1803_v32  ;;  %v1873_v35 = vmul.f32 %v5436_v7, %v1494_v19  ;;  %4537 = vrcp.f32 %v5827_v62  ;;  %vm2069_vm3 = vcmp.eq.f32.partialorder %v5659_v20, 0.0 }
 0x110   : > { %v5842_v36 = vpop.eup %4533  ;;  %v2541_v11 = vmul.f32 1.442695, %v2508_v42  ;;  %v2071_v3 = vsel %vm2069_vm3, %v2070_v38, %v2068_v41  ;;  %v2125_v5 = vmul.f32 %v5753_v60, %v2124_v33  ;;  %4539 = vpow2.f32 %v2539_v59  ;;  %v381_v42 = vpop.xlane.xlu2 %380 }
 0x111   : > { %8773 = vst [vmem:[#allocation28_spill] sm:$0xff] %v5842_v36  ;;  %v5845_v57 = vsub.f32 %v1838_v8, %v1873_v35  ;;  %v2445_v7 = vmul.f32 0.6931472, %v4532_v48  ;;  %v5849_v19 = vmul.f32 0.5, %v651_v31  ;;  %v893_v20 = vmul.f32 2.0, %v5832_v0 }
 0x112   : > { %v5847_v14 = vpop.eup %4535  ;;  %vm2127_vm4 = vcmp.eq.f32.partialorder %v5711_v58, inf  ;;  %v2075_v63 = vmul.f32 0.5, %v2074_v55  ;;  %v2411_v60 = vadd.f32 %v2071_v3, %v5642_v39  ;;  %vm2129_vm5 = vcmp.eq.f32.partialorder %v5711_v58, 0.0 }
 0x113   : > { %8774 = vst [vmem:[#allocation29_spill] sm:$0xff] %v5845_v57  ;;  %v5854_v23 = vand.u32 2147483647, %v5845_v57  ;;  %4541 = vrcp.f32 %v5847_v14  ;;  %v640_v24 = vmul.f32 %v5842_v36, %v5800_v44  ;;  %v941_v59 = vmul.f32 1.442695, %v893_v20  ;;  %v375_v20 = vpop.xlane.xlu0 %374 }
 0x114   : > { %8775 = vst [vmem:[#allocation30_spill] sm:$0xff] %v5849_v19  ;;  %4543 = vpow2.f32 %v2541_v11  ;;  %v2126_v32 = vmul.f32 %v2125_v5, %v5711_v58  ;;  %v2130_v41 = vand.u32 2147483648, %v5711_v58  ;;  %v5866_v31 = vmul.f32 %v5781_v52, %v2445_v7 }
 0x115   : > { %v4538_v33 = vpop.eup %4537  ;;  %v1969_v38 = vmul.f32 %v5854_v23, %v5854_v23  ;;  %4545 = vtanh.f32 %v5764_v12  ;;  %vm495_vm6 = vweird.f32 %v5292_v18  ;;  %v2076_v55 = vsub.f32 1.5, %v2075_v63  ;;  %v378_v12 = vpop.xlane.xlu1 %377 }
 0x116   : > { %v1049_v48 = vmul.f32 %v4538_v33, %v5827_v62  ;;  %4547 = vpow2.f32 %v941_v59  ;;  %v5874_v35 = vmax.f32 %v381_v42, 1e-15  ;;  %v5876_v11 = vpop.eup %4539  ;;  %v5880_v5 = vmul.f32 %v5842_v36, %v640_v24 }
 0x117   : > { %v5872_v8 = vadd.f32 1.0, %v1969_v38  ;;  %8777 = vst [vmem:[#allocation32_spill] sm:$0xff] %v5876_v11  ;;  %4549 = vlog2.f32 %v2411_v60  ;;  %v2128_v63 = vsel %vm2127_vm4, %v5711_v58, %v2126_v32  ;;  %v1057_v59 = vand.u32 2147483647, %v5827_v62 }
 0x118   : > { %8776 = vst [vmem:[#allocation31_spill] sm:$0xff] %v5874_v35  ;;  %v1050_v7 = vsub.f32 1.0, %v1049_v48  ;;  %v1059_v42 = vand.u32 2147483648, %v5827_v62  ;;  %vm2079_vm7 = vcmp.eq.f32.partialorder %v5771_v4, inf  ;;  %vm1054_vm8 = vweird.f32 %v4538_v33 }
 0x119   : > { %v4542_v16 = vpop.eup %4541  ;;  %4551 = vrsqrt.f32 %v5872_v8  ;;  %v2077_v48 = vmul.f32 %v5808_v54, %v2076_v55  ;;  %v5895_v32 = vmax.f32 %v378_v12, 1e-15  ;;  %v5897_v39 = vmax.f32 %v375_v20, 1e-15 }
 0x11a   : > { %v1051_v60 = vmul.f32 %v4538_v33, %v1050_v7  ;;  %4553 = vtanh.f32 %v5794_v13  ;;  %v1124_v24 = vmul.f32 %v4542_v16, %v5847_v14  ;;  %v5891_v38 = vpop.eup %4543  ;;  %v2131_v9 = vsel %vm2129_vm5, %v2130_v41, %v2128_v63 }
 0x11b   : > { %8778 = vst [vmem:[#allocation33_spill] sm:$0xff] %v5891_v38  ;;  %4555 = vrsqrt.f32 %v5874_v35  ;;  %v4546_v28 = vpop.eup %4545  ;;  %vm1053_vm9 = vweird.f32 %v5827_v62  ;;  %vm545_vm10 = vweird.f32 %v5327_v45  ;;  %vm2081_vm11 = vcmp.eq.f32.partialorder %v5771_v4, 0.0 }
 0x11c   : > { %v1052_v7 = vadd.f32 %v4538_v33, %v1051_v60  ;;  %v1125_v13 = vsub.f32 1.0, %v1124_v24  ;;  %v5902_v3 = vpop.eup %4547  ;;  %vm1055_vm12 = vmor %vm1053_vm9, %vm1054_vm8  ;;  %vm1058_vm13 = vcmp.eq.f32.partialorder %v1057_v59, 8.507059e+37  ;;  %v1060_v54 = vor.u32 1.1754944e-38, %v1059_v42 }
 0x11d   : > { %v1132_v55 = vand.u32 2147483647, %v5847_v14  ;;  %v1134_v12 = vand.u32 2147483648, %v5847_v14  ;;  %v4550_v58 = vpop.eup %4549  ;;  %vm1129_vm14 = vweird.f32 %v4542_v16  ;;  %4557 = vrcp.f32 %v5902_v3 }
 0x11e   : > { %v1056_v41 = vsel %vm1055_vm12, %v4538_v33, %v1052_v7  ;;  %v1126_v20 = vmul.f32 %v4542_v16, %v1125_v13  ;;  %v2416_v60 = vadd.f32 %v2131_v9, %v5684_v34  ;;  %v2078_v24 = vmul.f32 %v2077_v48, %v5771_v4 }
 0x11f   : > { %v5910_v63 = vpop.eup %4551  ;;  %v1061_v57 = vsel %vm1058_vm13, %v1060_v54, %v1056_v41  ;;  %v8779_v59 = vsub.f32 1.5, %v5376_v17  ;;  %vm1128_vm15 = vweird.f32 %v5847_v14  ;;  %v850_v34 = vmul.f32 %v4546_v28, %v5743_v21 }
 0x120   : > { %v4554_v38 = vpop.eup %4553  ;;  %v2133_v11 = vmul.f32 %v5910_v63, %v5872_v8  ;;  %v1458_v33 = vadd.f32 %v5827_v62, %v1061_v57  ;;  %v1127_v7 = vadd.f32 %v4542_v16, %v1126_v20  ;;  %vm1130_vm0 = vmor %vm1128_vm15, %vm1129_vm14  ;;  %v1135_v9 = vor.u32 1.1754944e-38, %v1134_v12 }
 0x121   : > { %v494_v42 = vmul.f32 %v5322_v40, %v8779_v59  ;;  %v5921_v13 = vpop.eup %4555  ;;  %4559 = vrsqrt.f32 %v5895_v32  ;;  %vm496_vm1 = vweird.f32 %v5322_v40  ;;  %vm605_vm2 = vweird.f32 %v5450_v47 }
 0x122   : > { %8780 = vst [vmem:[#allocation34_spill] sm:$0xff] %v5921_v13  ;;  %v2134_v17 = vmul.f32 %v5910_v63, %v2133_v11  ;;  %v1490_v48 = vmul.f32 0.5, %v1458_v33  ;;  %v1131_v54 = vsel %vm1130_vm0, %v4542_v16, %v1127_v7  ;;  %vm1133_vm3 = vcmp.eq.f32.partialorder %v1132_v55, 8.507059e+37  ;;  %vm497_vm4 = vmor %vm495_vm6, %vm496_vm1 }
 0x123   : > { %v2080_v21 = vsel %vm2079_vm7, %v5771_v4, %v2078_v24  ;;  %v1136_v62 = vsel %vm1133_vm3, %v1135_v9, %v1131_v54  ;;  %4561 = vrsqrt.f32 %v5897_v39  ;;  %v5935_v28 = vsel %vm497_vm4, %v5322_v40, %v494_v42  ;;  %v4558_v57 = vpop.eup %4557 }
 0x124   : > { %v2447_v12 = vmul.f32 0.6931472, %v4550_v58  ;;  %4563 = vlog2.f32 %v2416_v60  ;;  %v1735_v11 = vadd.f32 1.0, %v1490_v48  ;;  %v855_v16 = vmul.f32 %v4554_v38, %v5758_v61 }
 0x125   : > { %v1463_v55 = vadd.f32 %v5847_v14, %v1136_v62  ;;  %4565 = vtanh.f32 %v5832_v0  ;;  %v1214_v41 = vmul.f32 %v4558_v57, %v5902_v3  ;;  %v8781_v20 = vsub.f32 1.5, %v5466_v49  ;;  %v1649_v14 = vpop.f32.mrf.mxu0  ;;  %v5968_v62 = vld [vmem:[%s8637_s2] ss:$0 sm:$0xff] }
 0x126   : > { %v8782_v59 = vand.u32 2147483648, %v5771_v4  ;;  %v2135_v58 = vmul.f32 0.5, %v2134_v17  ;;  %v1767_v60 = vmul.f32 %v1735_v11, %v850_v34  ;;  %v755_v61 = vmul.f32 %v5935_v28, %v5292_v18 }
 0x127   : > { %v544_v24 = vmul.f32 %v5372_v15, %v8781_v20  ;;  %v5950_v38 = vpop.eup %4559  ;;  %v1495_v0 = vmul.f32 0.5, %v1463_v55  ;;  %v1215_v42 = vsub.f32 1.0, %v1214_v41  ;;  %vm1218_vm5 = vweird.f32 %v5902_v3  ;;  %v5974_v55 = vld [vmem:[%s8638_s3] ss:$0 sm:$0xff] }
 0x128   : > { %v2083_v40 = vsel %vm2081_vm11, %v8782_v59, %v2080_v21  ;;  %vm546_vm6 = vweird.f32 %v5372_v15  ;;  %v1799_v49 = vmul.f32 %v1767_v60, %v1649_v14  ;;  %v1222_v33 = vand.u32 2147483647, %v5902_v3 }
 0x129   : > { %v1224_v4 = vand.u32 2147483648, %v5902_v3  ;;  %v5956_v7 = vmul.f32 0.3155117, %v755_v61  ;;  %vm547_vm7 = vmor %vm545_vm10, %vm546_vm6  ;;  %v5960_v18 = vpop.eup %4561  ;;  %v1740_v34 = vadd.f32 1.0, %v1495_v0  ;;  %v1216_v9 = vmul.f32 %v4558_v57, %v1215_v42  ;;  %v1664_v61 = vpop.f32.mrf.mxu1 }
 0x12a   : > { %vm1219_vm8 = vweird.f32 %v4558_v57  ;;  %v5963_v17 = vsel %vm547_vm7, %v5372_v15, %v544_v24  ;;  %v4564_v54 = vpop.eup %4563  ;;  %v2136_v21 = vsub.f32 1.5, %v2135_v58  ;;  %v1834_v11 = vmul.f32 %v5968_v62, %v1799_v49 }
 0x12b   : > { %v1869_v41 = vmul.f32 %v5974_v55, %v1490_v48  ;;  %v883_v20 = vmul.f32 2.0, %v5956_v7  ;;  %v4566_v15 = vpop.eup %4565  ;;  %v1772_v24 = vmul.f32 %v1740_v34, %v855_v16  ;;  %v1217_v59 = vadd.f32 %v4558_v57, %v1216_v9  ;;  %vm1220_vm10 = vmor %vm1218_vm5, %vm1219_vm8 }
 0x12c   : > { %v760_v58 = vmul.f32 %v5963_v17, %v5327_v45  ;;  %vm606_vm9 = vweird.f32 %v5503_v2  ;;  %v1225_v14 = vor.u32 1.1754944e-38, %v1224_v4  ;;  %v8784_v48 = vsub.f32 1.5, %v5585_v30 }
 0x12d   : > { %v5981_v60 = vsub.f32 %v1834_v11, %v1869_v41  ;;  %v921_v42 = vmul.f32 1.442695, %v883_v20  ;;  %v1804_v16 = vmul.f32 %v1772_v24, %v1664_v61  ;;  %v1221_v34 = vsel %vm1220_vm10, %v4558_v57, %v1217_v59  ;;  %vm607_vm12 = vmor %vm605_vm2, %vm606_vm9 }
 0x12e   : > { %v604_v49 = vmul.f32 %v5503_v2, %v8784_v48  ;;  %vm1223_vm11 = vcmp.eq.f32.partialorder %v1222_v33, 8.507059e+37  ;;  %v5989_v9 = vmul.f32 0.3155117, %v760_v58  ;;  %v2137_v45 = vmul.f32 %v5910_v63, %v2136_v21 }
 0x12f   : > { %8783 = vst [vmem:[#allocation35_spill] sm:$0xff] %v5981_v60  ;;  %v5995_v11 = vand.u32 2147483647, %v5981_v60  ;;  %v1226_v41 = vsel %vm1223_vm11, %v1225_v14, %v1221_v34  ;;  %4567 = vpow2.f32 %v921_v42  ;;  %v1839_v4 = vmul.f32 %v5968_v62, %v1804_v16 }
 0x130   : > { %v1874_v30 = vmul.f32 %v5974_v55, %v1495_v0  ;;  %v1469_v20 = vadd.f32 %v5902_v3, %v1226_v41  ;;  %v888_v57 = vmul.f32 2.0, %v5989_v9  ;;  %v2510_v33 = vmul.f32 %v5781_v52, %v2447_v12 }
 0x131   : > { %v2457_v24 = vmul.f32 0.6931472, %v4564_v54  ;;  %v1965_v59 = vmul.f32 %v5995_v11, %v5995_v11  ;;  %v6005_v63 = vsel %vm607_vm12, %v5503_v2, %v604_v49  ;;  %v690_v61 = vmul.f32 %v5921_v13, %v5874_v35 }
 0x132   : > { %v6007_v21 = vsub.f32 %v1839_v4, %v1874_v30  ;;  %v1501_v58 = vmul.f32 0.5, %v1469_v20  ;;  %v931_v0 = vmul.f32 1.442695, %v888_v57  ;;  %v2412_v3 = vadd.f32 %v2083_v40, %v5747_v10 }
 0x133   : > { %v6012_v14 = vadd.f32 1.0, %v1965_v59  ;;  %v861_v12 = vmul.f32 %v4566_v15, %v5814_v6  ;;  %v766_v54 = vmul.f32 %v6005_v63, %v5450_v47  ;;  %v2138_v42 = vmul.f32 %v2137_v45, %v5872_v8 }
 0x134   : > { %8785 = vst [vmem:[#allocation36_spill] sm:$0xff] %v6007_v21  ;;  %v6019_v2 = vand.u32 2147483647, %v6007_v21  ;;  %v1746_v48 = vadd.f32 1.0, %v1501_v58  ;;  %4569 = vpow2.f32 %v931_v0  ;;  %v2543_v16 = vmul.f32 1.442695, %v5866_v31  ;;  %v1682_v31 = vpop.f32.mrf.mxu2 }
 0x135   : > { %v6021_v49 = vpop.eup %4567  ;;  %v2515_v10 = vmul.f32 %v5781_v52, %v2457_v24  ;;  %v6026_v40 = vmul.f32 0.5, %v5880_v5  ;;  %4571 = vrsqrt.f32 %v6012_v14  ;;  %v680_v15 = vmul.f32 %v5950_v38, %v5895_v32 }
 0x136   : > { %v1970_v47 = vmul.f32 %v6019_v2, %v6019_v2  ;;  %v1778_v6 = vmul.f32 %v1746_v48, %v861_v12  ;;  %4573 = vrcp.f32 %v6021_v49  ;;  %v2545_v34 = vmul.f32 1.442695, %v2510_v33 }
 0x137   : > { %4575 = vlog2.f32 %v2412_v3  ;;  %vm2139_vm13 = vcmp.eq.f32.partialorder %v5872_v8, inf  ;;  %v6035_v45 = vmul.f32 0.3155117, %v766_v54  ;;  %v691_v30 = vmul.f32 %v5921_v13, %v690_v61 }
 0x138   : > { %v2140_v5 = vsel %vm2139_vm13, %v5872_v8, %v2138_v42  ;;  %v6038_v41 = vadd.f32 1.0, %v1970_v47  ;;  %v1810_v4 = vmul.f32 %v1778_v6, %v1682_v31  ;;  %4577 = vpow2.f32 %v2543_v16 }
 0x139   : > { %v2555_v20 = vmul.f32 1.442695, %v2515_v10  ;;  %v2142_v57 = vand.u32 2147483648, %v5872_v8  ;;  %v894_v24 = vmul.f32 2.0, %v6035_v45  ;;  %vm2141_vm14 = vcmp.eq.f32.partialorder %v5872_v8, 0.0 }
 0x13a   : > { %v6043_v33 = vpop.eup %4569  ;;  %4579 = vrsqrt.f32 %v6038_v41  ;;  %v681_v59 = vmul.f32 %v5950_v38, %v680_v15  ;;  %v670_v0 = vmul.f32 %v5960_v18, %v5897_v39  ;;  %v1845_v61 = vmul.f32 %v5968_v62, %v1810_v4 }
 0x13b   : > { %v4572_v3 = vpop.eup %4571  ;;  %v2143_v12 = vsel %vm2141_vm14, %v2142_v57, %v2140_v5  ;;  %v1880_v54 = vmul.f32 %v5974_v55, %v1501_v58  ;;  %4581 = vrcp.f32 %v6043_v33  ;;  %v6055_v16 = vmul.f32 0.5, %v691_v30 }
 0x13c   : > { %v4574_v42 = vpop.eup %4573  ;;  %4583 = vpow2.f32 %v2545_v34  ;;  %v2085_v8 = vmul.f32 %v4572_v3, %v6012_v14  ;;  %v943_v15 = vmul.f32 1.442695, %v894_v24  ;;  %v2417_v31 = vadd.f32 %v2143_v12, %v5854_v23  ;;  %v390_v12 = vpop.xlane.xlu2 %389 }
 0x13d   : > { %v4576_v10 = vpop.eup %4575  ;;  %4585 = vpow2.f32 %v2555_v20  ;;  %v6057_v47 = vsub.f32 %v1845_v61, %v1880_v54  ;;  %v1064_v6 = vmul.f32 %v4574_v42, %v6021_v49  ;;  %v6061_v5 = vmul.f32 0.5, %v681_v59 }
 0x13e   : > { %v2086_v58 = vmul.f32 %v4572_v3, %v2085_v8  ;;  %4587 = vtanh.f32 %v5956_v7  ;;  %v6064_v34 = vpop.eup %4577  ;;  %v6070_v30 = vmul.f32 %v5960_v18, %v670_v0  ;;  %v6072_v61 = vmul.f32 0.6931472, %v4576_v10 }
 0x13f   : > { %8786 = vst [vmem:[#allocation37_spill] sm:$0xff] %v6057_v47  ;;  %v6067_v4 = vand.u32 2147483647, %v6057_v47  ;;  %v1065_v20 = vsub.f32 1.0, %v1064_v6  ;;  %4589 = vpow2.f32 %v943_v15  ;;  %v1072_v23 = vand.u32 2147483647, %v6021_v49 }
 0x140   : > { %8787 = vst [vmem:[#allocation38_spill] sm:$0xff] %v6064_v34  ;;  %v4580_v57 = vpop.eup %4579  ;;  %v2087_v24 = vmul.f32 0.5, %v2086_v58  ;;  %v1074_v59 = vand.u32 2147483648, %v6021_v49  ;;  %4591 = vtanh.f32 %v5989_v9  ;;  %vm1069_vm15 = vweird.f32 %v4574_v42 }
 0x141   : > { %v4582_v7 = vpop.eup %4581  ;;  %v2145_v54 = vmul.f32 %v4580_v57, %v6038_v41  ;;  %v1976_v8 = vmul.f32 %v6067_v4, %v6067_v4  ;;  %v1066_v48 = vmul.f32 %v4574_v42, %v1065_v20  ;;  %4593 = vlog2.f32 %v2417_v31 }
 0x142   : > { %v6080_v0 = vpop.eup %4583  ;;  %v2088_v10 = vsub.f32 1.5, %v2087_v24  ;;  %v1139_v6 = vmul.f32 %v4582_v7, %v6043_v33  ;;  %v6087_v60 = vmax.f32 %v390_v12, 1e-15  ;;  %vm1068_vm0 = vweird.f32 %v6021_v49 }
 0x143   : > { %8788 = vst [vmem:[#allocation39_spill] sm:$0xff] %v6080_v0  ;;  %v6083_v15 = vpop.eup %4585  ;;  %v2146_v58 = vmul.f32 %v4580_v57, %v2145_v54  ;;  %v6085_v47 = vadd.f32 1.0, %v1976_v8  ;;  %v1067_v21 = vadd.f32 %v4574_v42, %v1066_v48  ;;  %vm6090_vm1 = vcmp.eq.f32.partialorder %v1072_v23, 8.507059e+37  ;;  %vm1070_vm2 = vmor %vm1068_vm0, %vm1069_vm15  ;;  %v387_v23 = vpop.xlane.xlu1 %386 }
 0x144   : > { %8789 = vst [vmem:[#allocation40_spill] sm:$0xff] %v6083_v15  ;;  %v4588_v34 = vpop.eup %4587  ;;  %v1075_v31 = vor.u32 1.1754944e-38, %v1074_v59  ;;  %v1140_v20 = vsub.f32 1.0, %v1139_v6  ;;  %v1147_v48 = vand.u32 2147483647, %v6043_v33  ;;  %v1149_v12 = vand.u32 2147483648, %v6043_v33 }
 0x145   : > { %v6094_v24 = vpop.eup %4589  ;;  %v2147_v0 = vmul.f32 0.5, %v2146_v58  ;;  %4595 = vrsqrt.f32 %v6085_v47  ;;  %v2089_v54 = vmul.f32 %v4572_v3, %v2088_v10  ;;  %v1071_v8 = vsel %vm1070_vm2, %v4574_v42, %v1067_v21  ;;  %v8793_v58 = vld [vmem:[#allocation3_spill] sm:$0xff] }
 0x146   : > { %v1141_v15 = vmul.f32 %v4582_v7, %v1140_v20  ;;  %vm1144_vm3 = vweird.f32 %v4582_v7  ;;  %v4592_v56 = vpop.eup %4591  ;;  %v1076_v59 = vsel %vm6090_vm1, %v1075_v31, %v1071_v8  ;;  %4597 = vrcp.f32 %v6094_v24 }
 0x147   : > { %v2148_v26 = vsub.f32 1.5, %v2147_v0  ;;  %v8792_v6 = vsub.f32 1.5, %v5374_v46  ;;  %v6106_v19 = vpop.eup %4593  ;;  %vm505_vm4 = vweird.f32 %v8794_v27  ;;  %v851_v21 = vmul.f32 %v4588_v34, %v5935_v28 }
 0x148   : > { %v1459_v3 = vadd.f32 %v6021_v49, %v1076_v59  ;;  %v1142_v42 = vadd.f32 %v4582_v7, %v1141_v15  ;;  %vm1143_vm5 = vweird.f32 %v6043_v33  ;;  %vm2091_vm6 = vcmp.eq.f32.partialorder %v6012_v14, inf  ;;  %v8795_v15 = vld [vmem:[#allocation6_spill] sm:$0xff] }
 0x149   : > { %v504_v51 = vmul.f32 %v8793_v58, %v8792_v6  ;;  %vm1145_vm7 = vmor %vm1143_vm5, %vm1144_vm3  ;;  %v1150_v0 = vor.u32 1.1754944e-38, %v1149_v12  ;;  %4599 = vrsqrt.f32 %v6087_v60  ;;  %v6114_v46 = vmax.f32 %v387_v23, 1e-15  ;;  %v1652_v6 = vpop.f32.mrf.mxu0 }
 0x14a   : > { %v2090_v10 = vmul.f32 %v2089_v54, %v6012_v14  ;;  %v1491_v9 = vmul.f32 0.5, %v1459_v3  ;;  %v1146_v31 = vsel %vm1145_vm7, %v4582_v7, %v1142_v42  ;;  %vm1148_vm8 = vcmp.eq.f32.partialorder %v1147_v48, 8.507059e+37 }
 0x14b   : > { %v6117_v20 = vpop.eup %4595  ;;  %vm2093_vm9 = vcmp.eq.f32.partialorder %v6012_v14, 0.0  ;;  %v2094_v28 = vand.u32 2147483648, %v6012_v14  ;;  %v2149_v49 = vmul.f32 %v4580_v57, %v2148_v26  ;;  %v1151_v34 = vsel %vm1148_vm8, %v1150_v0, %v1146_v31 }
 0x14c   : > { %vm555_vm10 = vweird.f32 %v8795_v15  ;;  %v2217_v12 = vmul.f32 %v6117_v20, %v6085_v47  ;;  %v1736_v8 = vadd.f32 1.0, %v1491_v9  ;;  %v856_v23 = vmul.f32 %v4592_v56, %v5963_v17  ;;  %v4598_v7 = vpop.eup %4597 }
 0x14d   : > { %4601 = vtanh.f32 %v6035_v45  ;;  %vm2151_vm11 = vcmp.eq.f32.partialorder %v6038_v41, inf  ;;  %vm2153_vm12 = vcmp.eq.f32.partialorder %v6038_v41, 0.0  ;;  %v2154_v48 = vand.u32 2147483648, %v6038_v41 }
 0x14e   : > { %v1464_v26 = vadd.f32 %v6043_v33, %v1151_v34  ;;  %v2092_v57 = vsel %vm2091_vm6, %v6012_v14, %v2090_v10  ;;  %v2218_v54 = vmul.f32 %v6117_v20, %v2217_v12  ;;  %v1768_v59 = vmul.f32 %v1736_v8, %v851_v21 }
 0x14f   : > { %v1229_v56 = vmul.f32 %v4598_v7, %v6094_v24  ;;  %v6135_v17 = vpop.eup %4599  ;;  %v2150_v45 = vmul.f32 %v2149_v49, %v6038_v41  ;;  %vm1233_vm13 = vweird.f32 %v6094_v24  ;;  %v1237_v42 = vand.u32 2147483647, %v6094_v24 }
 0x150   : > { %8796 = vst [vmem:[#allocation3_spill] sm:$0xff] %v6135_v17  ;;  %v1496_v3 = vmul.f32 0.5, %v1464_v26  ;;  %v2219_v33 = vmul.f32 0.5, %v2218_v54  ;;  %v1800_v0 = vmul.f32 %v1768_v59, %v1652_v6  ;;  %vm506_vm14 = vweird.f32 %v8793_v58  ;;  %v384_v54 = vpop.xlane.xlu0 %383  ;;  %v8799_v6 = vld [vmem:[#allocation10_spill] sm:$0xff] }
 0x151   : > { %v1230_v31 = vsub.f32 1.0, %v1229_v56  ;;  %v2095_v21 = vsel %vm2093_vm9, %v2094_v28, %v2092_v57  ;;  %v1870_v10 = vmul.f32 %v5974_v55, %v1491_v9  ;;  %v1239_v12 = vand.u32 2147483648, %v6094_v24  ;;  %vm507_vm15 = vmor %vm505_vm4, %vm506_vm14  ;;  %v8797_v57 = vld [vmem:[#allocation17_spill] sm:$0xff] }
 0x152   : > { %v1741_v34 = vadd.f32 1.0, %v1496_v3  ;;  %v1835_v8 = vmul.f32 %v5968_v62, %v1800_v0  ;;  %vm1234_vm0 = vweird.f32 %v4598_v7  ;;  %v6149_v59 = vsel %vm507_vm15, %v8793_v58, %v504_v51 }
 0x153   : > { %v4602_v49 = vpop.eup %4601  ;;  %v1231_v26 = vmul.f32 %v4598_v7, %v1230_v31  ;;  %v2152_v14 = vsel %vm2151_vm11, %v6038_v41, %v2150_v45  ;;  %v756_v28 = vmul.f32 %v6149_v59, %v8794_v27  ;;  %v8798_v56 = vsub.f32 1.5, %v8797_v57  ;;  %v1667_v31 = vpop.f32.mrf.mxu1  ;;  %vm1235_vm2 = vmor %vm1233_vm13, %vm1234_vm0 }
 0x154   : > { %v1773_v9 = vmul.f32 %v1741_v34, %v856_v23  ;;  %v2220_v35 = vsub.f32 1.5, %v2219_v33  ;;  %v6159_v0 = vsub.f32 %v1835_v8, %v1870_v10  ;;  %vm556_vm1 = vweird.f32 %v8799_v6 }
 0x155   : > { %v554_v13 = vmul.f32 %v8799_v6, %v8798_v56  ;;  %v1232_v36 = vadd.f32 %v4598_v7, %v1231_v26  ;;  %v2413_v51 = vadd.f32 %v2095_v21, %v5995_v11  ;;  %v1240_v23 = vor.u32 1.1754944e-38, %v1239_v12  ;;  %vm557_vm5 = vmor %vm555_vm10, %vm556_vm1 }
 0x156   : > { %8800 = vst [vmem:[#allocation2_spill] sm:$0xff] %v6159_v0  ;;  %v1805_v58 = vmul.f32 %v1773_v9, %v1667_v31  ;;  %v6165_v45 = vmax.f32 %v384_v54, 1e-15  ;;  %vm615_vm3 = vweird.f32 %v5646_v37  ;;  %v2155_v27 = vsel %vm2153_vm12, %v2154_v48, %v2152_v14 }
 0x157   : > { %v6171_v33 = vand.u32 2147483647, %v6159_v0  ;;  %v1236_v10 = vsel %vm1235_vm2, %v4598_v7, %v1232_v36  ;;  %vm1238_vm4 = vcmp.eq.f32.partialorder %v1237_v42, 8.507059e+37  ;;  %v1875_v11 = vmul.f32 %v5974_v55, %v1496_v3 }
 0x158   : > { %v1840_v34 = vmul.f32 %v5968_v62, %v1805_v58  ;;  %v1241_v21 = vsel %vm1238_vm4, %v1240_v23, %v1236_v10  ;;  %v6175_v8 = vmul.f32 0.3155117, %v756_v28  ;;  %v2221_v41 = vmul.f32 %v6117_v20, %v2220_v35 }
 0x159   : > { %v1966_v48 = vmul.f32 %v6171_v33, %v6171_v33  ;;  %v1470_v36 = vadd.f32 %v6094_v24, %v1241_v21  ;;  %v6186_v7 = vsel %vm557_vm5, %v8799_v6, %v554_v13  ;;  %4603 = vlog2.f32 %v2413_v51 }
 0x15a   : > { %v6190_v12 = vsub.f32 %v1840_v34, %v1875_v11  ;;  %v2511_v26 = vmul.f32 %v5781_v52, %v6072_v61  ;;  %v2418_v35 = vadd.f32 %v2155_v27, %v6019_v2  ;;  %4605 = vrsqrt.f32 %v6114_v46  ;;  %v8802_v2 = vld [vmem:[#allocation5_spill] sm:$0xff]  ;;  %v1685_v11 = vpop.f32.mrf.mxu2 }
 0x15b   : > { %v6195_v20 = vadd.f32 1.0, %v1966_v48  ;;  %v1502_v54 = vmul.f32 0.5, %v1470_v36  ;;  %v884_v13 = vmul.f32 2.0, %v6175_v8  ;;  %v761_v14 = vmul.f32 %v6186_v7, %v8795_v15 }
 0x15c   : > { %8801 = vst [vmem:[#allocation6_spill] sm:$0xff] %v6190_v12  ;;  %v6198_v24 = vand.u32 2147483647, %v6190_v12  ;;  %v2459_v9 = vmul.f32 0.6931472, %v6106_v19  ;;  %v2222_v28 = vmul.f32 %v2221_v41, %v6085_v47  ;;  %v6207_v61 = vmul.f32 0.5, %v6070_v30 }
 0x15d   : > { %4607 = vrsqrt.f32 %v6165_v45  ;;  %vm565_vm6 = vweird.f32 %v8802_v2  ;;  %v862_v56 = vmul.f32 %v4602_v49, %v6005_v63  ;;  %v1747_v6 = vadd.f32 1.0, %v1502_v54 }
 0x15e   : > { %4609 = vrsqrt.f32 %v6195_v20  ;;  %v1971_v57 = vmul.f32 %v6198_v24, %v6198_v24  ;;  %v2547_v15 = vmul.f32 1.442695, %v2511_v26  ;;  %vm2223_vm7 = vcmp.eq.f32.partialorder %v6085_v47, inf }
 0x15f   : > { %4611 = vlog2.f32 %v2418_v35  ;;  %v923_v19 = vmul.f32 1.442695, %v884_v13  ;;  %v4604_v31 = vpop.eup %4603  ;;  %v1779_v51 = vmul.f32 %v1747_v6, %v862_v56  ;;  %v6218_v58 = vmul.f32 0.3155117, %v761_v14  ;;  %v8804_v14 = vld [vmem:[#allocation14_spill] sm:$0xff] }
 0x160   : > { %v6216_v30 = vadd.f32 1.0, %v1971_v57  ;;  %v8803_v23 = vsub.f32 1.5, %v5822_v22  ;;  %v2516_v10 = vmul.f32 %v5781_v52, %v2459_v9  ;;  %v2224_v63 = vsel %vm2223_vm7, %v6085_v47, %v2222_v28  ;;  %v6226_v49 = vpop.eup %4605  ;;  %v8806_v28 = vld [vmem:[#allocation9_spill] sm:$0xff] }
 0x161   : > { %4613 = vpow2.f32 %v923_v19  ;;  %vm616_vm8 = vweird.f32 %v5690_v29  ;;  %vm2225_vm9 = vcmp.eq.f32.partialorder %v6085_v47, 0.0  ;;  %v2226_v34 = vand.u32 2147483648, %v6085_v47 }
 0x162   : > { %v614_v27 = vmul.f32 %v5690_v29, %v8803_v23  ;;  %4615 = vrsqrt.f32 %v6216_v30  ;;  %v720_v22 = vmul.f32 %v6135_v17, %v6087_v60  ;;  %vm617_vm10 = vmor %vm615_vm3, %vm616_vm8  ;;  %v2451_v41 = vmul.f32 0.6931472, %v4604_v31 }
 0x163   : > { %v6235_v21 = vpop.eup %4607  ;;  %v1811_v48 = vmul.f32 %v1779_v51, %v1685_v11  ;;  %v889_v36 = vmul.f32 2.0, %v6218_v58  ;;  %v2227_v47 = vsel %vm2225_vm9, %v2226_v34, %v2224_v63  ;;  %v8805_v9 = vsub.f32 1.5, %v8804_v14 }
 0x164   : > { %v6239_v26 = vsel %vm617_vm10, %v5690_v29, %v614_v27  ;;  %v4610_v35 = vpop.eup %4609  ;;  %vm566_vm11 = vweird.f32 %v8806_v28  ;;  %v1881_v31 = vmul.f32 %v5974_v55, %v1502_v54  ;;  %v2557_v51 = vmul.f32 1.442695, %v2516_v10 }
 0x165   : > { %v767_v13 = vmul.f32 %v6239_v26, %v5646_v37  ;;  %v564_v57 = vmul.f32 %v8806_v28, %v8805_v9  ;;  %v4612_v56 = vpop.eup %4611  ;;  %v2097_v6 = vmul.f32 %v4610_v35, %v6195_v20  ;;  %v1846_v19 = vmul.f32 %v5968_v62, %v1811_v48  ;;  %vm567_vm12 = vmor %vm565_vm6, %vm566_vm11 }
 0x166   : > { %v933_v29 = vmul.f32 1.442695, %v889_v36  ;;  %v721_v23 = vmul.f32 %v6135_v17, %v720_v22  ;;  %v710_v37 = vmul.f32 %v6226_v49, %v6114_v46  ;;  %v2512_v34 = vmul.f32 %v5781_v52, %v2451_v41 }
 0x167   : > { %v6253_v27 = vmul.f32 0.3155117, %v767_v13  ;;  %v6255_v63 = vpop.eup %4613  ;;  %v2098_v11 = vmul.f32 %v4610_v35, %v2097_v6  ;;  %v6258_v14 = vsub.f32 %v1846_v19, %v1881_v31  ;;  %v2461_v10 = vmul.f32 0.6931472, %v4612_v56 }
 0x168   : > { %4617 = vpow2.f32 %v933_v29  ;;  %v4616_v54 = vpop.eup %4615  ;;  %v2424_v22 = vadd.f32 %v2227_v47, %v6067_v4  ;;  %v6267_v48 = vsel %vm567_vm12, %v8806_v28, %v564_v57  ;;  %v6273_v9 = vmul.f32 0.5, %v721_v23 }
 0x169   : > { %8807 = vst [vmem:[#allocation17_spill] sm:$0xff] %v6258_v14  ;;  %4619 = vrcp.f32 %v6255_v63  ;;  %v2099_v41 = vmul.f32 0.5, %v2098_v11  ;;  %v2157_v36 = vmul.f32 %v4616_v54, %v6216_v30  ;;  %v6271_v13 = vand.u32 2147483647, %v6258_v14 }
 0x16a   : > { %4621 = vpow2.f32 %v2547_v15  ;;  %8808 = vst [vmem:[#allocation10_spill] sm:$0xff] %v6273_v9  ;;  %v711_v6 = vmul.f32 %v6226_v49, %v710_v37  ;;  %v895_v56 = vmul.f32 2.0, %v6253_v27  ;;  %v762_v15 = vmul.f32 %v6267_v48, %v8802_v2 }
 0x16b   : > { %4623 = vpow2.f32 %v2557_v51  ;;  %v2100_v4 = vsub.f32 1.5, %v2099_v41  ;;  %v2158_v47 = vmul.f32 %v4616_v54, %v2157_v36  ;;  %v1977_v28 = vmul.f32 %v6271_v13, %v6271_v13 }
 0x16c   : > { %v2549_v57 = vmul.f32 1.442695, %v2512_v34  ;;  %v2517_v19 = vmul.f32 %v5781_v52, %v2461_v10  ;;  %4625 = vlog2.f32 %v2424_v22  ;;  %v700_v31 = vmul.f32 %v6235_v21, %v6165_v45 }
 0x16d   : > { %v2159_v23 = vmul.f32 0.5, %v2158_v47  ;;  %v6287_v37 = vadd.f32 1.0, %v1977_v28  ;;  %4627 = vtanh.f32 %v6175_v8  ;;  %v6291_v2 = vmul.f32 0.5, %v711_v6 }
 0x16e   : > { %v6284_v29 = vpop.eup %4617  ;;  %v945_v52 = vmul.f32 1.442695, %v895_v56  ;;  %v2101_v10 = vmul.f32 %v4610_v35, %v2100_v4  ;;  %v6297_v36 = vmul.f32 0.3155117, %v762_v15  ;;  %v2559_v8 = vmul.f32 1.442695, %v2517_v19 }
 0x16f   : > { %v4620_v11 = vpop.eup %4619  ;;  %4629 = vrcp.f32 %v6284_v29  ;;  %v2160_v22 = vsub.f32 1.5, %v2159_v23  ;;  %v6302_v28 = vmul.f32 %v6235_v21, %v700_v31  ;;  %vm2103_vm13 = vcmp.eq.f32.partialorder %v6195_v20, inf }
 0x170   : > { %v6294_v34 = vpop.eup %4621  ;;  %4631 = vrsqrt.f32 %v6287_v37  ;;  %v1079_v6 = vmul.f32 %v4620_v11, %v6255_v63  ;;  %vm2105_vm14 = vcmp.eq.f32.partialorder %v6195_v20, 0.0  ;;  %v2106_v35 = vand.u32 2147483648, %v6195_v20 }
 0x171   : > { %8809 = vst [vmem:[#allocation5_spill] sm:$0xff] %v6294_v34  ;;  %v6299_v47 = vpop.eup %4623  ;;  %4633 = vpow2.f32 %v2549_v57  ;;  %v2161_v56 = vmul.f32 %v4616_v54, %v2160_v22  ;;  %vm2163_vm15 = vcmp.eq.f32.partialorder %v6216_v30, inf  ;;  %v1087_v23 = vand.u32 2147483647, %v6255_v63 }
 0x172   : > { %8810 = vst [vmem:[#allocation14_spill] sm:$0xff] %v6299_v47  ;;  %v4626_v4 = vpop.eup %4625  ;;  %v1080_v15 = vsub.f32 1.0, %v1079_v6  ;;  %4635 = vpow2.f32 %v945_v52  ;;  %v2102_v19 = vmul.f32 %v2101_v10, %v6195_v20  ;;  %vm2165_vm0 = vcmp.eq.f32.partialorder %v6216_v30, 0.0 }
 0x173   : > { %v4628_v57 = vpop.eup %4627  ;;  %v1089_v31 = vand.u32 2147483648, %v6255_v63  ;;  %v890_v41 = vmul.f32 2.0, %v6297_v36  ;;  %v2166_v42 = vand.u32 2147483648, %v6216_v30  ;;  %vm1084_vm1 = vweird.f32 %v4620_v11 }
 0x174   : > { %v1081_v54 = vmul.f32 %v4620_v11, %v1080_v15  ;;  %4637 = vtanh.f32 %v6218_v58  ;;  %vm625_vm2 = vweird.f32 %v5613_v43  ;;  %v2473_v52 = vmul.f32 0.6931472, %v4626_v4 }
 0x175   : > { %v4630_v3 = vpop.eup %4629  ;;  %v2162_v10 = vmul.f32 %v2161_v56, %v6216_v30  ;;  %vm626_vm3 = vweird.f32 %v5648_v1  ;;  %vm1083_vm4 = vweird.f32 %v6255_v63  ;;  %vm1088_vm5 = vcmp.eq.f32.partialorder %v1087_v23, 8.507059e+37 }
 0x176   : > { %v6316_v22 = vpop.eup %4631  ;;  %v1154_v6 = vmul.f32 %v4630_v3, %v6284_v29  ;;  %v1082_v15 = vadd.f32 %v4620_v11, %v1081_v54  ;;  %v2104_v58 = vsel %vm2103_vm13, %v6195_v20, %v2102_v19  ;;  %vm1085_vm6 = vmor %vm1083_vm4, %vm1084_vm1  ;;  %v1090_v4 = vor.u32 1.1754944e-38, %v1089_v31 }
 0x177   : > { %v6322_v51 = vpop.eup %4633  ;;  %v2229_v14 = vmul.f32 %v6316_v22, %v6287_v37  ;;  %v935_v12 = vmul.f32 1.442695, %v890_v41  ;;  %v1164_v54 = vand.u32 2147483648, %v6284_v29  ;;  %v2164_v23 = vsel %vm2163_vm15, %v6216_v30, %v2162_v10  ;;  %vm627_vm12 = vmor %vm625_vm2, %vm626_vm3  ;;  %v8813_v30 = vld [vmem:[#allocation13_spill] sm:$0xff] }
 0x178   : > { %8811 = vst [vmem:[#allocation9_spill] sm:$0xff] %v6322_v51  ;;  %v1155_v56 = vsub.f32 1.0, %v1154_v6  ;;  %v6330_v0 = vpop.eup %4635  ;;  %v1086_v34 = vsel %vm1085_vm6, %v4620_v11, %v1082_v15  ;;  %v1162_v51 = vand.u32 2147483647, %v6284_v29  ;;  %vm1159_vm7 = vweird.f32 %v4630_v3  ;;  %v396_v15 = vpop.xlane.xlu1 %395 }
 0x179   : > { %v2230_v47 = vmul.f32 %v6316_v22, %v2229_v14  ;;  %v1091_v9 = vsel %vm1088_vm5, %v1090_v4, %v1086_v34  ;;  %v2107_v41 = vsel %vm2105_vm14, %v2106_v35, %v2104_v58  ;;  %4639 = vrcp.f32 %v6330_v0  ;;  %v6349_v34 = vld [vmem:[%s8639_s4] ss:$0 sm:$0xff]  ;;  %v1655_v4 = vpop.f32.mrf.mxu0 }
 0x17a   : > { %v1156_v17 = vmul.f32 %v4630_v3, %v1155_v56  ;;  %v4638_v19 = vpop.eup %4637  ;;  %v1460_v6 = vadd.f32 %v6255_v63, %v1091_v9  ;;  %vm1158_vm8 = vweird.f32 %v6284_v29  ;;  %4641 = vpow2.f32 %v935_v12 }
 0x17b   : > { %v2231_v31 = vmul.f32 0.5, %v2230_v47  ;;  %v8812_v11 = vsub.f32 1.5, %v5784_v50  ;;  %4643 = vpow2.f32 %v2559_v8  ;;  %v2523_v20 = vmul.f32 %v6349_v34, %v2473_v52  ;;  %vm1160_vm10 = vmor %vm1158_vm8, %vm1159_vm7  ;;  %v8815_v52 = vld [vmem:[#allocation7_spill] sm:$0xff] }
 0x17c   : > { %v1157_v14 = vadd.f32 %v4630_v3, %v1156_v17  ;;  %vm675_vm9 = vweird.f32 %v5897_v39  ;;  %v2167_v17 = vsel %vm2165_vm0, %v2166_v42, %v2164_v23  ;;  %v1492_v63 = vmul.f32 0.5, %v1460_v6 }
 0x17d   : > { %v624_v10 = vmul.f32 %v5648_v1, %v8812_v11  ;;  %v2414_v50 = vadd.f32 %v2107_v41, %v6171_v33  ;;  %v852_v12 = vmul.f32 %v4628_v57, %v6149_v59  ;;  %v1165_v47 = vor.u32 1.1754944e-38, %v1164_v54 }
 0x17e   : > { %v1161_v9 = vsel %vm1160_vm10, %v4630_v3, %v1157_v14  ;;  %v2232_v8 = vsub.f32 1.5, %v2231_v31  ;;  %v1737_v35 = vadd.f32 1.0, %v1492_v63  ;;  %vm1163_vm11 = vcmp.eq.f32.partialorder %v1162_v51, 8.507059e+37 }
 0x17f   : > { %v8814_v42 = vsub.f32 1.5, %v8813_v30  ;;  %v2419_v33 = vadd.f32 %v2167_v17, %v6198_v24  ;;  %v1166_v59 = vsel %vm1163_vm11, %v1165_v47, %v1161_v9  ;;  %4645 = vtanh.f32 %v6253_v27  ;;  %v4640_v51 = vpop.eup %4639  ;;  %v8819_v47 = vld [vmem:[#allocation4_spill] sm:$0xff] }
 0x180   : > { %v6370_v3 = vsel %vm627_vm12, %v5648_v1, %v624_v10  ;;  %v6372_v57 = vmul.f32 1.442695, %v2523_v20  ;;  %v1769_v56 = vmul.f32 %v1737_v35, %v852_v12  ;;  %v857_v54 = vmul.f32 %v4638_v19, %v6186_v7  ;;  %v6376_v23 = vpop.eup %4641 }
 0x181   : > { %v6365_v58 = vmul.f32 %v8815_v52, %v8814_v42  ;;  %4647 = vtanh.f32 %v6297_v36  ;;  %v1465_v24 = vadd.f32 %v6284_v29, %v1166_v59  ;;  %v1244_v41 = vmul.f32 %v4640_v51, %v6330_v0  ;;  %v6382_v27 = vpop.eup %4643  ;;  %v1670_v42 = vpop.f32.mrf.mxu1 }
 0x182   : > { %4649 = vlog2.f32 %v2414_v50  ;;  %v6380_v31 = vmax.f32 %v396_v15, 1e-15  ;;  %8816 = vst [vmem:[#allocation13_spill] sm:$0xff] %v6382_v27  ;;  %v2233_v1 = vmul.f32 %v6316_v22, %v2232_v8  ;;  %v1801_v6 = vmul.f32 %v1769_v56, %v1655_v4 }
 0x183   : > { %v768_v14 = vmul.f32 %v6370_v3, %v5613_v43  ;;  %vm676_vm13 = vweird.f32 %v5960_v18  ;;  %4651 = vlog2.f32 %v2419_v33  ;;  %v1497_v7 = vmul.f32 0.5, %v1465_v24 }
 0x184   : > { %v1245_v36 = vsub.f32 1.0, %v1244_v41  ;;  %v8817_v19 = vsub.f32 1.5, %v6207_v61  ;;  %v1836_v11 = vmul.f32 %v5968_v62, %v1801_v6  ;;  %v1871_v10 = vmul.f32 %v5974_v55, %v1492_v63  ;;  %vm677_vm3 = vmor %vm675_vm9, %vm676_vm13 }
 0x185   : > { %v1254_v20 = vand.u32 2147483648, %v6330_v0  ;;  %4653 = vrcp.f32 %v6376_v23  ;;  %v4646_v22 = vpop.eup %4645  ;;  %v1742_v17 = vadd.f32 1.0, %v1497_v7  ;;  %vm1249_vm14 = vweird.f32 %v4640_v51 }
 0x186   : > { %v674_v29 = vmul.f32 %v5960_v18, %v8817_v19  ;;  %v1246_v43 = vmul.f32 %v4640_v51, %v1245_v36  ;;  %v1252_v50 = vand.u32 2147483647, %v6330_v0  ;;  %v2234_v61 = vmul.f32 %v2233_v1, %v6287_v37 }
 0x187   : > { %v6396_v12 = vpop.eup %4647  ;;  %vm2235_vm15 = vcmp.eq.f32.partialorder %v6287_v37, inf  ;;  %vm2237_vm0 = vcmp.eq.f32.partialorder %v6287_v37, 0.0  ;;  %v6401_v9 = vsub.f32 %v1836_v11, %v1871_v10  ;;  %vm575_vm1 = vweird.f32 %v8819_v47 }
 0x188   : > { %v4650_v63 = vpop.eup %4649  ;;  %v2238_v8 = vand.u32 2147483648, %v6287_v37  ;;  %v1774_v35 = vmul.f32 %v1742_v17, %v857_v54  ;;  %v1247_v15 = vadd.f32 %v4640_v51, %v1246_v43  ;;  %vm1248_vm2 = vweird.f32 %v6330_v0 }
 0x189   : > { %8818 = vst [vmem:[#allocation7_spill] sm:$0xff] %v6401_v9  ;;  %v6411_v30 = vand.u32 2147483647, %v6401_v9  ;;  %vm1250_vm4 = vmor %vm1248_vm2, %vm1249_vm14  ;;  %v1255_v33 = vor.u32 1.1754944e-38, %v1254_v20  ;;  %v6414_v4 = vmul.f32 0.3155117, %v768_v14  ;;  %v6417_v59 = vsel %vm677_vm3, %v5960_v18, %v674_v29  ;;  %v4652_v56 = vpop.eup %4651 }
 0x18a   : > { %v1806_v54 = vmul.f32 %v1774_v35, %v1670_v42  ;;  %v1251_v24 = vsel %vm1250_vm4, %v4640_v51, %v1247_v15  ;;  %vm1253_vm5 = vcmp.eq.f32.partialorder %v1252_v50, 8.507059e+37  ;;  %v773_v41 = vmul.f32 %v6417_v59, %v5897_v39  ;;  %v8829_v9 = vld [vmem:[#allocation16_spill] sm:$0xff] }
 0x18b   : > { %v4654_v1 = vpop.eup %4653  ;;  %v2236_v6 = vsel %vm2235_vm15, %v6287_v37, %v2234_v61  ;;  %v1967_v36 = vmul.f32 %v6411_v30, %v6411_v30  ;;  %v1256_v14 = vsel %vm1253_vm5, %v1255_v33, %v1251_v24  ;;  %v896_v19 = vmul.f32 2.0, %v6414_v4 }
 0x18c   : > { %v1841_v18 = vmul.f32 %v5968_v62, %v1806_v54  ;;  %v1876_v29 = vmul.f32 %v5974_v55, %v1497_v7  ;;  %v1471_v51 = vadd.f32 %v6330_v0, %v1256_v14  ;;  %v1169_v11 = vmul.f32 %v4654_v1, %v6376_v23  ;;  %v393_v7 = vpop.xlane.xlu0 %392 }
 0x18d   : > { %vm635_vm6 = vweird.f32 %v5590_v53  ;;  %v6432_v39 = vadd.f32 1.0, %v1967_v36  ;;  %v863_v10 = vmul.f32 %v4646_v22, %v6239_v26  ;;  %v947_v20 = vmul.f32 1.442695, %v896_v19 }
 0x18e   : > { %v6435_v17 = vmul.f32 0.3155117, %v773_v41  ;;  %v2453_v43 = vmul.f32 0.6931472, %v4650_v63  ;;  %v6437_v50 = vsub.f32 %v1841_v18, %v1876_v29  ;;  %v1503_v61 = vmul.f32 0.5, %v1471_v51  ;;  %v1688_v41 = vpop.f32.mrf.mxu2 }
 0x18f   : > { %v1170_v35 = vsub.f32 1.0, %v1169_v11  ;;  %v2463_v15 = vmul.f32 0.6931472, %v4652_v56  ;;  %v2239_v0 = vsel %vm2237_vm0, %v2238_v8, %v2236_v6  ;;  %4655 = vrsqrt.f32 %v6432_v39 }
 0x190   : > { %8820 = vst [vmem:[#allocation4_spill] sm:$0xff] %v6437_v50  ;;  %v1177_v42 = vand.u32 2147483647, %v6376_v23  ;;  %v6444_v33 = vand.u32 2147483647, %v6437_v50  ;;  %v1748_v26 = vadd.f32 1.0, %v1503_v61  ;;  %vm576_vm7 = vweird.f32 %v8815_v52 }
 0x191   : > { %v1179_v22 = vand.u32 2147483648, %v6376_v23  ;;  %v1171_v63 = vmul.f32 %v4654_v1, %v1170_v35  ;;  %vm1174_vm8 = vweird.f32 %v4654_v1  ;;  %4657 = vpow2.f32 %v947_v20  ;;  %vm577_vm10 = vmor %vm575_vm1, %vm576_vm7 }
 0x192   : > { %v901_v56 = vmul.f32 2.0, %v6435_v17  ;;  %v1972_v37 = vmul.f32 %v6444_v33, %v6444_v33  ;;  %v1780_v8 = vmul.f32 %v1748_v26, %v863_v10  ;;  %4659 = vrsqrt.f32 %v6380_v31 }
 0x193   : > { %v6452_v54 = vmax.f32 %v393_v7, 1e-15  ;;  %v2513_v24 = vmul.f32 %v6349_v34, %v2453_v43  ;;  %v1172_v6 = vadd.f32 %v4654_v1, %v1171_v63  ;;  %vm1173_vm9 = vweird.f32 %v6376_v23 }
 0x194   : > { %v957_v36 = vmul.f32 1.442695, %v901_v56  ;;  %v2518_v14 = vmul.f32 %v6349_v34, %v2463_v15  ;;  %v2425_v19 = vadd.f32 %v2239_v0, %v6271_v13  ;;  %v6460_v18 = vadd.f32 1.0, %v1972_v37  ;;  %vm1175_vm11 = vmor %vm1173_vm9, %vm1174_vm8  ;;  %v8821_v0 = vld [vmem:[#allocation21_spill] sm:$0xff] }
 0x195   : > { %v1812_v29 = vmul.f32 %v1780_v8, %v1688_v41  ;;  %v6463_v51 = vpop.eup %4655  ;;  %v1176_v11 = vsel %vm1175_vm11, %v4654_v1, %v1172_v6  ;;  %vm1178_vm12 = vcmp.eq.f32.partialorder %v1177_v42, 8.507059e+37  ;;  %v1180_v10 = vor.u32 1.1754944e-38, %v1179_v22 }
 0x196   : > { %vm636_vm13 = vweird.f32 %v5630_v25  ;;  %v2109_v20 = vmul.f32 %v6463_v51, %v6432_v39  ;;  %4661 = vrsqrt.f32 %v6460_v18  ;;  %v1882_v43 = vmul.f32 %v5974_v55, %v1503_v61  ;;  %v8827_v61 = vld [vmem:[#allocation19_spill] sm:$0xff] }
 0x197   : > { %v6472_v13 = vsel %vm577_vm10, %v8815_v52, %v6365_v58  ;;  %v6474_v35 = vpop.eup %4657  ;;  %v1847_v15 = vmul.f32 %v5968_v62, %v1812_v29  ;;  %v1181_v1 = vsel %vm1178_vm12, %v1180_v10, %v1176_v11  ;;  %4663 = vpow2.f32 %v957_v36  ;;  %vm637_vm14 = vmor %vm635_vm6, %vm636_vm13 }
 0x198   : > { %v8822_v7 = vsub.f32 1.5, %v8821_v0  ;;  %v6480_v26 = vpop.eup %4659  ;;  %v2551_v22 = vmul.f32 1.442695, %v2513_v24  ;;  %v2110_v63 = vmul.f32 %v6463_v51, %v2109_v20  ;;  %v1466_v55 = vadd.f32 %v6376_v23, %v1181_v1 }
 0x199   : > { %4665 = vrcp.f32 %v6474_v35  ;;  %v2561_v62 = vmul.f32 1.442695, %v2518_v14  ;;  %v6490_v52 = vsub.f32 %v1847_v15, %v1882_v43  ;;  %v763_v58 = vmul.f32 %v6472_v13, %v8819_v47  ;;  %v1673_v15 = vpop.f32.mrf.mxu1 }
 0x19a   : > { %v634_v42 = vmul.f32 %v5630_v25, %v8822_v7  ;;  %4667 = vpow2.f32 %v6372_v57  ;;  %v6496_v23 = vmul.f32 0.5, %v6302_v28  ;;  %v1498_v56 = vmul.f32 0.5, %v1466_v55 }
 0x19b   : > { %8823 = vst [vmem:[#allocation21_spill] sm:$0xff] %v6490_v52  ;;  %4669 = vlog2.f32 %v2425_v19  ;;  %v2111_v37 = vmul.f32 0.5, %v2110_v63  ;;  %v6499_v8 = vand.u32 2147483647, %v6490_v52  ;;  %v740_v47 = vmul.f32 %v6480_v26, %v6380_v31 }
 0x19c   : > { %4671 = vrsqrt.f32 %v6452_v54  ;;  %v6503_v57 = vsel %vm637_vm14, %v5630_v25, %v634_v42  ;;  %v4662_v24 = vpop.eup %4661  ;;  %v858_v41 = vmul.f32 %v6396_v12, %v6267_v48  ;;  %v1743_v28 = vadd.f32 1.0, %v1498_v56 }
 0x19d   : > { %4673 = vpow2.f32 %v2551_v22  ;;  %v6509_v6 = vpop.eup %4663  ;;  %v2169_v36 = vmul.f32 %v4662_v24, %v6460_v18  ;;  %v1978_v14 = vmul.f32 %v6499_v8, %v6499_v8  ;;  %v6514_v19 = vmul.f32 0.3155117, %v763_v58 }
 0x19e   : > { %4675 = vpow2.f32 %v2561_v62  ;;  %v1775_v11 = vmul.f32 %v1743_v28, %v858_v41  ;;  %v769_v48 = vmul.f32 %v6503_v57, %v5590_v53  ;;  %v2112_v10 = vsub.f32 1.5, %v2111_v37  ;;  %v6540_v37 = vld [vmem:[%s8637_s2] ss:$0 sm:$0xff] }
 0x19f   : > { %v4666_v25 = vpop.eup %4665  ;;  %4677 = vrcp.f32 %v6509_v6  ;;  %v2170_v20 = vmul.f32 %v4662_v24, %v2169_v36  ;;  %v6522_v43 = vadd.f32 1.0, %v1978_v14  ;;  %v6526_v7 = vmul.f32 %v6480_v26, %v740_v47  ;;  %v6546_v47 = vld [vmem:[%s8638_s3] ss:$0 sm:$0xff] }
 0x1a0   : > { %v6520_v12 = vpop.eup %4667  ;;  %v1259_v1 = vmul.f32 %v4666_v25, %v6474_v35  ;;  %v1807_v42 = vmul.f32 %v1775_v11, %v1673_v15  ;;  %4679 = vtanh.f32 %v6414_v4  ;;  %v1267_v22 = vand.u32 2147483647, %v6474_v35 }
 0x1a1   : > { %8824 = vst [vmem:[#allocation41_spill] sm:$0xff] %v6520_v12  ;;  %v4670_v0 = vpop.eup %4669  ;;  %v2171_v53 = vmul.f32 0.5, %v2170_v20  ;;  %4681 = vrsqrt.f32 %v6522_v43  ;;  %v1269_v55 = vand.u32 2147483648, %v6474_v35  ;;  %v891_v62 = vmul.f32 2.0, %v6514_v19 }
 0x1a2   : > { %v6530_v63 = vpop.eup %4671  ;;  %v1842_v4 = vmul.f32 %v6540_v37, %v1807_v42  ;;  %v1877_v41 = vmul.f32 %v6546_v47, %v1498_v56  ;;  %v1260_v28 = vsub.f32 1.0, %v1259_v1  ;;  %v6549_v36 = vmul.f32 0.3155117, %v769_v48 }
 0x1a3   : > { %v6535_v58 = vpop.eup %4673  ;;  %v2475_v11 = vmul.f32 0.6931472, %v4670_v0  ;;  %v2113_v20 = vmul.f32 %v6463_v51, %v2112_v10  ;;  %v2172_v15 = vsub.f32 1.5, %v2171_v53  ;;  %v8828_v29 = vsub.f32 1.5, %v8827_v61 }
 0x1a4   : > { %8825 = vst [vmem:[#allocation42_spill] sm:$0xff] %v6535_v58  ;;  %v6551_v14 = vpop.eup %4675  ;;  %vm2115_vm15 = vcmp.eq.f32.partialorder %v6432_v39, inf  ;;  %v6560_v50 = vsub.f32 %v1842_v4, %v1877_v41  ;;  %v1261_v56 = vmul.f32 %v4666_v25, %v1260_v28  ;;  %vm1264_vm0 = vweird.f32 %v4666_v25 }
 0x1a5   : > { %8826 = vst [vmem:[#allocation43_spill] sm:$0xff] %v6551_v14  ;;  %v6557_v42 = vmul.f32 %v8829_v9, %v8828_v29  ;;  %v4678_v52 = vpop.eup %4677  ;;  %4683 = vtanh.f32 %v6435_v17  ;;  %vm1263_vm1 = vweird.f32 %v6474_v35  ;;  %vm6564_vm2 = vcmp.eq.f32.partialorder %v1267_v22, 8.507059e+37 }
 0x1a6   : > { %8830 = vst [vmem:[#allocation19_spill] sm:$0xff] %v6560_v50  ;;  %v1334_v51 = vmul.f32 %v4678_v52, %v6509_v6  ;;  %v937_v61 = vmul.f32 1.442695, %v891_v62  ;;  %v4680_v29 = vpop.eup %4679  ;;  %v6570_v10 = vand.u32 2147483647, %v6560_v50  ;;  %v1262_v1 = vadd.f32 %v4666_v25, %v1261_v56  ;;  %vm1265_vm3 = vmor %vm1263_vm1, %vm1264_vm0 }
 0x1a7   : > { %v1270_v0 = vor.u32 1.1754944e-38, %v1269_v55  ;;  %v897_v53 = vmul.f32 2.0, %v6549_v36  ;;  %v4682_v4 = vpop.eup %4681  ;;  %v2114_v17 = vmul.f32 %v2113_v20, %v6432_v39  ;;  %v2173_v41 = vmul.f32 %v4662_v24, %v2172_v15 }
 0x1a8   : > { %v1335_v22 = vsub.f32 1.0, %v1334_v51  ;;  %4685 = vpow2.f32 %v937_v61  ;;  %v2241_v28 = vmul.f32 %v4682_v4, %v6522_v43  ;;  %v1973_v62 = vmul.f32 %v6570_v10, %v6570_v10 }
 0x1a9   : > { %v1266_v12 = vsel %vm1265_vm3, %v4666_v25, %v1262_v1  ;;  %v1342_v50 = vand.u32 2147483647, %v6509_v6  ;;  %v1344_v27 = vand.u32 2147483648, %v6509_v6  ;;  %v949_v14 = vmul.f32 1.442695, %v897_v53 }
 0x1aa   : > { %v1271_v55 = vsel %vm6564_vm2, %v1270_v0, %v1266_v12  ;;  %v1336_v56 = vmul.f32 %v4678_v52, %v1335_v22  ;;  %v2242_v24 = vmul.f32 %v4682_v4, %v2241_v28  ;;  %v6581_v15 = vadd.f32 1.0, %v1973_v62 }
 0x1ab   : > { %v4684_v20 = vpop.eup %4683  ;;  %v1472_v51 = vadd.f32 %v6474_v35, %v1271_v55  ;;  %vm1339_vm4 = vweird.f32 %v4678_v52  ;;  %vm2117_vm5 = vcmp.eq.f32.partialorder %v6432_v39, 0.0  ;;  %v2118_v25 = vand.u32 2147483648, %v6432_v39 }
 0x1ac   : > { %v2174_v61 = vmul.f32 %v2173_v41, %v6460_v18  ;;  %v1337_v1 = vadd.f32 %v4678_v52, %v1336_v56  ;;  %vm685_vm6 = vweird.f32 %v5895_v32  ;;  %vm2175_vm7 = vcmp.eq.f32.partialorder %v6460_v18, inf }
 0x1ad   : > { %v2243_v12 = vmul.f32 0.5, %v2242_v24  ;;  %4687 = vrsqrt.f32 %v6581_v15  ;;  %vm1338_vm8 = vweird.f32 %v6509_v6  ;;  %v2116_v35 = vsel %vm2115_vm15, %v6432_v39, %v2114_v17  ;;  %v8833_v24 = vld [vmem:[#allocation11_spill] sm:$0xff] }
 0x1ae   : > { %v6591_v48 = vpop.eup %4685  ;;  %v1504_v0 = vmul.f32 0.5, %v1472_v51  ;;  %vm1340_vm9 = vmor %vm1338_vm8, %vm1339_vm4  ;;  %v1345_v53 = vor.u32 1.1754944e-38, %v1344_v27  ;;  %4689 = vpow2.f32 %v949_v14  ;;  %vm1343_vm10 = vcmp.eq.f32.partialorder %v1342_v50, 8.507059e+37 }
 0x1af   : > { %v2244_v41 = vsub.f32 1.5, %v2243_v12  ;;  %v1341_v22 = vsel %vm1340_vm9, %v4678_v52, %v1337_v1  ;;  %4691 = vrcp.f32 %v6591_v48  ;;  %v2176_v28 = vsel %vm2175_vm7, %v6460_v18, %v2174_v61  ;;  %v1691_v61 = vpop.f32.mrf.mxu2 }
 0x1b0   : > { %v864_v62 = vmul.f32 %v4680_v29, %v6370_v3  ;;  %v1749_v55 = vadd.f32 1.0, %v1504_v0  ;;  %v1346_v56 = vsel %vm1343_vm10, %v1345_v53, %v1341_v22  ;;  %vm585_vm11 = vweird.f32 %v8833_v24 }
 0x1b1   : > { %v6601_v58 = vmul.f32 %v6349_v34, %v2475_v11  ;;  %v2178_v17 = vand.u32 2147483648, %v6460_v18  ;;  %v1477_v27 = vadd.f32 %v6509_v6, %v1346_v56  ;;  %vm586_vm12 = vweird.f32 %v8829_v9 }
 0x1b2   : > { %v2119_v50 = vsel %vm2117_vm5, %v2118_v25, %v2116_v35  ;;  %vm2177_vm13 = vcmp.eq.f32.partialorder %v6460_v18, 0.0  ;;  %v1781_v52 = vmul.f32 %v1749_v55, %v864_v62  ;;  %v8834_v3 = vsub.f32 1.5, %v6061_v5  ;;  %vm587_vm4 = vmor %vm585_vm11, %vm586_vm12 }
 0x1b3   : > { %v6612_v29 = vpop.eup %4687  ;;  %v2179_v11 = vsel %vm2177_vm13, %v2178_v17, %v2176_v28  ;;  %v2245_v51 = vmul.f32 %v4682_v4, %v2244_v41  ;;  %v1509_v1 = vmul.f32 0.5, %v1477_v27  ;;  %vm686_vm14 = vweird.f32 %v5950_v38 }
 0x1b4   : > { %v684_v14 = vmul.f32 %v5950_v38, %v8834_v3  ;;  %v6615_v6 = vpop.eup %4689  ;;  %v2181_v39 = vmul.f32 %v6612_v29, %v6581_v15  ;;  %v1813_v25 = vmul.f32 %v1781_v52, %v1691_v61  ;;  %v869_v18 = vmul.f32 %v4684_v20, %v6417_v59  ;;  %vm687_vm1 = vmor %vm685_vm6, %vm686_vm14 }
 0x1b5   : > { %4693 = vtanh.f32 %v6514_v19  ;;  %v4692_v5 = vpop.eup %4691  ;;  %v2415_v12 = vadd.f32 %v2119_v50, %v6411_v30  ;;  %vm2247_vm15 = vcmp.eq.f32.partialorder %v6522_v43, inf  ;;  %vm2249_vm0 = vcmp.eq.f32.partialorder %v6522_v43, 0.0 }
 0x1b6   : > { %v1754_v4 = vadd.f32 1.0, %v1509_v1  ;;  %v2420_v35 = vadd.f32 %v2179_v11, %v6444_v33  ;;  %v1848_v53 = vmul.f32 %v6540_v37, %v1813_v25  ;;  %v1883_v41 = vmul.f32 %v6546_v47, %v1504_v0  ;;  %v1706_v0 = vpop.f32.mrf.mxu3 }
 0x1b7   : > { %v1184_v22 = vmul.f32 %v4692_v5, %v6591_v48  ;;  %v2246_v30 = vmul.f32 %v2245_v51, %v6522_v43  ;;  %v2250_v59 = vand.u32 2147483648, %v6522_v43  ;;  %v6635_v20 = vsel %vm687_vm1, %v5950_v38, %v684_v14 }
 0x1b8   : > { %v1786_v19 = vmul.f32 %v1754_v4, %v869_v18  ;;  %v2182_v33 = vmul.f32 %v6612_v29, %v2181_v39  ;;  %v6638_v28 = vsub.f32 %v1848_v53, %v1883_v41  ;;  %4695 = vrcp.f32 %v6615_v6 }
 0x1b9   : > { %v1185_v62 = vsub.f32 1.0, %v1184_v22  ;;  %4697 = vlog2.f32 %v2415_v12  ;;  %v1192_v56 = vand.u32 2147483647, %v6591_v48  ;;  %v1194_v17 = vand.u32 2147483648, %v6591_v48 }
 0x1ba   : > { %8835 = vst [vmem:[#allocation16_spill] sm:$0xff] %v6638_v28  ;;  %v1818_v55 = vmul.f32 %v1786_v19, %v1706_v0  ;;  %4699 = vlog2.f32 %v2420_v35  ;;  %v6644_v50 = vand.u32 2147483647, %v6638_v28  ;;  %vm1189_vm2 = vweird.f32 %v4692_v5 }
 0x1bb   : > { %v4694_v27 = vpop.eup %4693  ;;  %v1186_v38 = vmul.f32 %v4692_v5, %v1185_v62  ;;  %v2248_v52 = vsel %vm2247_vm15, %v6522_v43, %v2246_v30  ;;  %v1888_v14 = vmul.f32 %v6546_v47, %v1509_v1  ;;  %v774_v11 = vmul.f32 %v6635_v20, %v5895_v32 }
 0x1bc   : > { %v1853_v3 = vmul.f32 %v6540_v37, %v1818_v55  ;;  %v2183_v51 = vmul.f32 0.5, %v2182_v33  ;;  %v1979_v61 = vmul.f32 %v6644_v50, %v6644_v50  ;;  %vm1188_vm3 = vweird.f32 %v6591_v48 }
 0x1bd   : > { %v1187_v39 = vadd.f32 %v4692_v5, %v1186_v38  ;;  %vm1190_vm5 = vmor %vm1188_vm3, %vm1189_vm2  ;;  %vm1193_vm6 = vcmp.eq.f32.partialorder %v1192_v56, 8.507059e+37  ;;  %v1195_v1 = vor.u32 1.1754944e-38, %v1194_v17  ;;  %v6664_v32 = vsel %vm587_vm4, %v8829_v9, %v6557_v42 }
 0x1be   : > { %v6660_v25 = vsub.f32 %v1853_v3, %v1888_v14  ;;  %v4696_v18 = vpop.eup %4695  ;;  %v2251_v12 = vsel %vm2249_vm0, %v2250_v59, %v2248_v52  ;;  %v6668_v4 = vadd.f32 1.0, %v1979_v61  ;;  %v6670_v53 = vmul.f32 0.3155117, %v774_v11 }
 0x1bf   : > { %v1191_v35 = vsel %vm1190_vm5, %v4692_v5, %v1187_v39  ;;  %v4698_v41 = vpop.eup %4697  ;;  %v1274_v19 = vmul.f32 %v4696_v18, %v6615_v6  ;;  %v764_v9 = vmul.f32 %v6664_v32, %v8833_v24  ;;  %v6679_v33 = vmul.f32 0.5, %v6526_v7  ;;  %v1676_v39 = vpop.f32.mrf.mxu1 }
 0x1c0   : > { %8836 = vst [vmem:[#allocation11_spill] sm:$0xff] %v6660_v25  ;;  %v6673_v22 = vand.u32 2147483647, %v6660_v25  ;;  %v1196_v30 = vsel %vm1193_vm6, %v1195_v1, %v1191_v35  ;;  %v4700_v42 = vpop.eup %4699  ;;  %v6683_v43 = vmul.f32 %v6530_v63, %v6452_v54  ;;  %v2184_v5 = vsub.f32 1.5, %v2183_v51 }
 0x1c1   : > { %4701 = vrsqrt.f32 %v6668_v4  ;;  %v6687_v59 = vmul.f32 1.442695, %v6601_v58  ;;  %v859_v62 = vmul.f32 %v4694_v27, %v6472_v13  ;;  %vm645_vm7 = vweird.f32 %v5800_v44 }
 0x1c2   : > { %v1984_v0 = vmul.f32 %v6673_v22, %v6673_v22  ;;  %4703 = vtanh.f32 %v6549_v36  ;;  %v2426_v7 = vadd.f32 %v2251_v12, %v6499_v8  ;;  %v1467_v24 = vadd.f32 %v6591_v48, %v1196_v30 }
 0x1c3   : > { %v1275_v55 = vsub.f32 1.0, %v1274_v19  ;;  %v1282_v56 = vand.u32 2147483647, %v6615_v6  ;;  %v1284_v58 = vand.u32 2147483648, %v6615_v6  ;;  %v902_v38 = vmul.f32 2.0, %v6670_v53 }
 0x1c4   : > { %v6697_v17 = vadd.f32 1.0, %v1984_v0  ;;  %v6701_v52 = vmul.f32 0.3155117, %v764_v9  ;;  %v2185_v13 = vmul.f32 %v6612_v29, %v2184_v5  ;;  %v1499_v36 = vmul.f32 0.5, %v1467_v24  ;;  %v8838_v24 = vld [vmem:[#allocation28_spill] sm:$0xff] }
 0x1c5   : > { %v1276_v27 = vmul.f32 %v4696_v18, %v1275_v55  ;;  %vm1279_vm8 = vweird.f32 %v4696_v18  ;;  %v2455_v3 = vmul.f32 0.6931472, %v4698_v41  ;;  %vm2187_vm9 = vcmp.eq.f32.partialorder %v6581_v15, inf }
 0x1c6   : > { %4705 = vrsqrt.f32 %v6697_v17  ;;  %vm1278_vm10 = vweird.f32 %v6615_v6  ;;  %v2465_v48 = vmul.f32 0.6931472, %v4700_v42  ;;  %v1744_v14 = vadd.f32 1.0, %v1499_v36 }
 0x1c7   : > { %v4702_v8 = vpop.eup %4701  ;;  %4707 = vlog2.f32 %v2426_v7  ;;  %v1277_v11 = vadd.f32 %v4696_v18, %v1276_v27  ;;  %vm1280_vm11 = vmor %vm1278_vm10, %vm1279_vm8  ;;  %v1285_v29 = vor.u32 1.1754944e-38, %v1284_v58  ;;  %v959_v1 = vmul.f32 1.442695, %v902_v38 }
 0x1c8   : > { %v4704_v51 = vpop.eup %4703  ;;  %v2253_v61 = vmul.f32 %v4702_v8, %v6668_v4  ;;  %v892_v12 = vmul.f32 2.0, %v6701_v52  ;;  %v2186_v35 = vmul.f32 %v2185_v13, %v6581_v15  ;;  %v1776_v41 = vmul.f32 %v1744_v14, %v859_v62  ;;  %v8839_v14 = vld [vmem:[#allocation31_spill] sm:$0xff] }
 0x1c9   : > { %v1281_v30 = vsel %vm1280_vm11, %v4696_v18, %v1277_v11  ;;  %vm1283_vm12 = vcmp.eq.f32.partialorder %v1282_v56, 8.507059e+37  ;;  %4709 = vpow2.f32 %v959_v1  ;;  %v8837_v7 = vsub.f32 1.5, %v6026_v40 }
 0x1ca   : > { %v2254_v19 = vmul.f32 %v4702_v8, %v2253_v61  ;;  %v1286_v9 = vsel %vm1283_vm12, %v1285_v29, %v1281_v30  ;;  %v939_v42 = vmul.f32 1.442695, %v892_v12  ;;  %v1808_v5 = vmul.f32 %v1776_v41, %v1676_v39 }
 0x1cb   : > { %v1473_v0 = vadd.f32 %v6615_v6, %v1286_v9  ;;  %v644_v55 = vmul.f32 %v8838_v24, %v8837_v7  ;;  %vm646_vm13 = vweird.f32 %v8838_v24  ;;  %v2514_v38 = vmul.f32 %v6349_v34, %v2455_v3 }
 0x1cc   : > { %v6715_v58 = vpop.eup %4705  ;;  %v2190_v18 = vand.u32 2147483648, %v6581_v15  ;;  %v2255_v62 = vmul.f32 0.5, %v2254_v19  ;;  %4711 = vpow2.f32 %v939_v42  ;;  %v1843_v6 = vmul.f32 %v6540_v37, %v1808_v5  ;;  %vm647_vm15 = vmor %vm645_vm7, %vm646_vm13 }
 0x1cd   : > { %v4708_v56 = vpop.eup %4707  ;;  %v2313_v13 = vmul.f32 %v6715_v58, %v6697_v17  ;;  %v1878_v40 = vmul.f32 %v6546_v47, %v1499_v36  ;;  %v1505_v27 = vmul.f32 0.5, %v1473_v0  ;;  %vm695_vm14 = vweird.f32 %v8839_v14 }
 0x1ce   : > { %v2519_v11 = vmul.f32 %v6349_v34, %v2465_v48  ;;  %v2188_v3 = vsel %vm2187_vm9, %v6581_v15, %v2186_v35  ;;  %v2256_v61 = vsub.f32 1.5, %v2255_v62  ;;  %v865_v39 = vmul.f32 %v4704_v51, %v6503_v57 }
 0x1cf   : > { %v2314_v29 = vmul.f32 %v6715_v58, %v2313_v13  ;;  %v6734_v36 = vsub.f32 %v1843_v6, %v1878_v40  ;;  %v1750_v1 = vadd.f32 1.0, %v1505_v27  ;;  %v6737_v12 = vsel %vm647_vm15, %v8838_v24, %v644_v55  ;;  %v6739_v48 = vpop.eup %4709  ;;  %v8840_v13 = vld [vmem:[#allocation34_spill] sm:$0xff]  ;;  %v8841_v40 = vld [vmem:[#allocation23_spill] sm:$0xff] }
 0x1d0   : > { %4713 = vpow2.f32 %v6687_v59  ;;  %v6744_v57 = vmul.f32 %v6530_v63, %v6683_v43  ;;  %vm2189_vm0 = vcmp.eq.f32.partialorder %v6581_v15, 0.0  ;;  %v2257_v51 = vmul.f32 %v4702_v8, %v2256_v61  ;;  %v1694_v43 = vpop.f32.mrf.mxu2 }
 0x1d1   : > { %v2191_v35 = vsel %vm2189_vm0, %v2190_v18, %v2188_v3  ;;  %v6748_v41 = vand.u32 2147483647, %v6734_v36  ;;  %v1782_v30 = vmul.f32 %v1750_v1, %v865_v39  ;;  %4715 = vrcp.f32 %v6739_v48 }
 0x1d2   : > { %v6751_v19 = vpop.eup %4711  ;;  %v6753_v9 = vmul.f32 1.442695, %v2514_v38  ;;  %v6755_v42 = vmul.f32 1.442695, %v2519_v11  ;;  %v6757_v59 = vmul.f32 0.6931472, %v4708_v56  ;;  %v770_v15 = vmul.f32 %v6737_v12, %v5800_v44 }
 0x1d3   : > { %v2258_v8 = vmul.f32 %v2257_v51, %v6668_v4  ;;  %v2315_v5 = vmul.f32 0.5, %v2314_v29  ;;  %v1974_v0 = vmul.f32 %v6748_v41, %v6748_v41  ;;  %v1814_v7 = vmul.f32 %v1782_v30, %v1694_v43  ;;  %v8845_v51 = vld [vmem:[#allocation30_spill] sm:$0xff] }
 0x1d4   : > { %v2421_v24 = vadd.f32 %v2191_v35, %v6570_v10  ;;  %vm2259_vm1 = vcmp.eq.f32.partialorder %v6668_v4, inf  ;;  %vm2261_vm2 = vcmp.eq.f32.partialorder %v6668_v4, 0.0  ;;  %4717 = vrcp.f32 %v6751_v19  ;;  %v8847_v30 = vld [vmem:[#allocation26_spill] sm:$0xff] }
 0x1d5   : > { %v2262_v55 = vand.u32 2147483648, %v6668_v4  ;;  %v6769_v38 = vadd.f32 1.0, %v1974_v0  ;;  %v1849_v44 = vmul.f32 %v6540_v37, %v1814_v7  ;;  %v1357_v18 = vand.u32 2147483647, %v6739_v48 }
 0x1d6   : > { %v6773_v62 = vpop.eup %4713  ;;  %v1884_v56 = vmul.f32 %v6546_v47, %v1505_v27  ;;  %4719 = vtanh.f32 %v6670_v53  ;;  %v6777_v10 = vmul.f32 0.3155117, %v770_v15  ;;  %vm696_vm3 = vweird.f32 %v8840_v13 }
 0x1d7   : > { %v4716_v6 = vpop.eup %4715  ;;  %vm655_vm4 = vweird.f32 %v8841_v40  ;;  %v2260_v11 = vsel %vm2259_vm1, %v6668_v4, %v2258_v8  ;;  %v2316_v3 = vsub.f32 1.5, %v2315_v5  ;;  %4721 = vrsqrt.f32 %v6769_v38  ;;  %vm697_vm7 = vmor %vm695_vm14, %vm696_vm3 }
 0x1d8   : > { %v1359_v61 = vand.u32 2147483648, %v6739_v48  ;;  %4723 = vlog2.f32 %v2421_v24  ;;  %v6784_v39 = vsub.f32 %v1849_v44, %v1884_v56  ;;  %v1349_v27 = vmul.f32 %v4716_v6, %v6739_v48 }
 0x1d9   : > { %v8842_v53 = vsub.f32 1.5, %v6055_v16  ;;  %vm1353_vm5 = vweird.f32 %v6739_v48  ;;  %vm6791_vm6 = vcmp.eq.f32.partialorder %v1357_v18, 8.507059e+37  ;;  %4725 = vtanh.f32 %v6701_v52 }
 0x1da   : > { %v8846_v35 = vsub.f32 1.5, %v8845_v51  ;;  %v4718_v15 = vpop.eup %4717  ;;  %v2263_v16 = vsel %vm2261_vm2, %v2262_v55, %v2260_v11  ;;  %v6804_v8 = vand.u32 2147483647, %v6784_v39  ;;  %v1350_v5 = vsub.f32 1.0, %v1349_v27 }
 0x1db   : > { %v694_v29 = vmul.f32 %v8840_v13, %v8842_v53  ;;  %vm1203_vm8 = vweird.f32 %v6751_v19  ;;  %v2317_v0 = vmul.f32 %v6715_v58, %v2316_v3  ;;  %v1360_v52 = vor.u32 1.1754944e-38, %v1359_v61 }
 0x1dc   : > { %v654_v43 = vmul.f32 %v8847_v30, %v8846_v35  ;;  %v1199_v7 = vmul.f32 %v4718_v15, %v6751_v19  ;;  %v898_v24 = vmul.f32 2.0, %v6777_v10  ;;  %v4720_v44 = vpop.eup %4719  ;;  %v1980_v18 = vmul.f32 %v6804_v8, %v6804_v8 }
 0x1dd   : > { %v1351_v56 = vmul.f32 %v4716_v6, %v1350_v5  ;;  %vm1354_vm9 = vweird.f32 %v4716_v6  ;;  %v6813_v4 = vsel %vm697_vm7, %v8840_v13, %v694_v29  ;;  %v6815_v55 = vpop.eup %4721  ;;  %vm656_vm10 = vweird.f32 %v8847_v30 }
 0x1de   : > { %v1200_v11 = vsub.f32 1.0, %v1199_v7  ;;  %v951_v27 = vmul.f32 1.442695, %v898_v24  ;;  %v775_v58 = vmul.f32 %v6813_v4, %v8839_v14  ;;  %v4724_v3 = vpop.eup %4723  ;;  %v2193_v61 = vmul.f32 %v6815_v55, %v6769_v38  ;;  %vm6827_vm11 = vmor %vm1353_vm5, %vm1354_vm9 }
 0x1df   : > { %v6822_v53 = vadd.f32 1.0, %v1980_v18  ;;  %v1352_v51 = vadd.f32 %v4716_v6, %v1351_v56  ;;  %v1209_v35 = vand.u32 2147483648, %v6751_v19  ;;  %v4726_v13 = vpop.eup %4725  ;;  %vm1204_vm12 = vweird.f32 %v4718_v15  ;;  %vm657_vm13 = vmor %vm655_vm4, %vm656_vm10 }
 0x1e0   : > { %v1201_v5 = vmul.f32 %v4718_v15, %v1200_v11  ;;  %v1207_v14 = vand.u32 2147483647, %v6751_v19  ;;  %4727 = vpow2.f32 %v951_v27  ;;  %v2318_v7 = vmul.f32 %v2317_v0, %v6697_v17  ;;  %vm1205_vm14 = vmor %vm1203_vm8, %vm1204_vm12 }
 0x1e1   : > { %v2194_v24 = vmul.f32 %v6815_v55, %v2193_v61  ;;  %4729 = vrsqrt.f32 %v6822_v53  ;;  %v6835_v18 = vmul.f32 0.3155117, %v775_v58  ;;  %v2427_v56 = vadd.f32 %v2263_v16, %v6644_v50 }
 0x1e2   : > { %v1356_v11 = vsel %vm6827_vm11, %v4716_v6, %v1352_v51  ;;  %v1202_v25 = vadd.f32 %v4718_v15, %v1201_v5  ;;  %v6845_v27 = vsel %vm657_vm13, %v8847_v30, %v654_v43  ;;  %v2525_v0 = vmul.f32 %v6349_v34, %v6757_v59 }
 0x1e3   : > { %v2195_v61 = vmul.f32 0.5, %v2194_v24  ;;  %v1361_v58 = vsel %vm6791_vm6, %v1360_v52, %v1356_v11  ;;  %v1210_v28 = vor.u32 1.1754944e-38, %v1209_v35  ;;  %vm2319_vm15 = vcmp.eq.f32.partialorder %v6697_v17, inf }
 0x1e4   : > { %v1478_v50 = vadd.f32 %v6739_v48, %v1361_v58  ;;  %v1206_v6 = vsel %vm1205_vm14, %v4718_v15, %v1202_v25  ;;  %vm1208_vm0 = vcmp.eq.f32.partialorder %v1207_v14, 8.507059e+37  ;;  %v2320_v30 = vsel %vm2319_vm15, %v6697_v17, %v2318_v7 }
 0x1e5   : > { %v1211_v43 = vsel %vm1208_vm0, %v1210_v28, %v1206_v6  ;;  %v903_v34 = vmul.f32 2.0, %v6835_v18  ;;  %v771_v59 = vmul.f32 %v6845_v27, %v8841_v40  ;;  %4731 = vlog2.f32 %v2427_v56 }
 0x1e6   : > { %v6860_v1 = vpop.eup %4727  ;;  %v2322_v16 = vand.u32 2147483648, %v6697_v17  ;;  %v1510_v52 = vmul.f32 0.5, %v1478_v50  ;;  %v1468_v51 = vadd.f32 %v6751_v19, %v1211_v43  ;;  %vm2321_vm1 = vcmp.eq.f32.partialorder %v6697_v17, 0.0 }
 0x1e7   : > { %v4730_v35 = vpop.eup %4729  ;;  %v2196_v25 = vsub.f32 1.5, %v2195_v61  ;;  %v870_v48 = vmul.f32 %v4720_v44, %v6635_v20  ;;  %4733 = vrcp.f32 %v6860_v1  ;;  %v2467_v5 = vmul.f32 0.6931472, %v4724_v3  ;;  %v1679_v3 = vpop.f32.mrf.mxu1 }
 0x1e8   : > { %v2323_v28 = vsel %vm2321_vm1, %v2322_v16, %v2320_v30  ;;  %v2265_v15 = vmul.f32 %v4730_v35, %v6822_v53  ;;  %v1755_v40 = vadd.f32 1.0, %v1510_v52  ;;  %v1500_v29 = vmul.f32 0.5, %v1468_v51 }
 0x1e9   : > { %4735 = vpow2.f32 %v6753_v9  ;;  %v961_v14 = vmul.f32 1.442695, %v903_v34  ;;  %v6869_v7 = vmul.f32 0.3155117, %v771_v59  ;;  %v860_v17 = vmul.f32 %v4726_v13, %v6664_v32  ;;  %v1709_v9 = vpop.f32.mrf.mxu3 }
 0x1ea   : > { %v2266_v19 = vmul.f32 %v4730_v35, %v2265_v15  ;;  %v1787_v24 = vmul.f32 %v1755_v40, %v870_v48  ;;  %v1745_v56 = vadd.f32 1.0, %v1500_v29  ;;  %vm705_vm2 = vweird.f32 %v6165_v45  ;;  %v8851_v15 = vld [vmem:[#allocation22_spill] sm:$0xff] }
 0x1eb   : > { %4737 = vpow2.f32 %v6755_v42  ;;  %v6874_v20 = vmul.f32 1.442695, %v2525_v0  ;;  %v2432_v44 = vadd.f32 %v2323_v28, %v6673_v22  ;;  %v2197_v11 = vmul.f32 %v6815_v55, %v2196_v25  ;;  %v4732_v61 = vpop.eup %4731  ;;  %v6884_v42 = vld [vmem:[%s8639_s4] ss:$0 sm:$0xff] }
 0x1ec   : > { %v2267_v58 = vmul.f32 0.5, %v2266_v19  ;;  %v1819_v50 = vmul.f32 %v1787_v24, %v1709_v9  ;;  %v1777_v6 = vmul.f32 %v1745_v56, %v860_v17  ;;  %4739 = vtanh.f32 %v6777_v10 }
 0x1ed   : > { %v6879_v32 = vpop.eup %4733  ;;  %v2520_v13 = vmul.f32 %v6884_v42, %v2467_v5  ;;  %v1889_v22 = vmul.f32 %v6546_v47, %v1510_v52  ;;  %4741 = vpow2.f32 %v961_v14  ;;  %v899_v55 = vmul.f32 2.0, %v6869_v7 }
 0x1ee   : > { %v2268_v0 = vsub.f32 1.5, %v2267_v58  ;;  %v1854_v30 = vmul.f32 %v6540_v37, %v1819_v50  ;;  %v1809_v43 = vmul.f32 %v1777_v6, %v1679_v3  ;;  %v1289_v10 = vmul.f32 %v6879_v32, %v6860_v1 }
 0x1ef   : > { %v6892_v34 = vpop.eup %4735  ;;  %4743 = vlog2.f32 %v2432_v44  ;;  %v2198_v59 = vmul.f32 %v2197_v11, %v6769_v38  ;;  %vm2199_vm3 = vcmp.eq.f32.partialorder %v6769_v38, inf  ;;  %v1879_v16 = vmul.f32 %v6546_v47, %v1500_v29 }
 0x1f0   : > { %8850 = vst [vmem:[#allocation28_spill] sm:$0xff] %v6892_v34  ;;  %v6897_v52 = vsub.f32 %v1854_v30, %v1889_v22  ;;  %v1844_v51 = vmul.f32 %v6540_v37, %v1809_v43  ;;  %v1290_v25 = vsub.f32 1.0, %v1289_v10  ;;  %v953_v48 = vmul.f32 1.442695, %v899_v55 }
 0x1f1   : > { %v6900_v28 = vpop.eup %4737  ;;  %vm665_vm4 = vweird.f32 %v8851_v15  ;;  %v2479_v40 = vmul.f32 0.6931472, %v4732_v61  ;;  %v2269_v5 = vmul.f32 %v4730_v35, %v2268_v0  ;;  %vm1293_vm5 = vweird.f32 %v6860_v1 }
 0x1f2   : > { %v1297_v14 = vand.u32 2147483647, %v6860_v1  ;;  %v4740_v19 = vpop.eup %4739  ;;  %v6906_v24 = vand.u32 2147483647, %v6897_v52  ;;  %v6908_v29 = vsub.f32 %v1844_v51, %v1879_v16  ;;  %v1291_v17 = vmul.f32 %v6879_v32, %v1290_v25  ;;  %v8856_v51 = vld [vmem:[#allocation25_spill] sm:$0xff] }
 0x1f3   : > { %vm1294_vm6 = vweird.f32 %v6879_v32  ;;  %v6912_v56 = vpop.eup %4741  ;;  %v2200_v35 = vsel %vm2199_vm3, %v6769_v38, %v2198_v59  ;;  %v1299_v44 = vand.u32 2147483648, %v6860_v1  ;;  %v8853_v11 = vsub.f32 1.5, %v6496_v23 }
 0x1f4   : > { %8852 = vst [vmem:[#allocation31_spill] sm:$0xff] %v6908_v29  ;;  %vm706_vm7 = vweird.f32 %v6235_v21  ;;  %v1985_v3 = vmul.f32 %v6906_v24, %v6906_v24  ;;  %v6925_v61 = vand.u32 2147483647, %v6908_v29  ;;  %v1292_v58 = vadd.f32 %v6879_v32, %v1291_v17  ;;  %vm6934_vm8 = vmor %vm1293_vm5, %vm1294_vm6 }
 0x1f5   : > { %v704_v9 = vmul.f32 %v6235_v21, %v8853_v11  ;;  %4745 = vpow2.f32 %v953_v48  ;;  %v4744_v50 = vpop.eup %4743  ;;  %v6928_v6 = vmul.f32 1.442695, %v2520_v13  ;;  %v2202_v22 = vand.u32 2147483648, %v6769_v38  ;;  %vm707_vm11 = vmor %vm705_vm2, %vm706_vm7 }
 0x1f6   : > { %v2270_v23 = vmul.f32 %v2269_v5, %v6822_v53  ;;  %4747 = vrcp.f32 %v6912_v56  ;;  %vm2201_vm9 = vcmp.eq.f32.partialorder %v6769_v38, 0.0  ;;  %vm2271_vm10 = vcmp.eq.f32.partialorder %v6822_v53, inf }
 0x1f7   : > { %v6941_v0 = vadd.f32 1.0, %v1985_v3  ;;  %v1975_v13 = vmul.f32 %v6925_v61, %v6925_v61  ;;  %v2203_v30 = vsel %vm2201_vm9, %v2202_v22, %v2200_v35  ;;  %v1296_v43 = vsel %vm6934_vm8, %v6879_v32, %v1292_v58 }
 0x1f8   : > { %v1300_v10 = vor.u32 1.1754944e-38, %v1299_v44  ;;  %v6953_v38 = vsel %vm707_vm11, %v6235_v21, %v704_v9  ;;  %v2526_v59 = vmul.f32 %v6884_v42, %v2479_v40  ;;  %v2274_v16 = vand.u32 2147483648, %v6822_v53  ;;  %v8857_v44 = vld [vmem:[#allocation27_spill] sm:$0xff] }
 0x1f9   : > { %vm1298_vm12 = vcmp.eq.f32.partialorder %v1297_v14, 8.507059e+37  ;;  %vm666_vm13 = vweird.f32 %v8856_v51  ;;  %v2272_v25 = vsel %vm2271_vm10, %v6822_v53, %v2270_v23  ;;  %4749 = vrsqrt.f32 %v6941_v0 }
 0x1fa   : > { %v6960_v48 = vadd.f32 1.0, %v1975_v13  ;;  %v1301_v5 = vsel %vm1298_vm12, %v1300_v10, %v1296_v43  ;;  %v2422_v32 = vadd.f32 %v2203_v30, %v6748_v41  ;;  %4751 = vtanh.f32 %v6835_v18  ;;  %vm667_vm15 = vmor %vm665_vm4, %vm666_vm13 }
 0x1fb   : > { %v6962_v17 = vpop.eup %4745  ;;  %v1474_v21 = vadd.f32 %v6860_v1, %v1301_v5  ;;  %v776_v40 = vmul.f32 %v6953_v38, %v6165_v45  ;;  %vm2273_vm14 = vcmp.eq.f32.partialorder %v6822_v53, 0.0  ;;  %v866_v35 = vmul.f32 %v4740_v19, %v6737_v12 }
 0x1fc   : > { %v4748_v14 = vpop.eup %4747  ;;  %4753 = vrsqrt.f32 %v6960_v48  ;;  %v8858_v11 = vsub.f32 1.5, %v8857_v44  ;;  %v6975_v3 = vmul.f32 1.442695, %v2526_v59  ;;  %v2275_v41 = vsel %vm2273_vm14, %v2274_v16, %v2272_v25  ;;  %v1697_v16 = vpop.f32.mrf.mxu2 }
 0x1fd   : > { %v1506_v1 = vmul.f32 0.5, %v1474_v21  ;;  %v1364_v18 = vmul.f32 %v4748_v14, %v6912_v56  ;;  %vm715_vm0 = vweird.f32 %v6114_v46  ;;  %v2489_v45 = vmul.f32 0.6931472, %v4744_v50 }
 0x1fe   : > { %v664_v9 = vmul.f32 %v8856_v51, %v8858_v11  ;;  %v1372_v12 = vand.u32 2147483647, %v6912_v56  ;;  %v1374_v53 = vand.u32 2147483648, %v6912_v56  ;;  %4755 = vrcp.f32 %v6962_v17 }
 0x1ff   : > { %4757 = vlog2.f32 %v2422_v32  ;;  %v1751_v19 = vadd.f32 1.0, %v1506_v1  ;;  %v1365_v58 = vsub.f32 1.0, %v1364_v18  ;;  %v6986_v22 = vmul.f32 0.3155117, %v776_v40  ;;  %v4750_v23 = vpop.eup %4749 }
 0x200   : > { %v2428_v55 = vadd.f32 %v2275_v41, %v6804_v8  ;;  %vm1368_vm1 = vweird.f32 %v6912_v56  ;;  %v6991_v13 = vsel %vm667_vm15, %v8856_v51, %v664_v9  ;;  %vm716_vm2 = vweird.f32 %v6226_v49  ;;  %v4752_v50 = vpop.eup %4751 }
 0x201   : > { %v2325_v30 = vmul.f32 %v4750_v23, %v6941_v0  ;;  %v1783_v43 = vmul.f32 %v1751_v19, %v866_v35  ;;  %v1366_v10 = vmul.f32 %v4748_v14, %v1365_v58  ;;  %vm1369_vm3 = vweird.f32 %v4748_v14  ;;  %vm717_vm6 = vmor %vm715_vm0, %vm716_vm2 }
 0x202   : > { %v6995_v59 = vpop.eup %4753  ;;  %vm6997_vm4 = vcmp.eq.f32.partialorder %v1372_v12, 8.507059e+37  ;;  %v1375_v8 = vor.u32 1.1754944e-38, %v1374_v53  ;;  %v904_v5 = vmul.f32 2.0, %v6986_v22  ;;  %v772_v51 = vmul.f32 %v6991_v13, %v8851_v15  ;;  %vm1370_vm5 = vmor %vm1368_vm1, %vm1369_vm3 }
 0x203   : > { %v2326_v32 = vmul.f32 %v4750_v23, %v2325_v30  ;;  %v2205_v21 = vmul.f32 %v6995_v59, %v6960_v48  ;;  %v1815_v40 = vmul.f32 %v1783_v43, %v1697_v16  ;;  %v1367_v35 = vadd.f32 %v4748_v14, %v1366_v10 }
 0x204   : > { %v7006_v44 = vpop.eup %4755  ;;  %v1885_v11 = vmul.f32 %v6546_v47, %v1506_v1  ;;  %v963_v9 = vmul.f32 1.442695, %v904_v5  ;;  %v7011_v41 = vmul.f32 0.3155117, %v772_v51  ;;  %v8861_v18 = vsub.f32 1.5, %v6291_v2 }
 0x205   : > { %v4758_v12 = vpop.eup %4757  ;;  %v2327_v53 = vmul.f32 0.5, %v2326_v32  ;;  %v2206_v19 = vmul.f32 %v6995_v59, %v2205_v21  ;;  %v1850_v58 = vmul.f32 %v6540_v37, %v1815_v40  ;;  %v1371_v30 = vsel %vm1370_vm5, %v4748_v14, %v1367_v35 }
 0x206   : > { %v714_v15 = vmul.f32 %v6226_v49, %v8861_v18  ;;  %v2531_v43 = vmul.f32 %v6884_v42, %v2489_v45  ;;  %v1376_v47 = vsel %vm6997_vm4, %v1375_v8, %v1371_v30  ;;  %4759 = vtanh.f32 %v6869_v7 }
 0x207   : > { %v1304_v1 = vmul.f32 %v7006_v44, %v6962_v17  ;;  %4761 = vlog2.f32 %v2428_v55  ;;  %v7024_v2 = vsub.f32 %v1850_v58, %v1885_v11  ;;  %v871_v10 = vmul.f32 %v4752_v50, %v6813_v4 }
 0x208   : > { %v1479_v16 = vadd.f32 %v6912_v56, %v1376_v47  ;;  %v2328_v37 = vsub.f32 1.5, %v2327_v53  ;;  %v900_v45 = vmul.f32 2.0, %v7011_v41  ;;  %v7034_v7 = vsel %vm717_vm6, %v6226_v49, %v714_v15  ;;  %v1712_v47 = vpop.f32.mrf.mxu3 }
 0x209   : > { %v1305_v14 = vsub.f32 1.0, %v1304_v1  ;;  %v2207_v25 = vmul.f32 0.5, %v2206_v19  ;;  %v7037_v55 = vand.u32 2147483647, %v7024_v2  ;;  %4763 = vpow2.f32 %v963_v9 }
 0x20a   : > { %v1511_v8 = vmul.f32 0.5, %v1479_v16  ;;  %vm1308_vm7 = vweird.f32 %v6962_v17  ;;  %vm1309_vm8 = vweird.f32 %v7006_v44  ;;  %v955_v56 = vmul.f32 1.442695, %v900_v45  ;;  %v7089_v45 = vld [vmem:[%s8638_s3] ss:$0 sm:$0xff] }
 0x20b   : > { %v1306_v4 = vmul.f32 %v7006_v44, %v1305_v14  ;;  %v1981_v50 = vmul.f32 %v7037_v55, %v7037_v55  ;;  %v1314_v49 = vand.u32 2147483648, %v6962_v17  ;;  %v777_v51 = vmul.f32 %v7034_v7, %v6114_v46  ;;  %vm7055_vm9 = vmor %vm1308_vm7, %vm1309_vm8  ;;  %v7083_v14 = vld [vmem:[%s8637_s2] ss:$0 sm:$0xff] }
 0x20c   : > { %v1756_v5 = vadd.f32 1.0, %v1511_v8  ;;  %v4760_v32 = vpop.eup %4759  ;;  %v2329_v21 = vmul.f32 %v4750_v23, %v2328_v37  ;;  %v1312_v35 = vand.u32 2147483647, %v6962_v17  ;;  %4765 = vpow2.f32 %v955_v56 }
 0x20d   : > { %v1307_v40 = vadd.f32 %v7006_v44, %v1306_v4  ;;  %v4762_v11 = vpop.eup %4761  ;;  %v2469_v9 = vmul.f32 0.6931472, %v4758_v12  ;;  %v2208_v18 = vsub.f32 1.5, %v2207_v25  ;;  %v7049_v15 = vadd.f32 1.0, %v1981_v50 }
 0x20e   : > { %v1788_v53 = vmul.f32 %v1756_v5, %v871_v10  ;;  %4767 = vpow2.f32 %v6874_v20  ;;  %v7062_v23 = vmul.f32 0.5, %v6744_v57  ;;  %v2587_v30 = vmul.f32 1.442695, %v2531_v43 }
 0x20f   : > { %v1311_v12 = vsel %vm7055_vm9, %v7006_v44, %v1307_v40  ;;  %v7067_v58 = vpop.eup %4763  ;;  %4769 = vrsqrt.f32 %v7049_v15  ;;  %v1315_v1 = vor.u32 1.1754944e-38, %v1314_v49  ;;  %v7070_v10 = vmul.f32 0.3155117, %v777_v51 }
 0x210   : > { %4771 = vpow2.f32 %v6928_v6  ;;  %v2330_v20 = vmul.f32 %v2329_v21, %v6941_v0  ;;  %v1820_v16 = vmul.f32 %v1788_v53, %v1712_v47  ;;  %vm1313_vm10 = vcmp.eq.f32.partialorder %v1312_v35, 8.507059e+37 }
 0x211   : > { %vm725_vm11 = vweird.f32 %v6087_v60  ;;  %4773 = vpow2.f32 %v6975_v3  ;;  %v2521_v57 = vmul.f32 %v6884_v42, %v2469_v9  ;;  %v2209_v44 = vmul.f32 %v6995_v59, %v2208_v18 }
 0x212   : > { %v1316_v43 = vsel %vm1313_vm10, %v1315_v1, %v1311_v12  ;;  %v7078_v37 = vpop.eup %4765  ;;  %v1855_v6 = vmul.f32 %v7083_v14, %v1820_v16  ;;  %v1890_v3 = vmul.f32 %v7089_v45, %v1511_v8  ;;  %4775 = vrcp.f32 %v7067_v58  ;;  %v8864_v16 = vld [vmem:[#allocation3_spill] sm:$0xff] }
 0x213   : > { %v1475_v25 = vadd.f32 %v6962_v17, %v1316_v43  ;;  %v733_v59 = vsub.f32 1.5, %v7062_v23  ;;  %4777 = vpow2.f32 %v2587_v30  ;;  %vm2331_vm12 = vcmp.eq.f32.partialorder %v6941_v0, inf }
 0x214   : > { %v905_v4 = vmul.f32 2.0, %v7070_v10  ;;  %v7097_v56 = vpop.eup %4767  ;;  %v2332_v50 = vsel %vm2331_vm12, %v6941_v0, %v2330_v20  ;;  %v7100_v5 = vsub.f32 %v1855_v6, %v1890_v3  ;;  %4779 = vrcp.f32 %v7078_v37  ;;  %v1700_v3 = vpop.f32.mrf.mxu2 }
 0x215   : > { %v1507_v49 = vmul.f32 0.5, %v1475_v25  ;;  %v7103_v8 = vpop.eup %4769  ;;  %v7105_v17 = vmul.f32 1.442695, %v2521_v57  ;;  %v2481_v51 = vmul.f32 0.6931472, %v4762_v11  ;;  %vm2333_vm13 = vcmp.eq.f32.partialorder %v6941_v0, 0.0 }
 0x216   : > { %v2334_v21 = vand.u32 2147483648, %v6941_v0  ;;  %v7109_v40 = vpop.eup %4771  ;;  %v2210_v35 = vmul.f32 %v2209_v44, %v6960_v48  ;;  %v7113_v9 = vand.u32 2147483647, %v7100_v5  ;;  %v867_v18 = vmul.f32 %v4760_v32, %v6845_v27  ;;  %v8865_v25 = vld [vmem:[#allocation10_spill] sm:$0xff] }
 0x217   : > { %v1752_v53 = vadd.f32 1.0, %v1507_v49  ;;  %v7116_v19 = vpop.eup %4773  ;;  %vm2211_vm14 = vcmp.eq.f32.partialorder %v6960_v48, inf  ;;  %v2277_v11 = vmul.f32 %v7103_v8, %v7049_v15  ;;  %v965_v30 = vmul.f32 1.442695, %v905_v4 }
 0x218   : > { %v2335_v12 = vsel %vm2333_vm13, %v2334_v21, %v2332_v50  ;;  %v4776_v0 = vpop.eup %4775  ;;  %vm2213_vm15 = vcmp.eq.f32.partialorder %v6960_v48, 0.0  ;;  %v1986_v47 = vmul.f32 %v7113_v9, %v7113_v9  ;;  %4781 = vtanh.f32 %v6986_v22 }
 0x219   : > { %v1784_v1 = vmul.f32 %v1752_v53, %v867_v18  ;;  %v7125_v27 = vpop.eup %4777  ;;  %v2527_v32 = vmul.f32 %v6884_v42, %v2481_v51  ;;  %v1379_v20 = vmul.f32 %v4776_v0, %v7067_v58  ;;  %4783 = vpow2.f32 %v965_v30 }
 0x21a   : > { %vm726_vm0 = vweird.f32 %v8864_v16  ;;  %v7130_v57 = vpop.eup %4779  ;;  %v2433_v44 = vadd.f32 %v2335_v12, %v6906_v24  ;;  %v2212_v43 = vsel %vm2211_vm14, %v6960_v48, %v2210_v35  ;;  %v7134_v6 = vadd.f32 1.0, %v1986_v47 }
 0x21b   : > { %v8866_v22 = vsub.f32 1.5, %v8865_v25  ;;  %v2278_v50 = vmul.f32 %v7103_v8, %v2277_v11  ;;  %v1816_v51 = vmul.f32 %v1784_v1, %v1700_v3  ;;  %v1380_v21 = vsub.f32 1.0, %v1379_v20  ;;  %vm727_vm2 = vmor %vm725_vm11, %vm726_vm0 }
 0x21c   : > { %v1319_v18 = vmul.f32 %v7130_v57, %v7078_v37  ;;  %vm735_vm1 = vweird.f32 %v6452_v54  ;;  %v2214_v24 = vand.u32 2147483648, %v6960_v48  ;;  %4785 = vrsqrt.f32 %v7134_v6 }
 0x21d   : > { %v724_v4 = vmul.f32 %v8864_v16, %v8866_v22  ;;  %v1387_v35 = vand.u32 2147483647, %v7067_v58  ;;  %v1389_v53 = vand.u32 2147483648, %v7067_v58  ;;  %v7151_v12 = vmul.f32 1.442695, %v2527_v32 }
 0x21e   : > { %v1851_v11 = vmul.f32 %v7083_v14, %v1816_v51  ;;  %v1886_v30 = vmul.f32 %v7089_v45, %v1507_v49  ;;  %4787 = vtanh.f32 %v7011_v41  ;;  %v4782_v47 = vpop.eup %4781  ;;  %v2215_v1 = vsel %vm2213_vm15, %v2214_v24, %v2212_v43 }
 0x21f   : > { %4789 = vlog2.f32 %v2433_v44  ;;  %v1381_v20 = vmul.f32 %v4776_v0, %v1380_v21  ;;  %vm1384_vm3 = vweird.f32 %v4776_v0  ;;  %v7158_v3 = vpop.eup %4783  ;;  %v2279_v25 = vmul.f32 0.5, %v2278_v50 }
 0x220   : > { %v7160_v22 = vsub.f32 %v1851_v11, %v1886_v30  ;;  %v1320_v32 = vsub.f32 1.0, %v1319_v18  ;;  %v7163_v46 = vsel %vm727_vm2, %v8864_v16, %v724_v4  ;;  %vm1383_vm4 = vweird.f32 %v7067_v58 }
 0x221   : > { %v1382_v51 = vadd.f32 %v4776_v0, %v1381_v20  ;;  %vm7166_vm5 = vcmp.eq.f32.partialorder %v1387_v35, 8.507059e+37  ;;  %v1390_v48 = vor.u32 1.1754944e-38, %v1389_v53  ;;  %vm1385_vm6 = vmor %vm1383_vm4, %vm1384_vm3  ;;  %v1329_v43 = vand.u32 2147483648, %v7078_v37 }
 0x222   : > { %8867 = vst [vmem:[#allocation34_spill] sm:$0xff] %v7160_v22  ;;  %v7171_v49 = vand.u32 2147483647, %v7160_v22  ;;  %v1321_v44 = vmul.f32 %v7130_v57, %v1320_v32  ;;  %4791 = vrcp.f32 %v7158_v3  ;;  %v7176_v16 = vpop.eup %4785  ;;  %vm1324_vm7 = vweird.f32 %v7130_v57 }
 0x223   : > { %v1386_v4 = vsel %vm1385_vm6, %v4776_v0, %v1382_v51  ;;  %v1327_v50 = vand.u32 2147483647, %v7078_v37  ;;  %v778_v21 = vmul.f32 %v7163_v46, %v6087_v60  ;;  %v2280_v24 = vsub.f32 1.5, %v2279_v25 }
 0x224   : > { %v4788_v18 = vpop.eup %4787  ;;  %v2337_v35 = vmul.f32 %v7176_v16, %v7134_v6  ;;  %v1982_v53 = vmul.f32 %v7171_v49, %v7171_v49  ;;  %v1391_v11 = vsel %vm7166_vm5, %v1390_v48, %v1386_v4  ;;  %v2423_v0 = vadd.f32 %v2215_v1, %v6925_v61 }
 0x225   : > { %v4790_v30 = vpop.eup %4789  ;;  %v1480_v20 = vadd.f32 %v7067_v58, %v1391_v11  ;;  %v1322_v32 = vadd.f32 %v7130_v57, %v1321_v44  ;;  %vm1323_vm8 = vweird.f32 %v7078_v37  ;;  %v1330_v41 = vor.u32 1.1754944e-38, %v1329_v43 }
 0x226   : > { %v2338_v60 = vmul.f32 %v7176_v16, %v2337_v35  ;;  %v7193_v25 = vadd.f32 1.0, %v1982_v53  ;;  %vm7197_vm9 = vmor %vm1323_vm8, %vm1324_vm7  ;;  %v734_v61 = vmul.f32 %v6530_v63, %v733_v59  ;;  %v7207_v48 = vmul.f32 0.3155117, %v778_v21 }
 0x227   : > { %v1512_v58 = vmul.f32 0.5, %v1480_v20  ;;  %v1326_v1 = vsel %vm7197_vm9, %v7130_v57, %v1322_v32  ;;  %vm736_vm10 = vweird.f32 %v6530_v63  ;;  %v2281_v4 = vmul.f32 %v7103_v8, %v2280_v24 }
 0x228   : > { %v4792_v44 = vpop.eup %4791  ;;  %4793 = vrsqrt.f32 %v7193_v25  ;;  %v872_v43 = vmul.f32 %v4782_v47, %v6953_v38  ;;  %vm1328_vm11 = vcmp.eq.f32.partialorder %v1327_v50, 8.507059e+37  ;;  %vm737_vm12 = vmor %vm735_vm1, %vm736_vm10  ;;  %vm2283_vm13 = vcmp.eq.f32.partialorder %v7049_v15, inf }
 0x229   : > { %v1757_v23 = vadd.f32 1.0, %v1512_v58  ;;  %v1331_v59 = vsel %vm1328_vm11, %v1330_v41, %v1326_v1  ;;  %4795 = vtanh.f32 %v7070_v10  ;;  %v2339_v57 = vmul.f32 0.5, %v2338_v60  ;;  %v1715_v10 = vpop.f32.mrf.mxu3 }
 0x22a   : > { %4797 = vlog2.f32 %v2423_v0  ;;  %v1476_v21 = vadd.f32 %v7078_v37, %v1331_v59  ;;  %v1394_v8 = vmul.f32 %v4792_v44, %v7158_v3  ;;  %v868_v35 = vmul.f32 %v4788_v18, %v6991_v13 }
 0x22b   : > { %v1789_v24 = vmul.f32 %v1757_v23, %v872_v43  ;;  %v906_v38 = vmul.f32 2.0, %v7207_v48  ;;  %v7222_v47 = vsel %vm737_vm12, %v6530_v63, %v734_v61  ;;  %vm745_vm14 = vweird.f32 %v6380_v31 }
 0x22c   : > { %v2282_v50 = vmul.f32 %v2281_v4, %v7049_v15  ;;  %vm2285_vm15 = vcmp.eq.f32.partialorder %v7049_v15, 0.0  ;;  %v1508_v53 = vmul.f32 0.5, %v1476_v21  ;;  %v1395_v11 = vsub.f32 1.0, %v1394_v8 }
 0x22d   : > { %v779_v37 = vmul.f32 %v7222_v47, %v6452_v54  ;;  %v1821_v0 = vmul.f32 %v1789_v24, %v1715_v10  ;;  %v1402_v13 = vand.u32 2147483647, %v7158_v3  ;;  %v1404_v18 = vand.u32 2147483648, %v7158_v3  ;;  %v1703_v54 = vpop.f32.mrf.mxu2 }
 0x22e   : > { %v967_v20 = vmul.f32 1.442695, %v906_v38  ;;  %v7231_v63 = vpop.eup %4793  ;;  %v2340_v32 = vsub.f32 1.5, %v2339_v57  ;;  %v1891_v60 = vmul.f32 %v7089_v45, %v1512_v58  ;;  %v1753_v51 = vadd.f32 1.0, %v1508_v53 }
 0x22f   : > { %vm1399_vm0 = vweird.f32 %v4792_v44  ;;  %v4796_v41 = vpop.eup %4795  ;;  %v2289_v61 = vmul.f32 %v7231_v63, %v7193_v25  ;;  %v1856_v1 = vmul.f32 %v7083_v14, %v1821_v0  ;;  %v1396_v4 = vmul.f32 %v4792_v44, %v1395_v11 }
 0x230   : > { %4799 = vpow2.f32 %v967_v20  ;;  %v4798_v43 = vpop.eup %4797  ;;  %v2491_v23 = vmul.f32 0.6931472, %v4790_v30  ;;  %v2286_v59 = vand.u32 2147483648, %v7049_v15  ;;  %v1785_v21 = vmul.f32 %v1753_v51, %v868_v35 }
 0x231   : > { %v7238_v8 = vmul.f32 0.3155117, %v779_v37  ;;  %v2284_v58 = vsel %vm2283_vm13, %v7049_v15, %v2282_v50  ;;  %v7243_v57 = vsub.f32 %v1856_v1, %v1891_v60  ;;  %v1397_v24 = vadd.f32 %v4792_v44, %v1396_v4 }
 0x232   : > { %vm1398_vm1 = vweird.f32 %v7158_v3  ;;  %v2290_v38 = vmul.f32 %v7231_v63, %v2289_v61  ;;  %v1817_v10 = vmul.f32 %v1785_v21, %v1703_v54  ;;  %vm1403_vm3 = vcmp.eq.f32.partialorder %v1402_v13, 8.507059e+37 }
 0x233   : > { %vm1400_vm2 = vmor %vm1398_vm1, %vm1399_vm0  ;;  %v1405_v30 = vor.u32 1.1754944e-38, %v1404_v18  ;;  %v2341_v35 = vmul.f32 %v7176_v16, %v2340_v32  ;;  %v7250_v11 = vand.u32 2147483647, %v7243_v57  ;;  %vm746_vm4 = vweird.f32 %v6480_v26 }
 0x234   : > { %v1401_v37 = vsel %vm1400_vm2, %v4792_v44, %v1397_v24  ;;  %v1852_v50 = vmul.f32 %v7083_v14, %v1817_v10  ;;  %v1887_v0 = vmul.f32 %v7089_v45, %v1508_v53  ;;  %v907_v60 = vmul.f32 2.0, %v7238_v8  ;;  %vm747_vm5 = vmor %vm745_vm14, %vm746_vm4 }
 0x235   : > { %v1406_v20 = vsel %vm1403_vm3, %v1405_v30, %v1401_v37  ;;  %4801 = vpow2.f32 %v7105_v17  ;;  %v2287_v16 = vsel %vm2285_vm15, %v2286_v59, %v2284_v58  ;;  %v1987_v13 = vmul.f32 %v7250_v11, %v7250_v11 }
 0x236   : > { %v7256_v51 = vpop.eup %4799  ;;  %v1481_v44 = vadd.f32 %v7158_v3, %v1406_v20  ;;  %v2291_v18 = vmul.f32 0.5, %v2290_v38  ;;  %v7264_v32 = vsub.f32 %v1852_v50, %v1887_v0  ;;  %v8872_v53 = vsub.f32 1.5, %v6679_v33  ;;  %v1718_v20 = vpop.f32.mrf.mxu3 }
 0x237   : > { %4803 = vrcp.f32 %v7256_v51  ;;  %v2532_v17 = vmul.f32 %v6884_v42, %v2491_v23  ;;  %v7272_v15 = vadd.f32 1.0, %v1987_v13  ;;  %v2471_v3 = vmul.f32 0.6931472, %v4798_v43 }
 0x238   : > { %v744_v61 = vmul.f32 %v6480_v26, %v8872_v53  ;;  %4805 = vpow2.f32 %v7151_v12  ;;  %v1513_v1 = vmul.f32 0.5, %v1481_v44  ;;  %v2342_v54 = vmul.f32 %v2341_v35, %v7134_v6 }
 0x239   : > { %v7280_v4 = vand.u32 2147483647, %v7264_v32  ;;  %v969_v33 = vmul.f32 1.442695, %v907_v60  ;;  %v2429_v59 = vadd.f32 %v2287_v16, %v7037_v55  ;;  %4807 = vrsqrt.f32 %v7272_v15 }
 0x23a   : > { %v873_v12 = vmul.f32 %v4796_v41, %v7034_v7  ;;  %v2292_v23 = vsub.f32 1.5, %v2291_v18  ;;  %v1758_v58 = vadd.f32 1.0, %v1513_v1  ;;  %v7288_v24 = vsel %vm747_vm5, %v6480_v26, %v744_v61 }
 0x23b   : > { %v1983_v21 = vmul.f32 %v7280_v4, %v7280_v4  ;;  %v7290_v43 = vpop.eup %4801  ;;  %v7292_v38 = vmul.f32 1.442695, %v2532_v17  ;;  %vm2343_vm6 = vcmp.eq.f32.partialorder %v7134_v6, inf  ;;  %4809 = vpow2.f32 %v969_v33 }
 0x23c   : > { %v2522_v10 = vmul.f32 %v6884_v42, %v2471_v3  ;;  %v2344_v7 = vsel %vm2343_vm6, %v7134_v6, %v2342_v54  ;;  %v1790_v30 = vmul.f32 %v1758_v58, %v873_v12  ;;  %4811 = vlog2.f32 %v2429_v59 }
 0x23d   : > { %v4804_v55 = vpop.eup %4803  ;;  %v7297_v41 = vadd.f32 1.0, %v1983_v21  ;;  %v2346_v26 = vand.u32 2147483648, %v7134_v6  ;;  %v780_v50 = vmul.f32 %v7288_v24, %v6380_v31  ;;  %vm2345_vm7 = vcmp.eq.f32.partialorder %v7134_v6, 0.0 }
 0x23e   : > { %v7299_v35 = vpop.eup %4805  ;;  %v1409_v37 = vmul.f32 %v4804_v55, %v7256_v51  ;;  %v2293_v0 = vmul.f32 %v7231_v63, %v2292_v23  ;;  %vm2295_vm8 = vcmp.eq.f32.partialorder %v7193_v25, inf  ;;  %v1822_v13 = vmul.f32 %v1790_v30, %v1718_v20 }
 0x23f   : > { %4813 = vrsqrt.f32 %v7297_v41  ;;  %v4808_v60 = vpop.eup %4807  ;;  %v2347_v16 = vsel %vm2345_vm7, %v2346_v26, %v2344_v7  ;;  %vm1413_vm9 = vweird.f32 %v7256_v51  ;;  %v1417_v53 = vand.u32 2147483647, %v7256_v51 }
 0x240   : > { %v1410_v44 = vsub.f32 1.0, %v1409_v37  ;;  %v2349_v18 = vmul.f32 %v4808_v60, %v7272_v15  ;;  %v1419_v31 = vand.u32 2147483648, %v7256_v51  ;;  %v7313_v6 = vmul.f32 0.3155117, %v780_v50 }
 0x241   : > { %v7315_v63 = vpop.eup %4809  ;;  %v1857_v61 = vmul.f32 %v7083_v14, %v1822_v13  ;;  %v1892_v17 = vmul.f32 %v7089_v45, %v1513_v1  ;;  %vm1414_vm10 = vweird.f32 %v4804_v55  ;;  %v2294_v54 = vmul.f32 %v2293_v0, %v7193_v25 }
 0x242   : > { %v1411_v3 = vmul.f32 %v4804_v55, %v1410_v44  ;;  %v2298_v33 = vand.u32 2147483648, %v7193_v25  ;;  %v2350_v59 = vmul.f32 %v4808_v60, %v2349_v18  ;;  %4815 = vtanh.f32 %v7207_v48  ;;  %v4812_v12 = vpop.eup %4811  ;;  %vm1415_vm11 = vmor %vm1413_vm9, %vm1414_vm10 }
 0x243   : > { %v2434_v23 = vadd.f32 %v2347_v16, %v7113_v9  ;;  %v7323_v21 = vsub.f32 %v1857_v61, %v1892_v17  ;;  %4817 = vrcp.f32 %v7315_v63  ;;  %v1420_v1 = vor.u32 1.1754944e-38, %v1419_v31 }
 0x244   : > { %v1412_v58 = vadd.f32 %v4804_v55, %v1411_v3  ;;  %v2351_v30 = vmul.f32 0.5, %v2350_v59  ;;  %4819 = vtanh.f32 %v7238_v8  ;;  %v908_v26 = vmul.f32 2.0, %v7313_v6 }
 0x245   : > { %v4814_v7 = vpop.eup %4813  ;;  %v7332_v37 = vand.u32 2147483647, %v7323_v21  ;;  %vm1418_vm12 = vcmp.eq.f32.partialorder %v1417_v53, 8.507059e+37  ;;  %v2296_v50 = vsel %vm2295_vm8, %v7193_v25, %v2294_v54  ;;  %4821 = vlog2.f32 %v2434_v23 }
 0x246   : > { %v2301_v48 = vmul.f32 %v4814_v7, %v7297_v41  ;;  %v1416_v9 = vsel %vm1415_vm11, %v4804_v55, %v1412_v58  ;;  %v2352_v0 = vsub.f32 1.5, %v2351_v30  ;;  %v971_v16 = vmul.f32 1.442695, %v908_v26  ;;  %v8873_v30 = vld [vmem:[#allocation38_spill] sm:$0xff] }
 0x247   : > { %v1421_v20 = vsel %vm1418_vm12, %v1420_v1, %v1416_v9  ;;  %v1988_v8 = vmul.f32 %v7332_v37, %v7332_v37  ;;  %v7340_v31 = vmul.f32 1.442695, %v2522_v10  ;;  %vm2297_vm13 = vcmp.eq.f32.partialorder %v7193_v25, 0.0 }
 0x248   : > { %v2302_v13 = vmul.f32 %v4814_v7, %v2301_v48  ;;  %v1482_v44 = vadd.f32 %v7256_v51, %v1421_v20  ;;  %v4816_v18 = vpop.eup %4815  ;;  %v2353_v55 = vmul.f32 %v4808_v60, %v2352_v0  ;;  %4823 = vpow2.f32 %v971_v16  ;;  %v1721_v16 = vpop.f32.mrf.mxu3 }
 0x249   : > { %v4818_v53 = vpop.eup %4817  ;;  %v2299_v61 = vsel %vm2297_vm13, %v2298_v33, %v2296_v50  ;;  %v7343_v3 = vadd.f32 1.0, %v1988_v8  ;;  %v2483_v23 = vmul.f32 0.6931472, %v4812_v12  ;;  %4825 = vrcp.f32 %v8873_v30 }
 0x24a   : > { %v2303_v17 = vmul.f32 0.5, %v2302_v13  ;;  %v1514_v54 = vmul.f32 0.5, %v1482_v44  ;;  %v7345_v59 = vpop.eup %4819  ;;  %v2354_v58 = vmul.f32 %v2353_v55, %v7272_v15  ;;  %v1424_v51 = vmul.f32 %v4818_v53, %v7315_v63 }
 0x24b   : > { %vm2355_vm14 = vcmp.eq.f32.partialorder %v7272_v15, inf  ;;  %4827 = vrsqrt.f32 %v7343_v3  ;;  %v874_v10 = vmul.f32 %v4816_v18, %v7163_v46  ;;  %v2430_v60 = vadd.f32 %v2299_v61, %v7171_v49  ;;  %v4822_v1 = vpop.eup %4821 }
 0x24c   : > { %v2304_v25 = vsub.f32 1.5, %v2303_v17  ;;  %vm2357_vm15 = vcmp.eq.f32.partialorder %v7272_v15, 0.0  ;;  %v2358_v33 = vand.u32 2147483648, %v7272_v15  ;;  %v1759_v12 = vadd.f32 1.0, %v1514_v54 }
 0x24d   : > { %v2356_v26 = vsel %vm2355_vm14, %v7272_v15, %v2354_v58  ;;  %v1425_v9 = vsub.f32 1.0, %v1424_v51  ;;  %v1434_v50 = vand.u32 2147483648, %v7315_v63  ;;  %vm2307_vm0 = vcmp.eq.f32.partialorder %v7297_v41, inf }
 0x24e   : > { %v2305_v48 = vmul.f32 %v4814_v7, %v2304_v25  ;;  %v7358_v0 = vpop.eup %4823  ;;  %vm2309_vm1 = vcmp.eq.f32.partialorder %v7297_v41, 0.0  ;;  %v1791_v46 = vmul.f32 %v1759_v12, %v874_v10  ;;  %v1432_v49 = vand.u32 2147483647, %v7315_v63 }
 0x24f   : > { %v1426_v13 = vmul.f32 %v4818_v53, %v1425_v9  ;;  %vm1429_vm2 = vweird.f32 %v4818_v53  ;;  %4829 = vrcp.f32 %v7358_v0  ;;  %v7365_v7 = vpop.eup %4825  ;;  %v2359_v8 = vsel %vm2357_vm15, %v2358_v33, %v2356_v26 }
 0x250   : > { %v2306_v20 = vmul.f32 %v2305_v48, %v7297_v41  ;;  %4831 = vlog2.f32 %v2430_v60  ;;  %v2310_v44 = vand.u32 2147483648, %v7297_v41  ;;  %v1823_v18 = vmul.f32 %v1791_v46, %v1721_v16 }
 0x251   : > { %v4828_v55 = vpop.eup %4827  ;;  %v1427_v17 = vadd.f32 %v4818_v53, %v1426_v13  ;;  %vm1428_vm3 = vweird.f32 %v7315_v63  ;;  %v1435_v58 = vor.u32 1.1754944e-38, %v1434_v50  ;;  %v1893_v15 = vmul.f32 %v7089_v45, %v1514_v54 }
 0x252   : > { %v2308_v61 = vsel %vm2307_vm0, %v7297_v41, %v2306_v20  ;;  %v2361_v25 = vmul.f32 %v4828_v55, %v7343_v3  ;;  %v1858_v10 = vmul.f32 %v7083_v14, %v1823_v18  ;;  %vm1430_vm4 = vmor %vm1428_vm3, %vm1429_vm2  ;;  %v2435_v60 = vadd.f32 %v2359_v8, %v7250_v11 }
 0x253   : > { %v2311_v51 = vsel %vm2309_vm1, %v2310_v44, %v2308_v61  ;;  %v1431_v33 = vsel %vm1430_vm4, %v4818_v53, %v1427_v17  ;;  %vm1433_vm5 = vcmp.eq.f32.partialorder %v1432_v49, 8.507059e+37  ;;  %v2634_v12 = vmul.f32 %v7365_v7, %v8873_v30 }
 0x254   : > { %v2431_v26 = vadd.f32 %v2311_v51, %v7280_v4  ;;  %v2362_v48 = vmul.f32 %v4828_v55, %v2361_v25  ;;  %v7382_v41 = vsub.f32 %v1858_v10, %v1893_v15  ;;  %v1436_v9 = vsel %vm1433_vm5, %v1435_v58, %v1431_v33 }
 0x255   : > { %v4830_v50 = vpop.eup %4829  ;;  %4833 = vpow2.f32 %v7292_v38  ;;  %v2528_v54 = vmul.f32 %v6884_v42, %v2483_v23  ;;  %v2493_v46 = vmul.f32 0.6931472, %v4822_v1  ;;  %v1483_v20 = vadd.f32 %v7315_v63, %v1436_v9 }
 0x256   : > { %8874 = vst [vmem:[#allocation23_spill] sm:$0xff] %v7382_v41  ;;  %v4832_v11 = vpop.eup %4831  ;;  %4835 = vpow2.f32 %v7340_v31  ;;  %v2363_v53 = vmul.f32 0.5, %v2362_v48  ;;  %v7389_v49 = vand.u32 2147483647, %v7382_v41  ;;  %v1439_v4 = vmul.f32 %v4830_v50, %v7358_v0 }
 0x257   : > { %4837 = vlog2.f32 %v2435_v60  ;;  %v1515_v16 = vmul.f32 0.5, %v1483_v20  ;;  %v2635_v13 = vsub.f32 1.0, %v2634_v12  ;;  %v2581_v1 = vmul.f32 1.442695, %v2528_v54 }
 0x258   : > { %4839 = vlog2.f32 %v2431_v26  ;;  %v2364_v8 = vsub.f32 1.5, %v2363_v53  ;;  %v1989_v38 = vmul.f32 %v7389_v49, %v7389_v49  ;;  %v1440_v23 = vsub.f32 1.0, %v1439_v4 }
 0x259   : > { %v2533_v63 = vmul.f32 %v6884_v42, %v2493_v46  ;;  %v875_v31 = vmul.f32 %v7345_v59, %v7222_v47  ;;  %v1760_v44 = vadd.f32 1.0, %v1515_v16  ;;  %4841 = vtanh.f32 %v7313_v6  ;;  %v1724_v47 = vpop.f32.mrf.mxu3 }
 0x25a   : > { %v2365_v18 = vmul.f32 %v4828_v55, %v2364_v8  ;;  %v7397_v61 = vadd.f32 1.0, %v1989_v38  ;;  %v1441_v17 = vmul.f32 %v4830_v50, %v1440_v23  ;;  %v2485_v51 = vmul.f32 0.6931472, %v4832_v11 }
 0x25b   : > { %v7400_v58 = vpop.eup %4833  ;;  %v1792_v25 = vmul.f32 %v1760_v44, %v875_v31  ;;  %v1449_v10 = vand.u32 2147483648, %v7358_v0  ;;  %v2636_v15 = vmul.f32 %v7365_v7, %v2635_v13  ;;  %vm1444_vm6 = vweird.f32 %v4830_v50 }
 0x25c   : > { %v7404_v60 = vpop.eup %4835  ;;  %v2366_v42 = vmul.f32 %v2365_v18, %v7343_v3  ;;  %4843 = vrsqrt.f32 %v7397_v61  ;;  %v1447_v59 = vand.u32 2147483647, %v7358_v0  ;;  %vm2367_vm7 = vcmp.eq.f32.partialorder %v7343_v3, inf }
 0x25d   : > { %v4838_v6 = vpop.eup %4837  ;;  %vm2369_vm8 = vcmp.eq.f32.partialorder %v7343_v3, 0.0  ;;  %v1824_v55 = vmul.f32 %v1792_v25, %v1724_v47  ;;  %vm2639_vm9 = vweird.f32 %v7365_v7  ;;  %v2370_v26 = vand.u32 2147483648, %v7343_v3 }
 0x25e   : > { %v4840_v33 = vpop.eup %4839  ;;  %v2368_v12 = vsel %vm2367_vm7, %v7343_v3, %v2366_v42  ;;  %v1442_v48 = vadd.f32 %v4830_v50, %v1441_v17  ;;  %vm1443_vm10 = vweird.f32 %v7358_v0  ;;  %v1894_v54 = vmul.f32 %v7089_v45, %v1515_v16 }
 0x25f   : > { %v1859_v9 = vmul.f32 %v7083_v14, %v1824_v55  ;;  %vm1445_vm11 = vmor %vm1443_vm10, %vm1444_vm6  ;;  %v1450_v46 = vor.u32 1.1754944e-38, %v1449_v10  ;;  %v2637_v20 = vadd.f32 %v7365_v7, %v2636_v15  ;;  %v4842_v11 = vpop.eup %4841  ;;  %v2495_v53 = vmul.f32 0.6931472, %v4838_v6 }
 0x260   : > { %v1446_v4 = vsel %vm1445_vm11, %v4830_v50, %v1442_v48  ;;  %vm1448_vm12 = vcmp.eq.f32.partialorder %v1447_v59, 8.507059e+37  ;;  %v2644_v13 = vand.u32 2147483648, %v8873_v30  ;;  %v2487_v8 = vmul.f32 0.6931472, %v4840_v33  ;;  %v7429_v50 = vld [vmem:[%s8639_s4] ss:$0 sm:$0xff] }
 0x261   : > { %v2371_v38 = vsel %vm2369_vm8, %v2370_v26, %v2368_v12  ;;  %v7421_v23 = vsub.f32 %v1859_v9, %v1894_v54  ;;  %v1451_v31 = vsel %vm1448_vm12, %v1450_v46, %v1446_v4  ;;  %4845 = vpow2.f32 %v2581_v1  ;;  %v8878_v12 = vld [vmem:[#allocation32_spill] sm:$0xff]  ;;  %v1727_v9 = vpop.f32.mrf.mxu3 }
 0x262   : > { %v4844_v44 = vpop.eup %4843  ;;  %v1484_v16 = vadd.f32 %v7358_v0, %v1451_v31  ;;  %vm2638_vm13 = vweird.f32 %v8873_v30  ;;  %v2642_v18 = vand.u32 2147483647, %v8873_v30  ;;  %v2591_v17 = vmul.f32 1.442695, %v2533_v63 }
 0x263   : > { %8875 = vst [vmem:[#allocation30_spill] sm:$0xff] %v7421_v23  ;;  %v2529_v3 = vmul.f32 %v7429_v50, %v2485_v51  ;;  %v2373_v25 = vmul.f32 %v4844_v44, %v7397_v61  ;;  %v7434_v10 = vand.u32 2147483647, %v7421_v23  ;;  %vm7438_vm14 = vmor %vm2638_vm13, %vm2639_vm9  ;;  %v2534_v1 = vmul.f32 %v7429_v50, %v2495_v53 }
 0x264   : > { %v2436_v63 = vadd.f32 %v2371_v38, %v7332_v37  ;;  %v1516_v15 = vmul.f32 0.5, %v1484_v16  ;;  %v2641_v51 = vsel %vm7438_vm14, %v7365_v7, %v2637_v20  ;;  %v2530_v42 = vmul.f32 %v7429_v50, %v2487_v8 }
 0x265   : > { %v2374_v47 = vmul.f32 %v4844_v44, %v2373_v25  ;;  %v1990_v59 = vmul.f32 %v7434_v10, %v7434_v10  ;;  %v2645_v6 = vor.u32 1.1754944e-38, %v2644_v13  ;;  %v876_v55 = vmul.f32 %v4842_v11, %v7288_v24  ;;  %v8880_v25 = vld [vmem:[#allocation9_spill] sm:$0xff] }
 0x266   : > { %v1761_v33 = vadd.f32 1.0, %v1516_v15  ;;  %vm2643_vm15 = vcmp.eq.f32.partialorder %v2642_v18, 8.507059e+37  ;;  %4847 = vrcp.f32 %v8878_v12  ;;  %v2583_v26 = vmul.f32 1.442695, %v2529_v3 }
 0x267   : > { %v2375_v37 = vmul.f32 0.5, %v2374_v47  ;;  %v7452_v48 = vadd.f32 1.0, %v1990_v59  ;;  %v2646_v54 = vsel %vm2643_vm15, %v2645_v6, %v2641_v51  ;;  %v7454_v7 = vpop.eup %4845  ;;  %v2593_v46 = vmul.f32 1.442695, %v2534_v1  ;;  %v8881_v59 = vld [vmem:[#allocation5_spill] sm:$0xff] }
 0x268   : > { %4849 = vlog2.f32 %v2436_v63  ;;  %v1793_v20 = vmul.f32 %v1761_v33, %v876_v55  ;;  %v2585_v53 = vmul.f32 1.442695, %v2530_v42  ;;  %v3085_v11 = vsub.f32 %v8873_v30, %v2646_v54 }
 0x269   : > { %v2376_v4 = vsub.f32 1.5, %v2375_v37  ;;  %4851 = vrsqrt.f32 %v7452_v48  ;;  %vm2379_vm0 = vcmp.eq.f32.partialorder %v7397_v61, inf  ;;  %vm2381_vm1 = vcmp.eq.f32.partialorder %v7397_v61, 0.0 }
 0x26a   : > { %4853 = vpow2.f32 %v2591_v17  ;;  %v1825_v24 = vmul.f32 %v1793_v20, %v1727_v9  ;;  %v1895_v31 = vmul.f32 %v7089_v45, %v1516_v15  ;;  %v2382_v18 = vand.u32 2147483648, %v7397_v61 }
 0x26b   : > { %4855 = vpow2.f32 %v2583_v26  ;;  %v2377_v13 = vmul.f32 %v4844_v44, %v2376_v4  ;;  %v7467_v44 = vmul.f32 0.5, %v3085_v11  ;;  %vm2608_vm2 = vweird.f32 %v8878_v12  ;;  %v8883_v4 = vld [vmem:[#allocation15_spill] sm:$0xff]  ;;  %v8890_v11 = vld [vmem:[#allocation40_spill] sm:$0xff] }
 0x26c   : > { %v4848_v8 = vpop.eup %4847  ;;  %4857 = vpow2.f32 %v2593_v46  ;;  %v1860_v38 = vmul.f32 %v7083_v14, %v1825_v24  ;;  %v2612_v1 = vand.u32 2147483647, %v8878_v12  ;;  %v2614_v63 = vand.u32 2147483648, %v8878_v12  ;;  %v8882_v46 = vld [vmem:[#allocation39_spill] sm:$0xff] }
 0x26d   : > { %4859 = vpow2.f32 %v2585_v53  ;;  %v2378_v16 = vmul.f32 %v2377_v13, %v7397_v61  ;;  %v2604_v17 = vmul.f32 %v4848_v8, %v8878_v12  ;;  %vm2609_vm3 = vweird.f32 %v4848_v8 }
 0x26e   : > { %v4850_v30 = vpop.eup %4849  ;;  %v7465_v3 = vsub.f32 %v1860_v38, %v1895_v31  ;;  %4861 = vrcp.f32 %v8880_v25  ;;  %vm2391_vm4 = vcmp.eq.f32.partialorder %v7452_v48, inf  ;;  %vm3149_vm5 = vcmp.lt.f32.partialorder %v8883_v4, 0.0  ;;  %vm2610_vm8 = vmor %vm2608_vm2, %vm2609_vm3 }
 0x26f   : > { %v4852_v0 = vpop.eup %4851  ;;  %v2380_v14 = vsel %vm2379_vm0, %v7397_v61, %v2378_v16  ;;  %v2605_v45 = vsub.f32 1.0, %v2604_v17  ;;  %4863 = vrcp.f32 %v8881_v59  ;;  %v2497_v55 = vmul.f32 0.6931472, %v4850_v30 }
 0x270   : > { %8879 = vst [vmem:[#allocation26_spill] sm:$0xff] %v7465_v3  ;;  %v7476_v15 = vpop.eup %4853  ;;  %v2383_v51 = vsel %vm2381_vm1, %v2382_v18, %v2380_v14  ;;  %v2385_v42 = vmul.f32 %v4852_v0, %v7452_v48  ;;  %v7482_v47 = vand.u32 2147483647, %v7465_v3  ;;  %v2394_v61 = vand.u32 2147483648, %v7452_v48  ;;  %v8886_v18 = vld [vmem:[#allocation33_spill] sm:$0xff]  ;;  %v8887_v14 = vld [vmem:[#allocation8_spill] sm:$0xff] }
 0x271   : > { %v7485_v6 = vpop.eup %4855  ;;  %v2606_v33 = vmul.f32 %v4848_v8, %v2605_v45  ;;  %4865 = vrcp.f32 %v8882_v46  ;;  %v2437_v53 = vadd.f32 %v2383_v51, %v7389_v49  ;;  %vm7499_vm6 = vcmp.eq.f32.partialorder %v2612_v1, 8.507059e+37 }
 0x272   : > { %v7488_v37 = vpop.eup %4857  ;;  %v2386_v9 = vmul.f32 %v4852_v0, %v2385_v42  ;;  %v1991_v54 = vmul.f32 %v7482_v47, %v7482_v47  ;;  %v2687_v13 = vand.u32 2147483647, %v8880_v25  ;;  %vm2393_vm7 = vcmp.eq.f32.partialorder %v7452_v48, 0.0 }
 0x273   : > { %v7494_v20 = vpop.eup %4859  ;;  %v2607_v24 = vadd.f32 %v4848_v8, %v2606_v33  ;;  %v2689_v49 = vand.u32 2147483648, %v8880_v25  ;;  %4867 = vrcp.f32 %v8886_v18  ;;  %v2615_v30 = vor.u32 1.1754944e-38, %v2614_v63 }
 0x274   : > { %v4862_v38 = vpop.eup %4861  ;;  %v2387_v31 = vmul.f32 0.5, %v2386_v9  ;;  %v7505_v16 = vadd.f32 1.0, %v1991_v54  ;;  %vm3147_vm9 = vcmp.lt.f32.partialorder %v8887_v14, 0.0  ;;  %v7518_v42 = vmul.f32 %v7429_v50, %v2497_v55 }
 0x275   : > { %v2611_v17 = vsel %vm2610_vm8, %v4848_v8, %v2607_v24  ;;  %v2679_v45 = vmul.f32 %v4862_v38, %v8880_v25  ;;  %v7515_v51 = vpop.eup %4863  ;;  %vm2683_vm10 = vweird.f32 %v8880_v25  ;;  %v2657_v9 = vand.u32 2147483647, %v8882_v46 }
 0x276   : > { %v2388_v33 = vsub.f32 1.5, %v2387_v31  ;;  %4869 = vrsqrt.f32 %v7505_v16  ;;  %v2616_v8 = vsel %vm7499_vm6, %v2615_v30, %v2611_v17  ;;  %vm7528_vm11 = vcmp.eq.f32.partialorder %v2687_v13, 8.507059e+37 }
 0x277   : > { %4871 = vlog2.f32 %v2437_v53  ;;  %v2680_v63 = vsub.f32 1.0, %v2679_v45  ;;  %v7525_v54 = vpop.eup %4865  ;;  %v3083_v1 = vsub.f32 %v8878_v12, %v2616_v8  ;;  %v2690_v31 = vor.u32 1.1754944e-38, %v2689_v49 }
 0x278   : > { %v2389_v24 = vmul.f32 %v4852_v0, %v2388_v33  ;;  %vm2684_vm12 = vweird.f32 %v4862_v38  ;;  %v2649_v53 = vmul.f32 %v7525_v54, %v8882_v46  ;;  %vm2653_vm13 = vweird.f32 %v8882_v46 }
 0x279   : > { %v2681_v26 = vmul.f32 %v4862_v38, %v2680_v63  ;;  %4873 = vrcp.f32 %v8890_v11  ;;  %v7536_v17 = vpop.eup %4867  ;;  %v3181_v12 = vsub.f32 0.0, %v7467_v44  ;;  %v3115_v13 = vmul.f32 0.5, %v3083_v1  ;;  %vm2685_vm15 = vmor %vm2683_vm10, %vm2684_vm12 }
 0x27a   : > { %v2390_v0 = vmul.f32 %v2389_v24, %v7452_v48  ;;  %v2659_v30 = vand.u32 2147483648, %v8882_v46  ;;  %v2650_v49 = vsub.f32 1.0, %v2649_v53  ;;  %vm7541_vm14 = vcmp.eq.f32.partialorder %v2657_v9, 8.507059e+37  ;;  %v8893_v9 = vld [vmem:[#allocation35_spill] sm:$0xff] }
 0x27b   : > { %v2682_v45 = vadd.f32 %v4862_v38, %v2681_v26  ;;  %v2627_v8 = vand.u32 2147483647, %v8886_v18  ;;  %v2629_v63 = vand.u32 2147483648, %v8886_v18  ;;  %v7553_v1 = vsel %vm3149_vm5, %v3181_v12, %v7467_v44 }
 0x27c   : > { %v4870_v3 = vpop.eup %4869  ;;  %v2392_v24 = vsel %vm2391_vm4, %v7452_v48, %v2390_v0  ;;  %v3179_v26 = vsub.f32 0.0, %v3115_v13  ;;  %vm3152_vm0 = vcmp.lt.f32.partialorder %v8893_v9, 0.0  ;;  %v2619_v53 = vmul.f32 %v7536_v17, %v8886_v18 }
 0x27d   : > { %vm2623_vm1 = vweird.f32 %v8886_v18  ;;  %v4872_v23 = vpop.eup %4871  ;;  %v2395_v0 = vsel %vm2393_vm7, %v2394_v61, %v2392_v24  ;;  %v2397_v4 = vmul.f32 %v4870_v3, %v7505_v16  ;;  %v3245_v44 = vmul.f32 %v7553_v1, %v7553_v1 }
 0x27e   : > { %v2686_v12 = vsel %vm2685_vm15, %v4862_v38, %v2682_v45  ;;  %v2438_v29 = vadd.f32 %v2395_v0, %v7434_v10  ;;  %v7570_v22 = vsel %vm3147_vm9, %v3179_v26, %v3115_v13  ;;  %vm2654_vm2 = vweird.f32 %v7525_v54 }
 0x27f   : > { %v2691_v41 = vsel %vm7528_vm11, %v2690_v31, %v2686_v12  ;;  %v7575_v34 = vpop.eup %4873  ;;  %v2398_v48 = vmul.f32 %v4870_v3, %v2397_v4  ;;  %3279 = vadd.xlane.f32.xlu1 %v3245_v44  ;;  %v3243_v61 = vmul.f32 %v7570_v22, %v7570_v22  ;;  %v2651_v10 = vmul.f32 %v7525_v54, %v2650_v49  ;;  %vm2655_vm6 = vmor %vm2653_vm13, %vm2654_vm2 }
 0x280   : > { %v3088_v38 = vsub.f32 %v8880_v25, %v2691_v41  ;;  %v7581_v45 = vmul.f32 0.6931472, %v4872_v23  ;;  %vm2403_vm3 = vcmp.eq.f32.partialorder %v7505_v16, inf  ;;  %v2406_v14 = vand.u32 2147483648, %v7505_v16  ;;  %v8894_v41 = vld [vmem:[#allocation18_spill] sm:$0xff]  ;;  %v8898_v25 = vld [vmem:[#allocation20_spill] sm:$0xff] }
 0x281   : > { %v2660_v55 = vor.u32 1.1754944e-38, %v2659_v30  ;;  %v2620_v31 = vsub.f32 1.0, %v2619_v53  ;;  %v2399_v13 = vmul.f32 0.5, %v2398_v48  ;;  %vm2405_vm4 = vcmp.eq.f32.partialorder %v7505_v16, 0.0  ;;  %3275 = vadd.xlane.f32.xlu2 %v3243_v61 }
 0x282   : > { %v3120_v24 = vmul.f32 0.5, %v3088_v38  ;;  %v2652_v26 = vadd.f32 %v7525_v54, %v2651_v10  ;;  %vm2624_vm5 = vweird.f32 %v7536_v17  ;;  %vm3150_vm7 = vcmp.lt.f32.partialorder %v8894_v41, 0.0 }
 0x283   : > { %v2621_v23 = vmul.f32 %v7536_v17, %v2620_v31  ;;  %vm7594_vm8 = vcmp.eq.f32.partialorder %v2627_v8, 8.507059e+37  ;;  %v2630_v30 = vor.u32 1.1754944e-38, %v2629_v63  ;;  %v2724_v49 = vmul.f32 %v7575_v34, %v8890_v11  ;;  %vm2625_vm9 = vmor %vm2623_vm1, %vm2624_vm5 }
 0x284   : > { %4875 = vlog2.f32 %v2438_v29  ;;  %v2400_v53 = vsub.f32 1.5, %v2399_v13  ;;  %v3184_v0 = vsub.f32 0.0, %v3120_v24  ;;  %v2656_v4 = vsel %vm2655_vm6, %v7525_v54, %v2652_v26  ;;  %v8897_v29 = vld [vmem:[#allocation12_spill] sm:$0xff] }
 0x285   : > { %v2661_v44 = vsel %vm7541_vm14, %v2660_v55, %v2656_v4  ;;  %v2622_v12 = vadd.f32 %v7536_v17, %v2621_v23  ;;  %v2725_v48 = vsub.f32 1.0, %v2724_v49  ;;  %v2734_v8 = vand.u32 2147483648, %v8890_v11 }
 0x286   : > { %v2401_v61 = vmul.f32 %v4870_v3, %v2400_v53  ;;  %v7607_v63 = vsel %vm3152_vm0, %v3184_v0, %v3120_v24  ;;  %v3086_v38 = vsub.f32 %v8882_v46, %v2661_v44  ;;  %vm3148_vm10 = vcmp.lt.f32.partialorder %v8897_v29, 0.0  ;;  %v8899_v53 = vld [vmem:[#allocation42_spill] sm:$0xff] }
 0x287   : > { %vm2729_vm11 = vweird.f32 %v7575_v34  ;;  %v3248_v54 = vmul.f32 %v7607_v63, %v7607_v63  ;;  %v2626_v3 = vsel %vm2625_vm9, %v7536_v17, %v2622_v12  ;;  %v2726_v33 = vmul.f32 %v7575_v34, %v2725_v48 }
 0x288   : > { %v2732_v9 = vand.u32 2147483647, %v8890_v11  ;;  %v2402_v46 = vmul.f32 %v2401_v61, %v7505_v16  ;;  %v3118_v10 = vmul.f32 0.5, %v3086_v38  ;;  %v2631_v55 = vsel %vm7594_vm8, %v2630_v30, %v2626_v3 }
 0x289   : > { %v2664_v31 = vmul.f32 %v7515_v51, %v8881_v59  ;;  %3285 = vadd.xlane.f32.xlu1 %v3248_v54  ;;  %v3084_v13 = vsub.f32 %v8886_v18, %v2631_v55  ;;  %v2727_v24 = vadd.f32 %v7575_v34, %v2726_v33  ;;  %vm2728_vm12 = vweird.f32 %v8890_v11  ;;  %v8902_v55 = vld [vmem:[#allocation43_spill] sm:$0xff] }
 0x28a   : > { %v2735_v17 = vor.u32 1.1754944e-38, %v2734_v8  ;;  %v4876_v26 = vpop.eup %4875  ;;  %v2404_v23 = vsel %vm2403_vm3, %v7505_v16, %v2402_v46  ;;  %v3182_v49 = vsub.f32 0.0, %v3118_v10  ;;  %vm2730_vm13 = vmor %vm2728_vm12, %vm2729_vm11  ;;  %vm3155_vm14 = vcmp.lt.f32.partialorder %v8898_v25, 0.0 }
 0x28b   : > { %v2665_v30 = vsub.f32 1.0, %v2664_v31  ;;  %4877 = vrcp.f32 %v8899_v53  ;;  %v2407_v18 = vsel %vm2405_vm4, %v2406_v14, %v2404_v23  ;;  %v3116_v0 = vmul.f32 0.5, %v3084_v13 }
 0x28c   : > { %v2731_v4 = vsel %vm2730_vm13, %v7575_v34, %v2727_v24  ;;  %vm2733_vm15 = vcmp.eq.f32.partialorder %v2732_v9, 8.507059e+37  ;;  %v7641_v44 = vsel %vm3150_vm7, %v3182_v49, %v3118_v10  ;;  %vm2669_vm0 = vweird.f32 %v7515_v51  ;;  %v8904_v49 = vld [vmem:[#allocation13_spill] sm:$0xff] }
 0x28d   : > { %v2736_v12 = vsel %vm2733_vm15, %v2735_v17, %v2731_v4  ;;  %v2666_v48 = vmul.f32 %v7515_v51, %v2665_v30  ;;  %v2439_v8 = vadd.f32 %v2407_v18, %v7482_v47  ;;  %v3246_v61 = vmul.f32 %v7641_v44, %v7641_v44 }
 0x28e   : > { %v3180_v16 = vsub.f32 0.0, %v3116_v0  ;;  %v3091_v14 = vsub.f32 %v8890_v11, %v2736_v12  ;;  %v2595_v34 = vmul.f32 1.442695, %v7518_v42  ;;  %vm2668_vm1 = vweird.f32 %v8881_v59 }
 0x28f   : > { %v2667_v38 = vadd.f32 %v7515_v51, %v2666_v48  ;;  %v8900_v41 = vand.u32 2147483647, %v8881_v59  ;;  %v2536_v54 = vmul.f32 %v7429_v50, %v7581_v45  ;;  %3281 = vadd.xlane.f32.xlu2 %v3246_v61  ;;  %vm2670_vm3 = vmor %vm2668_vm1, %vm2669_vm0  ;;  %v8901_v11 = vand.u32 2147483648, %v8881_v59 }
 0x290   : > { %v7658_v47 = vsel %vm3148_vm10, %v3180_v16, %v3116_v0  ;;  %v3123_v3 = vmul.f32 0.5, %v3091_v14  ;;  %v2501_v9 = vmul.f32 0.6931472, %v4876_v26  ;;  %4879 = vrcp.f32 %v8902_v55  ;;  %v8907_v16 = vld [vmem:[#allocation14_spill] sm:$0xff] }
 0x291   : > { %vm2673_vm2 = vcmp.eq.f32.partialorder %v8900_v41, 8.507059e+37  ;;  %v2675_v42 = vor.u32 1.1754944e-38, %v8901_v11  ;;  %v4878_v33 = vpop.eup %4877  ;;  %v3244_v46 = vmul.f32 %v7658_v47, %v7658_v47  ;;  %v2671_v10 = vsel %vm2670_vm3, %v7515_v51, %v2667_v38  ;;  %v8903_v51 = vld [vmem:[#allocation24_spill] sm:$0xff]  ;;  %v8908_v11 = vld [vmem:[#allocation2_spill] sm:$0xff] }
 0x292   : > { %4881 = vlog2.f32 %v2439_v8  ;;  %v3187_v45 = vsub.f32 0.0, %v3123_v3  ;;  %v2694_v29 = vmul.f32 %v4878_v33, %v8899_v53  ;;  %v2702_v24 = vand.u32 2147483647, %v8899_v53 }
 0x293   : > { %v2676_v31 = vsel %vm2673_vm2, %v2675_v42, %v2671_v10  ;;  %4883 = vpow2.f32 %v2595_v34  ;;  %3277 = vadd.xlane.f32.xlu0 %v3244_v46  ;;  %v2704_v17 = vand.u32 2147483648, %v8899_v53  ;;  %vm3151_vm4 = vcmp.lt.f32.partialorder %v8903_v51, 0.0 }
 0x294   : > { %v3087_v13 = vsub.f32 %v8881_v59, %v2676_v31  ;;  %v7672_v26 = vsel %vm3155_vm14, %v3187_v45, %v3123_v3  ;;  %v2695_v23 = vsub.f32 1.0, %v2694_v29  ;;  %4885 = vrcp.f32 %v8904_v49 }
 0x295   : > { %v7676_v30 = vmul.f32 1.442695, %v2536_v54  ;;  %v3251_v18 = vmul.f32 %v7672_v26, %v7672_v26  ;;  %v2777_v59 = vand.u32 2147483647, %v8902_v55  ;;  %v7682_v4 = vmul.f32 %v7429_v50, %v2501_v9 }
 0x296   : > { %v3119_v0 = vmul.f32 0.5, %v3087_v13  ;;  %v2696_v12 = vmul.f32 %v4878_v33, %v2695_v23  ;;  %vm2698_vm5 = vweird.f32 %v8899_v53  ;;  %vm2699_vm6 = vweird.f32 %v4878_v33  ;;  %v4880_v25 = vpop.eup %4879 }
 0x297   : > { %3291 = vadd.xlane.f32.xlu1 %v3251_v18  ;;  %vm7685_vm7 = vcmp.eq.f32.partialorder %v2702_v24, 8.507059e+37  ;;  %v2705_v61 = vor.u32 1.1754944e-38, %v2704_v17  ;;  %4887 = vrcp.f32 %v8907_v16  ;;  %v2769_v38 = vmul.f32 %v4880_v25, %v8902_v55  ;;  %vm2700_vm9 = vmor %vm2698_vm5, %vm2699_vm6 }
 0x298   : > { %v3183_v48 = vsub.f32 0.0, %v3119_v0  ;;  %v4882_v14 = vpop.eup %4881  ;;  %v2697_v34 = vadd.f32 %v4878_v33, %v2696_v12  ;;  %vm2773_vm8 = vweird.f32 %v8902_v55  ;;  %v2779_v41 = vand.u32 2147483648, %v8902_v55 }
 0x299   : > { %v7693_v54 = vpop.eup %4883  ;;  %vm3153_vm10 = vcmp.lt.f32.partialorder %v8908_v11, 0.0  ;;  %vm7702_vm11 = vcmp.eq.f32.partialorder %v2777_v59, 8.507059e+37  ;;  %vm2758_vm12 = vweird.f32 %v8904_v49  ;;  %v2762_v9 = vand.u32 2147483647, %v8904_v49 }
 0x29a   : > { %v7697_v3 = vsel %vm3151_vm4, %v3183_v48, %v3119_v0  ;;  %v4886_v46 = vpop.eup %4885  ;;  %v2701_v45 = vsel %vm2700_vm9, %v4878_v33, %v2697_v34  ;;  %v2770_v31 = vsub.f32 1.0, %v2769_v38  ;;  %v2764_v29 = vand.u32 2147483648, %v8904_v49 }
 0x29b   : > { %v3247_v10 = vmul.f32 %v7697_v3, %v7697_v3  ;;  %v7711_v13 = vmul.f32 0.6931472, %v4882_v14  ;;  %v2706_v24 = vsel %vm7685_vm7, %v2705_v61, %v2701_v45  ;;  %v2754_v17 = vmul.f32 %v4886_v46, %v8904_v49 }
 0x29c   : > { %v2747_v51 = vand.u32 2147483647, %v8907_v16  ;;  %v3089_v23 = vsub.f32 %v8899_v53, %v2706_v24  ;;  %v2771_v18 = vmul.f32 %v4880_v25, %v2770_v31  ;;  %vm2774_vm13 = vweird.f32 %v4880_v25  ;;  %v8913_v53 = vld [vmem:[#allocation6_spill] sm:$0xff] }
 0x29d   : > { %3283 = vadd.xlane.f32.xlu0 %v3247_v10  ;;  %v2780_v0 = vor.u32 1.1754944e-38, %v2779_v41  ;;  %v4888_v59 = vpop.eup %4887  ;;  %v2755_v33 = vsub.f32 1.0, %v2754_v17  ;;  %vm7718_vm14 = vcmp.eq.f32.partialorder %v2762_v9, 8.507059e+37  ;;  %vm2743_vm15 = vweird.f32 %v8907_v16  ;;  %vm2775_vm0 = vmor %vm2773_vm8, %vm2774_vm13 }
 0x29e   : > { %4889 = vrcp.f32 %v7290_v43  ;;  %v3121_v48 = vmul.f32 0.5, %v3089_v23  ;;  %v2772_v8 = vadd.f32 %v4880_v25, %v2771_v18  ;;  %v2765_v61 = vor.u32 1.1754944e-38, %v2764_v29 }
 0x29f   : > { %v2739_v14 = vmul.f32 %v4888_v59, %v8907_v16  ;;  %vm3158_vm1 = vcmp.lt.f32.partialorder %v8913_v53, 0.0  ;;  %v2756_v34 = vmul.f32 %v4886_v46, %v2755_v33  ;;  %vm2759_vm2 = vweird.f32 %v4886_v46 }
 0x2a0   : > { %vm7728_vm3 = vcmp.eq.f32.partialorder %v2747_v51, 8.507059e+37  ;;  %v2749_v41 = vand.u32 2147483648, %v8907_v16  ;;  %v3185_v9 = vsub.f32 0.0, %v3121_v48  ;;  %v2776_v10 = vsel %vm2775_vm0, %v4880_v25, %v2772_v8  ;;  %vm2760_vm4 = vmor %vm2758_vm12, %vm2759_vm2  ;;  %v8916_v25 = vld [vmem:[#allocation36_spill] sm:$0xff] }
 0x2a1   : > { %v2740_v45 = vsub.f32 1.0, %v2739_v14  ;;  %4891 = vrcp.f32 %v7109_v40  ;;  %v2781_v31 = vsel %vm7702_vm11, %v2780_v0, %v2776_v10  ;;  %v2757_v29 = vadd.f32 %v4886_v46, %v2756_v34 }
 0x2a2   : > { %v2822_v24 = vand.u32 2147483647, %v7290_v43  ;;  %v2824_v17 = vand.u32 2147483648, %v7290_v43  ;;  %v7740_v51 = vsel %vm3153_vm10, %v3185_v9, %v3121_v48  ;;  %v3094_v23 = vsub.f32 %v8902_v55, %v2781_v31  ;;  %v8917_v9 = vld [vmem:[#allocation29_spill] sm:$0xff] }
 0x2a3   : > { %vm3157_vm5 = vcmp.lt.f32.partialorder %v8916_v25, 0.0  ;;  %v2741_v18 = vmul.f32 %v4888_v59, %v2740_v45  ;;  %vm2744_vm6 = vweird.f32 %v4888_v59  ;;  %v3249_v0 = vmul.f32 %v7740_v51, %v7740_v51 }
 0x2a4   : > { %v4890_v42 = vpop.eup %4889  ;;  %v2761_v33 = vsel %vm2760_vm4, %v4886_v46, %v2757_v29  ;;  %vm2818_vm7 = vweird.f32 %v7290_v43  ;;  %4893 = vrcp.f32 %v6900_v28  ;;  %v3126_v11 = vmul.f32 0.5, %v3094_v23  ;;  %vm2745_vm8 = vmor %vm2743_vm15, %vm2744_vm6 }
 0x2a5   : > { %v2766_v55 = vsel %vm7718_vm14, %v2765_v61, %v2761_v33  ;;  %v2742_v48 = vadd.f32 %v4888_v59, %v2741_v18  ;;  %v2814_v8 = vmul.f32 %v4890_v42, %v7290_v43  ;;  %3287 = vadd.xlane.f32.xlu2 %v3249_v0  ;;  %v2750_v34 = vor.u32 1.1754944e-38, %v2749_v41 }
 0x2a6   : > { %v3093_v14 = vsub.f32 %v8904_v49, %v2766_v55  ;;  %vm3156_vm9 = vcmp.lt.f32.partialorder %v8917_v9, 0.0  ;;  %vm7757_vm10 = vcmp.eq.f32.partialorder %v2822_v24, 8.507059e+37  ;;  %v2825_v10 = vor.u32 1.1754944e-38, %v2824_v17 }
 0x2a7   : > { %v4892_v45 = vpop.eup %4891  ;;  %v3190_v12 = vsub.f32 0.0, %v3126_v11  ;;  %v2746_v61 = vsel %vm2745_vm8, %v4888_v59, %v2742_v48  ;;  %v2815_v31 = vsub.f32 1.0, %v2814_v8  ;;  %v2809_v29 = vand.u32 2147483648, %v7109_v40 }
 0x2a8   : > { %v3125_v23 = vmul.f32 0.5, %v3093_v14  ;;  %v2751_v49 = vsel %vm7728_vm3, %v2750_v34, %v2746_v61  ;;  %v2799_v18 = vmul.f32 %v4892_v45, %v7109_v40  ;;  %vm2803_vm11 = vweird.f32 %v7109_v40 }
 0x2a9   : > { %v7768_v41 = vsel %vm3158_vm1, %v3190_v12, %v3126_v11  ;;  %v3092_v24 = vsub.f32 %v8907_v16, %v2751_v49  ;;  %v2816_v17 = vmul.f32 %v4890_v42, %v2815_v31  ;;  %vm2819_vm12 = vweird.f32 %v4890_v42 }
 0x2aa   : > { %v4894_v59 = vpop.eup %4893  ;;  %v3254_v0 = vmul.f32 %v7768_v41, %v7768_v41  ;;  %v3189_v33 = vsub.f32 0.0, %v3125_v23  ;;  %v2800_v55 = vsub.f32 1.0, %v2799_v18  ;;  %v2807_v38 = vand.u32 2147483647, %v7109_v40  ;;  %vm2820_vm13 = vmor %vm2818_vm7, %vm2819_vm12 }
 0x2ab   : > { %v3124_v48 = vmul.f32 0.5, %v3092_v24  ;;  %v2817_v8 = vadd.f32 %v4890_v42, %v2816_v17  ;;  %v2810_v14 = vor.u32 1.1754944e-38, %v2809_v29  ;;  %v2784_v34 = vmul.f32 %v4894_v59, %v6900_v28 }
 0x2ac   : > { %3297 = vadd.xlane.f32.xlu1 %v3254_v0  ;;  %v7777_v53 = vsel %vm3157_vm5, %v3189_v33, %v3125_v23  ;;  %vm3161_vm14 = vcmp.lt.f32.partialorder %v6734_v36, 0.0  ;;  %v2801_v16 = vmul.f32 %v4892_v45, %v2800_v55  ;;  %vm2804_vm15 = vweird.f32 %v4892_v45  ;;  %v8921_v0 = vld [vmem:[#allocation41_spill] sm:$0xff] }
 0x2ad   : > { %v2792_v11 = vand.u32 2147483647, %v6900_v28  ;;  %v3253_v12 = vmul.f32 %v7777_v53, %v7777_v53  ;;  %v3188_v61 = vsub.f32 0.0, %v3124_v48  ;;  %v2821_v31 = vsel %vm2820_vm13, %v4890_v42, %v2817_v8  ;;  %vm2805_vm0 = vmor %vm2803_vm11, %vm2804_vm15  ;;  %v8920_v42 = vld [vmem:[#allocation19_spill] sm:$0xff] }
 0x2ae   : > { %v2785_v29 = vsub.f32 1.0, %v2784_v34  ;;  %v2826_v25 = vsel %vm7757_vm10, %v2825_v10, %v2821_v31  ;;  %v2802_v23 = vadd.f32 %v4892_v45, %v2801_v16  ;;  %v2794_v49 = vand.u32 2147483648, %v6900_v28  ;;  %v8922_v16 = vld [vmem:[#allocation4_spill] sm:$0xff] }
 0x2af   : > { %4895 = vrcp.f32 %v6773_v62  ;;  %3295 = vadd.xlane.f32.xlu0 %v3253_v12  ;;  %v7791_v18 = vsel %vm3156_vm9, %v3188_v61, %v3124_v48  ;;  %v3097_v24 = vsub.f32 %v7290_v43, %v2826_v25  ;;  %vm3160_vm1 = vcmp.lt.f32.partialorder %v8920_v42, 0.0 }
 0x2b0   : > { %v2786_v17 = vmul.f32 %v4894_v59, %v2785_v29  ;;  %vm2789_vm2 = vweird.f32 %v4894_v59  ;;  %v3252_v46 = vmul.f32 %v7791_v18, %v7791_v18  ;;  %v2806_v10 = vsel %vm2805_vm0, %v4892_v45, %v2802_v23 }
 0x2b1   : > { %vm2808_vm3 = vcmp.eq.f32.partialorder %v2807_v38, 8.507059e+37  ;;  %4897 = vrcp.f32 %v8921_v0  ;;  %v3129_v33 = vmul.f32 0.5, %v3097_v24  ;;  %vm2788_vm4 = vweird.f32 %v6900_v28 }
 0x2b2   : > { %v2811_v9 = vsel %vm2808_vm3, %v2810_v14, %v2806_v10  ;;  %v2787_v55 = vadd.f32 %v4894_v59, %v2786_v17  ;;  %v2599_v43 = vmul.f32 1.442695, %v7682_v4  ;;  %v2538_v48 = vmul.f32 %v7429_v50, %v7711_v13  ;;  %3293 = vadd.xlane.f32.xlu2 %v3252_v46  ;;  %vm2790_vm5 = vmor %vm2788_vm4, %vm2789_vm2 }
 0x2b3   : > { %v3096_v8 = vsub.f32 %v7109_v40, %v2811_v9  ;;  %v2795_v34 = vor.u32 1.1754944e-38, %v2794_v49  ;;  %vm3159_vm6 = vcmp.lt.f32.partialorder %v8922_v16, 0.0  ;;  %v3193_v45 = vsub.f32 0.0, %v3129_v33 }
 0x2b4   : > { %v2791_v38 = vsel %vm2790_vm5, %v4894_v59, %v2787_v55  ;;  %vm2793_vm7 = vcmp.eq.f32.partialorder %v2792_v11, 8.507059e+37  ;;  %4899 = vrcp.f32 %v7299_v35  ;;  %v2867_v4 = vand.u32 2147483647, %v6773_v62 }
 0x2b5   : > { %v4896_v14 = vpop.eup %4895  ;;  %v3128_v12 = vmul.f32 0.5, %v3096_v8  ;;  %v2796_v61 = vsel %vm2793_vm7, %v2795_v34, %v2791_v38  ;;  %v2869_v31 = vand.u32 2147483648, %v6773_v62  ;;  %4901 = vpow2.f32 %v7676_v30 }
 0x2b6   : > { %v7812_v40 = vsel %vm3161_vm14, %v3193_v45, %v3129_v33  ;;  %v3095_v50 = vsub.f32 %v6900_v28, %v2796_v61  ;;  %v2859_v13 = vmul.f32 %v4896_v14, %v6773_v62  ;;  %4903 = vpow2.f32 %v2599_v43  ;;  %v8925_v61 = vld [vmem:[#allocation17_spill] sm:$0xff] }
 0x2b7   : > { %v4898_v59 = vpop.eup %4897  ;;  %v7816_v11 = vmul.f32 1.442695, %v2538_v48  ;;  %v3257_v29 = vmul.f32 %v7812_v40, %v7812_v40  ;;  %v3192_v25 = vsub.f32 0.0, %v3128_v12  ;;  %vm2863_vm8 = vweird.f32 %v6773_v62 }
 0x2b8   : > { %v3127_v23 = vmul.f32 0.5, %v3095_v50  ;;  %v2860_v49 = vsub.f32 1.0, %v2859_v13  ;;  %v2844_v36 = vmul.f32 %v4898_v59, %v8921_v0  ;;  %vm2864_vm9 = vweird.f32 %v4896_v14 }
 0x2b9   : > { %3303 = vadd.xlane.f32.xlu1 %v3257_v29  ;;  %v7824_v28 = vsel %vm3160_vm1, %v3192_v25, %v3128_v12  ;;  %vm7826_vm10 = vcmp.eq.f32.partialorder %v2867_v4, 8.507059e+37  ;;  %v2870_v24 = vor.u32 1.1754944e-38, %v2869_v31  ;;  %v2852_v55 = vand.u32 2147483647, %v8921_v0  ;;  %vm2865_vm12 = vmor %vm2863_vm8, %vm2864_vm9 }
 0x2ba   : > { %v4900_v17 = vpop.eup %4899  ;;  %v3256_v46 = vmul.f32 %v7824_v28, %v7824_v28  ;;  %v3191_v10 = vsub.f32 0.0, %v3127_v23  ;;  %v2861_v33 = vmul.f32 %v4896_v14, %v2860_v49  ;;  %v2845_v9 = vsub.f32 1.0, %v2844_v36 }
 0x2bb   : > { %v2854_v43 = vand.u32 2147483648, %v8921_v0  ;;  %v2904_v42 = vmul.f32 %v4900_v17, %v7299_v35  ;;  %4905 = vrcp.f32 %v7116_v19  ;;  %v7836_v48 = vpop.eup %4901  ;;  %vm2849_vm11 = vweird.f32 %v4898_v59 }
 0x2bc   : > { %3301 = vadd.xlane.f32.xlu0 %v3256_v46  ;;  %v7840_v8 = vsel %vm3159_vm6, %v3191_v10, %v3127_v23  ;;  %v2862_v34 = vadd.f32 %v4896_v14, %v2861_v33  ;;  %v2846_v45 = vmul.f32 %v4898_v59, %v2845_v9  ;;  %v7842_v38 = vpop.eup %4903  ;;  %vm3164_vm13 = vcmp.lt.f32.partialorder %v8925_v61, 0.0  ;;  %v8926_v23 = vld [vmem:[#allocation37_spill] sm:$0xff] }
 0x2bd   : > { %v3255_v12 = vmul.f32 %v7840_v8, %v7840_v8  ;;  %vm2848_vm14 = vweird.f32 %v8921_v0  ;;  %v2905_v4 = vsub.f32 1.0, %v2904_v42  ;;  %v2912_v16 = vand.u32 2147483647, %v7299_v35 }
 0x2be   : > { %v2866_v31 = vsel %vm2865_vm12, %v4896_v14, %v2862_v34  ;;  %v2847_v50 = vadd.f32 %v4898_v59, %v2846_v45  ;;  %v2914_v13 = vand.u32 2147483648, %v7299_v35  ;;  %4907 = vrcp.f32 %v7097_v56  ;;  %vm2850_vm15 = vmor %vm2848_vm14, %vm2849_vm11 }
 0x2bf   : > { %3299 = vadd.xlane.f32.xlu2 %v3255_v12  ;;  %v2871_v29 = vsel %vm7826_vm10, %v2870_v24, %v2866_v31  ;;  %v2855_v25 = vor.u32 1.1754944e-38, %v2854_v43  ;;  %vm3163_vm0 = vcmp.lt.f32.partialorder %v8926_v23, 0.0  ;;  %v2906_v49 = vmul.f32 %v4900_v17, %v2905_v4 }
 0x2c0   : > { %vm2909_vm1 = vweird.f32 %v4900_v17  ;;  %v3100_v36 = vsub.f32 %v6773_v62, %v2871_v29  ;;  %v2851_v46 = vsel %vm2850_vm15, %v4898_v59, %v2847_v50  ;;  %vm2853_vm2 = vcmp.eq.f32.partialorder %v2852_v55, 8.507059e+37 }
 0x2c1   : > { %vm2908_vm3 = vweird.f32 %v7299_v35  ;;  %v4906_v14 = vpop.eup %4905  ;;  %v2856_v10 = vsel %vm2853_vm2, %v2855_v25, %v2851_v46  ;;  %v2907_v33 = vadd.f32 %v4900_v17, %v2906_v49  ;;  %vm2913_vm4 = vcmp.eq.f32.partialorder %v2912_v16, 8.507059e+37 }
 0x2c2   : > { %v2897_v9 = vand.u32 2147483647, %v7116_v19  ;;  %v3132_v30 = vmul.f32 0.5, %v3100_v36  ;;  %v3099_v24 = vsub.f32 %v8921_v0, %v2856_v10  ;;  %vm2910_vm5 = vmor %vm2908_vm3, %vm2909_vm1  ;;  %v2915_v43 = vor.u32 1.1754944e-38, %v2914_v13 }
 0x2c3   : > { %v2889_v42 = vmul.f32 %v4906_v14, %v7116_v19  ;;  %v2911_v34 = vsel %vm2910_vm5, %v4900_v17, %v2907_v33  ;;  %vm3167_vm6 = vcmp.lt.f32.partialorder %v6784_v39, 0.0  ;;  %v2899_v62 = vand.u32 2147483648, %v7116_v19 }
 0x2c4   : > { %4909 = vrcp.f32 %v7454_v7  ;;  %v4908_v59 = vpop.eup %4907  ;;  %v3196_v55 = vsub.f32 0.0, %v3132_v30  ;;  %v3131_v45 = vmul.f32 0.5, %v3099_v24  ;;  %v2916_v12 = vsel %vm2913_vm4, %v2915_v43, %v2911_v34 }
 0x2c5   : > { %v2890_v4 = vsub.f32 1.0, %v2889_v42  ;;  %v3103_v16 = vsub.f32 %v7299_v35, %v2916_v12  ;;  %vm2893_vm7 = vweird.f32 %v7116_v19  ;;  %vm7867_vm8 = vcmp.eq.f32.partialorder %v2897_v9, 8.507059e+37 }
 0x2c6   : > { %v2874_v17 = vmul.f32 %v4908_v59, %v7097_v56  ;;  %v7874_v31 = vsel %vm3164_vm13, %v3196_v55, %v3132_v30  ;;  %v3195_v50 = vsub.f32 0.0, %v3131_v45  ;;  %vm2894_vm9 = vweird.f32 %v4906_v14 }
 0x2c7   : > { %v2891_v13 = vmul.f32 %v4906_v14, %v2890_v4  ;;  %v3260_v29 = vmul.f32 %v7874_v31, %v7874_v31  ;;  %v3135_v25 = vmul.f32 0.5, %v3103_v16  ;;  %v2882_v49 = vand.u32 2147483647, %v7097_v56  ;;  %vm2895_vm10 = vmor %vm2893_vm7, %vm2894_vm9 }
 0x2c8   : > { %v2875_v35 = vsub.f32 1.0, %v2874_v17  ;;  %v7881_v36 = vsel %vm3163_vm0, %v3195_v50, %v3131_v45  ;;  %v2900_v10 = vor.u32 1.1754944e-38, %v2899_v62  ;;  %v2884_v61 = vand.u32 2147483648, %v7097_v56 }
 0x2c9   : > { %v2892_v46 = vadd.f32 %v4906_v14, %v2891_v13  ;;  %3309 = vadd.xlane.f32.xlu1 %v3260_v29  ;;  %v3259_v9 = vmul.f32 %v7881_v36, %v7881_v36  ;;  %v3199_v30 = vsub.f32 0.0, %v3135_v25  ;;  %vm2879_vm11 = vweird.f32 %v4908_v59  ;;  %v8929_v29 = vld [vmem:[#allocation16_spill] sm:$0xff] }
 0x2ca   : > { %v4910_v33 = vpop.eup %4909  ;;  %v2876_v24 = vmul.f32 %v4908_v59, %v2875_v35  ;;  %vm2878_vm12 = vweird.f32 %v7097_v56  ;;  %4911 = vrcp.f32 %v7476_v15  ;;  %vm2883_vm13 = vcmp.eq.f32.partialorder %v2882_v49, 8.507059e+37 }
 0x2cb   : > { %v2896_v43 = vsel %vm2895_vm10, %v4906_v14, %v2892_v46  ;;  %v2919_v23 = vmul.f32 %v4910_v33, %v7454_v7  ;;  %3307 = vadd.xlane.f32.xlu0 %v3259_v9  ;;  %v7893_v42 = vsel %vm3167_vm6, %v3199_v30, %v3135_v25  ;;  %vm2880_vm14 = vmor %vm2878_vm12, %vm2879_vm11  ;;  %v2885_v14 = vor.u32 1.1754944e-38, %v2884_v61 }
 0x2cc   : > { %v2901_v34 = vsel %vm7867_vm8, %v2900_v10, %v2896_v43  ;;  %v2877_v62 = vadd.f32 %v4908_v59, %v2876_v24  ;;  %v2927_v12 = vand.u32 2147483647, %v7454_v7  ;;  %v3263_v4 = vmul.f32 %v7893_v42, %v7893_v42 }
 0x2cd   : > { %v3102_v55 = vsub.f32 %v7116_v19, %v2901_v34  ;;  %v2920_v45 = vsub.f32 1.0, %v2919_v23  ;;  %v2929_v39 = vand.u32 2147483648, %v7454_v7  ;;  %4913 = vrcp.f32 %v7400_v58  ;;  %v8930_v23 = vld [vmem:[#allocation21_spill] sm:$0xff] }
 0x2ce   : > { %v2881_v16 = vsel %vm2880_vm14, %v4908_v59, %v2877_v62  ;;  %vm2924_vm15 = vweird.f32 %v4910_v33  ;;  %4915 = vpow2.f32 %v7816_v11  ;;  %vm3166_vm0 = vcmp.lt.f32.partialorder %v8929_v29, 0.0 }
 0x2cf   : > { %v3134_v17 = vmul.f32 0.5, %v3102_v55  ;;  %v2886_v0 = vsel %vm2883_vm13, %v2885_v14, %v2881_v16  ;;  %v2921_v50 = vmul.f32 %v4910_v33, %v2920_v45  ;;  %vm2923_vm1 = vweird.f32 %v7454_v7 }
 0x2d0   : > { %v3101_v19 = vsub.f32 %v7097_v56, %v2886_v0  ;;  %v4912_v13 = vpop.eup %4911  ;;  %vm2925_vm2 = vmor %vm2923_vm1, %vm2924_vm15  ;;  %vm2928_vm3 = vcmp.eq.f32.partialorder %v2927_v12, 8.507059e+37  ;;  %v2930_v49 = vor.u32 1.1754944e-38, %v2929_v39  ;;  %v3004_v11 = vand.u32 2147483648, %v7476_v15 }
 0x2d1   : > { %v3198_v25 = vsub.f32 0.0, %v3134_v17  ;;  %v2922_v35 = vadd.f32 %v4910_v33, %v2921_v50  ;;  %3315 = vadd.xlane.f32.xlu1 %v3263_v4  ;;  %v2994_v46 = vmul.f32 %v4912_v13, %v7476_v15  ;;  %4917 = vrcp.f32 %v7125_v27 }
 0x2d2   : > { %v3133_v59 = vmul.f32 0.5, %v3101_v19  ;;  %vm3165_vm4 = vcmp.lt.f32.partialorder %v8930_v23, 0.0  ;;  %vm3168_vm5 = vcmp.lt.f32.partialorder %v7024_v2, 0.0  ;;  %vm2999_vm6 = vweird.f32 %v4912_v13 }
 0x2d3   : > { %v7908_v10 = vsel %vm3166_vm0, %v3198_v25, %v3134_v17  ;;  %v2926_v61 = vsel %vm2925_vm2, %v4910_v33, %v2922_v35  ;;  %v4914_v56 = vpop.eup %4913  ;;  %v2995_v43 = vsub.f32 1.0, %v2994_v46  ;;  %v3002_v45 = vand.u32 2147483647, %v7476_v15 }
 0x2d4   : > { %v3262_v9 = vmul.f32 %v7908_v10, %v7908_v10  ;;  %v3197_v30 = vsub.f32 0.0, %v3133_v59  ;;  %v2931_v24 = vsel %vm2928_vm3, %v2930_v49, %v2926_v61  ;;  %v2979_v62 = vmul.f32 %v4914_v56, %v7400_v58  ;;  %v7918_v33 = vpop.eup %4915 }
 0x2d5   : > { %v3104_v34 = vsub.f32 %v7454_v7, %v2931_v24  ;;  %v2996_v14 = vmul.f32 %v4912_v13, %v2995_v43  ;;  %v2989_v7 = vand.u32 2147483648, %v7400_v58  ;;  %vm2998_vm7 = vweird.f32 %v7476_v15 }
 0x2d6   : > { %3313 = vadd.xlane.f32.xlu0 %v3262_v9  ;;  %v7920_v55 = vsel %vm3165_vm4, %v3197_v30, %v3133_v59  ;;  %v2980_v16 = vsub.f32 1.0, %v2979_v62  ;;  %v3005_v17 = vor.u32 1.1754944e-38, %v3004_v11  ;;  %4919 = vrcp.f32 %v7494_v20  ;;  %vm3000_vm8 = vmor %vm2998_vm7, %vm2999_vm6 }
 0x2d7   : > { %v3261_v12 = vmul.f32 %v7920_v55, %v7920_v55  ;;  %v3136_v4 = vmul.f32 0.5, %v3104_v34  ;;  %v2997_v39 = vadd.f32 %v4912_v13, %v2996_v14  ;;  %v4918_v0 = vpop.eup %4917  ;;  %vm3173_vm9 = vcmp.lt.f32.partialorder %v7100_v5, 0.0 }
 0x2d8   : > { %v2981_v19 = vmul.f32 %v4914_v56, %v2980_v16  ;;  %vm2984_vm10 = vweird.f32 %v4914_v56  ;;  %v2987_v29 = vand.u32 2147483647, %v7400_v58  ;;  %vm3003_vm11 = vcmp.eq.f32.partialorder %v3002_v45, 8.507059e+37 }
 0x2d9   : > { %3311 = vadd.xlane.f32.xlu2 %v3261_v12  ;;  %v3200_v50 = vsub.f32 0.0, %v3136_v4  ;;  %v3001_v25 = vsel %vm3000_vm8, %v4912_v13, %v2997_v39  ;;  %vm2983_vm12 = vweird.f32 %v7400_v58  ;;  %v2964_v35 = vmul.f32 %v4918_v0, %v7125_v27 }
 0x2da   : > { %v3006_v49 = vsel %vm3003_vm11, %v3005_v17, %v3001_v25  ;;  %v2982_v46 = vadd.f32 %v4914_v56, %v2981_v19  ;;  %v2990_v61 = vor.u32 1.1754944e-38, %v2989_v7  ;;  %vm2985_vm13 = vmor %vm2983_vm12, %vm2984_vm10  ;;  %v2972_v30 = vand.u32 2147483647, %v7125_v27 }
 0x2db   : > { %v7934_v59 = vsel %vm3168_vm5, %v3200_v50, %v3136_v4  ;;  %v3109_v11 = vsub.f32 %v7476_v15, %v3006_v49  ;;  %v2965_v9 = vsub.f32 1.0, %v2964_v35  ;;  %v2974_v13 = vand.u32 2147483648, %v7125_v27 }
 0x2dc   : > { %v3264_v24 = vmul.f32 %v7934_v59, %v7934_v59  ;;  %v2986_v43 = vsel %vm2985_vm13, %v4914_v56, %v2982_v46  ;;  %vm2988_vm14 = vcmp.eq.f32.partialorder %v2987_v29, 8.507059e+37  ;;  %4921 = vrcp.f32 %v7693_v54  ;;  %v4920_v2 = vpop.eup %4919  ;;  %v8931_v46 = vld [vmem:[#allocation11_spill] sm:$0xff] }
 0x2dd   : > { %v3141_v23 = vmul.f32 0.5, %v3109_v11  ;;  %v2991_v34 = vsel %vm2988_vm14, %v2990_v61, %v2986_v43  ;;  %v2966_v62 = vmul.f32 %v4918_v0, %v2965_v9  ;;  %vm2969_vm15 = vweird.f32 %v4918_v0 }
 0x2de   : > { %v3108_v15 = vsub.f32 %v7400_v58, %v2991_v34  ;;  %vm3172_vm0 = vcmp.lt.f32.partialorder %v6897_v52, 0.0  ;;  %vm2968_vm1 = vweird.f32 %v7125_v27  ;;  %v2949_v14 = vmul.f32 %v4920_v2, %v7494_v20 }
 0x2df   : > { %v3205_v45 = vsub.f32 0.0, %v3141_v23  ;;  %v2967_v12 = vadd.f32 %v4918_v0, %v2966_v62  ;;  %vm2973_vm2 = vcmp.eq.f32.partialorder %v2972_v30, 8.507059e+37  ;;  %v2975_v56 = vor.u32 1.1754944e-38, %v2974_v13  ;;  %vm2970_vm3 = vmor %vm2968_vm1, %vm2969_vm15 }
 0x2e0   : > { %v3140_v4 = vmul.f32 0.5, %v3108_v15  ;;  %v2950_v16 = vsub.f32 1.0, %v2949_v14  ;;  %v2959_v7 = vand.u32 2147483648, %v7494_v20  ;;  %4923 = vrcp.f32 %v7488_v37 }
 0x2e1   : > { %3317 = vadd.xlane.f32.xlu2 %v3264_v24  ;;  %v7950_v58 = vsel %vm3173_vm9, %v3205_v45, %v3141_v23  ;;  %v2971_v39 = vsel %vm2970_vm3, %v4918_v0, %v2967_v12  ;;  %vm2954_vm4 = vweird.f32 %v4920_v2  ;;  %v2957_v17 = vand.u32 2147483647, %v7494_v20 }
 0x2e2   : > { %v4922_v50 = vpop.eup %4921  ;;  %v3269_v19 = vmul.f32 %v7950_v58, %v7950_v58  ;;  %v3204_v29 = vsub.f32 0.0, %v3140_v4  ;;  %v2976_v25 = vsel %vm2973_vm2, %v2975_v56, %v2971_v39  ;;  %v2951_v35 = vmul.f32 %v4920_v2, %v2950_v16 }
 0x2e3   : > { %v3107_v49 = vsub.f32 %v7125_v27, %v2976_v25  ;;  %vm3171_vm5 = vcmp.lt.f32.partialorder %v8931_v46, 0.0  ;;  %vm2953_vm6 = vweird.f32 %v7494_v20  ;;  %v3024_v5 = vmul.f32 %v4922_v50, %v7693_v54 }
 0x2e4   : > { %3327 = vadd.xlane.f32.xlu1 %v3269_v19  ;;  %v7961_v0 = vsel %vm3172_vm0, %v3204_v29, %v3140_v4  ;;  %v2952_v61 = vadd.f32 %v4920_v2, %v2951_v35  ;;  %v2960_v11 = vor.u32 1.1754944e-38, %v2959_v7  ;;  %v3032_v9 = vand.u32 2147483647, %v7693_v54  ;;  %vm2955_vm7 = vmor %vm2953_vm6, %vm2954_vm4 }
 0x2e5   : > { %v3268_v30 = vmul.f32 %v7961_v0, %v7961_v0  ;;  %v3139_v13 = vmul.f32 0.5, %v3107_v49  ;;  %v3025_v27 = vsub.f32 1.0, %v3024_v5  ;;  %4925 = vrcp.f32 %v7836_v48 }
 0x2e6   : > { %v4924_v24 = vpop.eup %4923  ;;  %v2956_v43 = vsel %vm2955_vm7, %v4920_v2, %v2952_v61  ;;  %vm2958_vm8 = vcmp.eq.f32.partialorder %v2957_v17, 8.507059e+37  ;;  %vm3029_vm9 = vweird.f32 %v4922_v50  ;;  %v3034_v52 = vand.u32 2147483648, %v7693_v54 }
 0x2e7   : > { %3325 = vadd.xlane.f32.xlu0 %v3268_v30  ;;  %v3203_v23 = vsub.f32 0.0, %v3139_v13  ;;  %v2961_v34 = vsel %vm2958_vm8, %v2960_v11, %v2956_v43  ;;  %v3026_v62 = vmul.f32 %v4922_v50, %v3025_v27  ;;  %v3009_v15 = vmul.f32 %v4924_v24, %v7488_v37 }
 0x2e8   : > { %v3106_v14 = vsub.f32 %v7494_v20, %v2961_v34  ;;  %vm3170_vm10 = vcmp.lt.f32.partialorder %v7264_v32, 0.0  ;;  %vm3028_vm11 = vweird.f32 %v7693_v54  ;;  %vm7973_vm12 = vcmp.eq.f32.partialorder %v3032_v9, 8.507059e+37 }
 0x2e9   : > { %v7979_v2 = vsel %vm3171_vm5, %v3203_v23, %v3139_v13  ;;  %v3027_v12 = vadd.f32 %v4922_v50, %v3026_v62  ;;  %v3010_v56 = vsub.f32 1.0, %v3009_v15  ;;  %v3019_v4 = vand.u32 2147483648, %v7488_v37  ;;  %vm3030_vm13 = vmor %vm3028_vm11, %vm3029_vm9 }
 0x2ea   : > { %v3267_v16 = vmul.f32 %v7979_v2, %v7979_v2  ;;  %v3138_v20 = vmul.f32 0.5, %v3106_v14  ;;  %v3035_v7 = vor.u32 1.1754944e-38, %v3034_v52  ;;  %vm3175_vm14 = vcmp.lt.f32.partialorder %v7323_v21, 0.0 }
 0x2eb   : > { %4927 = vrcp.f32 %v7485_v6  ;;  %v4926_v39 = vpop.eup %4925  ;;  %v3031_v17 = vsel %vm3030_vm13, %v4922_v50, %v3027_v12  ;;  %v3011_v19 = vmul.f32 %v4924_v24, %v3010_v56  ;;  %vm3014_vm15 = vweird.f32 %v4924_v24 }
 0x2ec   : > { %v3017_v29 = vand.u32 2147483647, %v7488_v37  ;;  %3323 = vadd.xlane.f32.xlu2 %v3267_v16  ;;  %v3202_v25 = vsub.f32 0.0, %v3138_v20  ;;  %v3036_v35 = vsel %vm7973_vm12, %v3035_v7, %v3031_v17  ;;  %vm3013_vm0 = vweird.f32 %v7488_v37 }
 0x2ed   : > { %v3039_v49 = vmul.f32 %v4926_v39, %v7836_v48  ;;  %v3111_v46 = vsub.f32 %v7693_v54, %v3036_v35  ;;  %v3012_v5 = vadd.f32 %v4924_v24, %v3011_v19  ;;  %v3020_v61 = vor.u32 1.1754944e-38, %v3019_v4  ;;  %vm3015_vm1 = vmor %vm3013_vm0, %vm3014_vm15  ;;  %v8934_v4 = vld [vmem:[#allocation28_spill] sm:$0xff]  ;;  %v8935_v35 = vld [vmem:[#allocation23_spill] sm:$0xff] }
 0x2ee   : > { %v3047_v11 = vand.u32 2147483647, %v7836_v48  ;;  %v7996_v50 = vsel %vm3170_vm10, %v3202_v25, %v3138_v20  ;;  %v3049_v30 = vand.u32 2147483648, %v7836_v48  ;;  %4929 = vrcp.f32 %v7404_v60 }
 0x2ef   : > { %v3040_v9 = vsub.f32 1.0, %v3039_v49  ;;  %v3266_v13 = vmul.f32 %v7996_v50, %v7996_v50  ;;  %v3143_v27 = vmul.f32 0.5, %v3111_v46  ;;  %v3016_v43 = vsel %vm3015_vm1, %v4924_v24, %v3012_v5 }
 0x2f0   : > { %vm3018_vm2 = vcmp.eq.f32.partialorder %v3017_v29, 8.507059e+37  ;;  %vm3174_vm3 = vcmp.lt.f32.partialorder %v7243_v57, 0.0  ;;  %vm3044_vm4 = vweird.f32 %v4926_v39  ;;  %vm3043_vm5 = vweird.f32 %v7836_v48 }
 0x2f1   : > { %v4928_v54 = vpop.eup %4927  ;;  %v3021_v52 = vsel %vm3018_vm2, %v3020_v61, %v3016_v43  ;;  %v3041_v23 = vmul.f32 %v4926_v39, %v3040_v9  ;;  %3321 = vadd.xlane.f32.xlu1 %v3266_v13  ;;  %v3207_v32 = vsub.f32 0.0, %v3143_v27  ;;  %vm3048_vm6 = vcmp.eq.f32.partialorder %v3047_v11, 8.507059e+37  ;;  %vm3045_vm7 = vmor %vm3043_vm5, %vm3044_vm4 }
 0x2f2   : > { %v3110_v34 = vsub.f32 %v7488_v37, %v3021_v52  ;;  %v2934_v62 = vmul.f32 %v4928_v54, %v7485_v6  ;;  %v3050_v14 = vor.u32 1.1754944e-38, %v3049_v30  ;;  %v2942_v24 = vand.u32 2147483647, %v7485_v6 }
 0x2f3   : > { %v3042_v15 = vadd.f32 %v4926_v39, %v3041_v23  ;;  %v8009_v45 = vsel %vm3175_vm14, %v3207_v32, %v3143_v27  ;;  %4931 = vrcp.f32 %v8934_v4  ;;  %vm2939_vm8 = vweird.f32 %v4928_v54 }
 0x2f4   : > { %v3142_v12 = vmul.f32 0.5, %v3110_v34  ;;  %v2935_v56 = vsub.f32 1.0, %v2934_v62  ;;  %v4930_v16 = vpop.eup %4929  ;;  %v3271_v37 = vmul.f32 %v8009_v45, %v8009_v45  ;;  %v2944_v7 = vand.u32 2147483648, %v7485_v6 }
 0x2f5   : > { %v3046_v20 = vsel %vm3045_vm7, %v4926_v39, %v3042_v15  ;;  %v2829_v21 = vmul.f32 %v4930_v16, %v7404_v60  ;;  %vm3176_vm9 = vcmp.lt.f32.partialorder %v8935_v35, 0.0  ;;  %vm2938_vm10 = vweird.f32 %v7485_v6 }
 0x2f6   : > { %v3206_v17 = vsub.f32 0.0, %v3142_v12  ;;  %v3051_v19 = vsel %vm3048_vm6, %v3050_v14, %v3046_v20  ;;  %v2936_v29 = vmul.f32 %v4928_v54, %v2935_v56  ;;  %3331 = vadd.xlane.f32.xlu0 %v3271_v37  ;;  %v2837_v49 = vand.u32 2147483647, %v7404_v60  ;;  %vm2940_vm11 = vmor %vm2938_vm10, %vm2939_vm8 }
 0x2f7   : > { %v3112_v25 = vsub.f32 %v7836_v48, %v3051_v19  ;;  %v2830_v5 = vsub.f32 1.0, %v2829_v21  ;;  %v2839_v61 = vand.u32 2147483648, %v7404_v60  ;;  %vm2943_vm12 = vcmp.eq.f32.partialorder %v2942_v24, 8.507059e+37  ;;  %v3280_v21 = vpop.xlane.xlu1 %3279 }
 0x2f8   : > { %v8022_v39 = vsel %vm3174_vm3, %v3206_v17, %v3142_v12  ;;  %v2937_v46 = vadd.f32 %v4928_v54, %v2936_v29  ;;  %v2945_v48 = vor.u32 1.1754944e-38, %v2944_v7  ;;  %vm2834_vm13 = vweird.f32 %v4930_v16  ;;  %v8936_v7 = vld [vmem:[#allocation34_spill] sm:$0xff]  ;;  %v8937_v29 = vld [vmem:[#allocation31_spill] sm:$0xff] }
 0x2f9   : > { %v3270_v11 = vmul.f32 %v8022_v39, %v8022_v39  ;;  %v3144_v9 = vmul.f32 0.5, %v3112_v25  ;;  %v4932_v30 = vpop.eup %4931  ;;  %v2831_v27 = vmul.f32 %v4930_v16, %v2830_v5  ;;  %4933 = vrcp.f32 %v7842_v38 }
 0x2fa   : > { %v2941_v13 = vsel %vm2940_vm11, %v4928_v54, %v2937_v46  ;;  %vm2833_vm14 = vweird.f32 %v7404_v60  ;;  %v2709_v52 = vmul.f32 %v4932_v30, %v8934_v4  ;;  %vm2838_vm15 = vcmp.eq.f32.partialorder %v2837_v49, 8.507059e+37 }
 0x2fb   : > { %3329 = vadd.xlane.f32.xlu2 %v3270_v11  ;;  %v3208_v57 = vsub.f32 0.0, %v3144_v9  ;;  %v2946_v43 = vsel %vm2943_vm12, %v2945_v48, %v2941_v13  ;;  %v2832_v32 = vadd.f32 %v4930_v16, %v2831_v27  ;;  %v2840_v34 = vor.u32 1.1754944e-38, %v2839_v61  ;;  %vm2835_vm0 = vmor %vm2833_vm14, %vm2834_vm13 }
 0x2fc   : > { %v3105_v23 = vsub.f32 %v7485_v6, %v2946_v43  ;;  %v2710_v54 = vsub.f32 1.0, %v2709_v52  ;;  %v2717_v15 = vand.u32 2147483647, %v8934_v4  ;;  %4935 = vrcp.f32 %v7918_v33 }
 0x2fd   : > { %v8034_v62 = vsel %vm3176_vm9, %v3208_v57, %v3144_v9  ;;  %v2836_v12 = vsel %vm2835_vm0, %v4930_v16, %v2832_v32  ;;  %v2719_v6 = vand.u32 2147483648, %v8934_v4  ;;  %vm2714_vm1 = vweird.f32 %v4932_v30 }
 0x2fe   : > { %v3272_v14 = vmul.f32 %v8034_v62, %v8034_v62  ;;  %v3137_v24 = vmul.f32 0.5, %v3105_v23  ;;  %v2841_v56 = vsel %vm2838_vm15, %v2840_v34, %v2836_v12  ;;  %v2711_v37 = vmul.f32 %v4932_v30, %v2710_v54 }
 0x2ff   : > { %v4934_v20 = vpop.eup %4933  ;;  %vm3169_vm2 = vcmp.lt.f32.partialorder %v8936_v7, 0.0  ;;  %v3098_v19 = vsub.f32 %v7404_v60, %v2841_v56  ;;  %vm3162_vm3 = vcmp.lt.f32.partialorder %v8937_v29, 0.0  ;;  %vm2713_vm4 = vweird.f32 %v8934_v4 }
 0x300   : > { %3333 = vadd.xlane.f32.xlu1 %v3272_v14  ;;  %v3201_v17 = vsub.f32 0.0, %v3137_v24  ;;  %v2712_v25 = vadd.f32 %v4932_v30, %v2711_v37  ;;  %vm2718_vm5 = vcmp.eq.f32.partialorder %v2717_v15, 8.507059e+37  ;;  %v3054_v16 = vmul.f32 %v4934_v20, %v7842_v38  ;;  %vm2715_vm6 = vmor %vm2713_vm4, %vm2714_vm1  ;;  %v8938_v37 = vld [vmem:[#allocation7_spill] sm:$0xff] }
 0x301   : > { %v3130_v49 = vmul.f32 0.5, %v3098_v19  ;;  %v2720_v46 = vor.u32 1.1754944e-38, %v2719_v6  ;;  %v3062_v5 = vand.u32 2147483647, %v7842_v38  ;;  %v8051_v48 = vadd.f32 1.0, %v3280_v21 }
 0x302   : > { %v8046_v35 = vsel %vm3169_vm2, %v3201_v17, %v3137_v24  ;;  %v4936_v61 = vpop.eup %4935  ;;  %v2716_v11 = vsel %vm2715_vm6, %v4932_v30, %v2712_v25  ;;  %v3055_v9 = vsub.f32 1.0, %v3054_v16  ;;  %v3064_v57 = vand.u32 2147483648, %v7842_v38 }
 0x303   : > { %v3265_v60 = vmul.f32 %v8046_v35, %v8046_v35  ;;  %v3194_v13 = vsub.f32 0.0, %v3130_v49  ;;  %v2721_v27 = vsel %vm2718_vm5, %v2720_v46, %v2716_v11  ;;  %v3069_v43 = vmul.f32 %v4936_v61, %v7918_v33 }
 0x304   : > { %v3090_v52 = vsub.f32 %v8934_v4, %v2721_v27  ;;  %v3056_v23 = vmul.f32 %v4934_v20, %v3055_v9  ;;  %vm3059_vm7 = vweird.f32 %v4934_v20  ;;  %4937 = vrsqrt.f32 %v8051_v48  ;;  %v8939_v27 = vld [vmem:[#allocation30_spill] sm:$0xff] }
 0x305   : > { %3319 = vadd.xlane.f32.xlu0 %v3265_v60  ;;  %v8059_v32 = vsel %vm3162_vm3, %v3194_v13, %v3130_v49  ;;  %vm3058_vm8 = vweird.f32 %v7842_v38  ;;  %v3070_v30 = vsub.f32 1.0, %v3069_v43  ;;  %v3079_v14 = vand.u32 2147483648, %v7918_v33  ;;  %v3276_v13 = vpop.xlane.xlu2 %3275 }
 0x306   : > { %v3258_v34 = vmul.f32 %v8059_v32, %v8059_v32  ;;  %v3122_v54 = vmul.f32 0.5, %v3090_v52  ;;  %v3057_v15 = vadd.f32 %v4934_v20, %v3056_v23  ;;  %vm3060_vm9 = vmor %vm3058_vm8, %vm3059_vm7  ;;  %v3065_v4 = vor.u32 1.1754944e-38, %v3064_v57 }
 0x307   : > { %v3071_v24 = vmul.f32 %v4936_v61, %v3070_v30  ;;  %vm3074_vm10 = vweird.f32 %v4936_v61  ;;  %v3077_v12 = vand.u32 2147483647, %v7918_v33  ;;  %vm3063_vm11 = vcmp.eq.f32.partialorder %v3062_v5, 8.507059e+37 }
 0x308   : > { %3305 = vadd.xlane.f32.xlu2 %v3258_v34  ;;  %v3186_v6 = vsub.f32 0.0, %v3122_v54  ;;  %v3061_v56 = vsel %vm3060_vm9, %v4934_v20, %v3057_v15  ;;  %vm3154_vm12 = vcmp.lt.f32.partialorder %v8938_v37, 0.0  ;;  %vm3073_vm13 = vweird.f32 %v7918_v33  ;;  %v8940_v34 = vld [vmem:[#allocation26_spill] sm:$0xff] }
 0x309   : > { %v3066_v7 = vsel %vm3063_vm11, %v3065_v4, %v3061_v56  ;;  %v3072_v17 = vadd.f32 %v4936_v61, %v3071_v24  ;;  %vm3075_vm14 = vmor %vm3073_vm13, %vm3074_vm10  ;;  %v3080_v25 = vor.u32 1.1754944e-38, %v3079_v14  ;;  %vm3078_vm15 = vcmp.eq.f32.partialorder %v3077_v12, 8.507059e+37 }
 0x30a   : > { %v4938_v19 = vpop.eup %4937  ;;  %v8068_v29 = vsel %vm3154_vm12, %v3186_v6, %v3122_v54  ;;  %v3113_v21 = vsub.f32 %v7842_v38, %v3066_v7  ;;  %vm3177_vm0 = vcmp.lt.f32.partialorder %v8939_v27, 0.0  ;;  %v3339_v43 = vadd.f32 1.0, %v3276_v13 }
 0x30b   : > { %v3250_v16 = vmul.f32 %v8068_v29, %v8068_v29  ;;  %v3076_v49 = vsel %vm3075_vm14, %v4936_v61, %v3072_v17  ;;  %v3396_v20 = vmul.f32 %v4938_v19, %v8051_v48  ;;  %vm3178_vm1 = vcmp.lt.f32.partialorder %v8940_v34, 0.0  ;;  %v3286_v17 = vpop.xlane.xlu1 %3285 }
 0x30c   : > { %v3145_v46 = vmul.f32 0.5, %v3113_v21  ;;  %v3081_v5 = vsel %vm3078_vm15, %v3080_v25, %v3076_v49  ;;  %4939 = vrsqrt.f32 %v3339_v43  ;;  %vm3402_vm2 = vcmp.eq.f32.partialorder %v8051_v48, inf }
 0x30d   : > { %3289 = vadd.xlane.f32.xlu0 %v3250_v16  ;;  %v3114_v60 = vsub.f32 %v7918_v33, %v3081_v5  ;;  %v3397_v11 = vmul.f32 %v4938_v19, %v3396_v20  ;;  %v3405_v4 = vand.u32 2147483648, %v8051_v48  ;;  %vm3404_vm3 = vcmp.eq.f32.partialorder %v8051_v48, 0.0  ;;  %v3282_v34 = vpop.xlane.xlu2 %3281 }
 0x30e   : > { %v3209_v9 = vsub.f32 0.0, %v3145_v46  ;;  %v3344_v21 = vadd.f32 1.0, %v3286_v17  ;;  %vm3378_vm4 = vcmp.eq.f32.partialorder %v3339_v43, inf  ;;  %v3381_v5 = vand.u32 2147483648, %v3339_v43 }
 0x30f   : > { %v3146_v38 = vmul.f32 0.5, %v3114_v60  ;;  %v3398_v57 = vmul.f32 0.5, %v3397_v11  ;;  %vm3380_vm5 = vcmp.eq.f32.partialorder %v3339_v43, 0.0 }
 0x310   : > { %v8076_v52 = vsel %vm3177_vm0, %v3209_v9, %v3145_v46  ;;  %vm3438_vm10 = vcmp.eq.f32.partialorder %v3344_v21, inf  ;;  %v3441_v17 = vand.u32 2147483648, %v3344_v21  ;;  %vm3440_vm11 = vcmp.eq.f32.partialorder %v3344_v21, 0.0 }
 0x311   : > { %v3273_v61 = vmul.f32 %v8076_v52, %v8076_v52  ;;  %v3210_v23 = vsub.f32 0.0, %v3146_v38  ;;  %v3399_v30 = vsub.f32 1.5, %v3398_v57 }
 0x312   : > { %v4940_v24 = vpop.eup %4939 }
 0x313   : > { %3335 = vadd.xlane.f32.xlu2 %v3273_v61  ;;  %v8081_v33 = vsel %vm3178_vm1, %v3210_v23, %v3146_v38  ;;  %v3400_v54 = vmul.f32 %v4938_v19, %v3399_v30  ;;  %v3372_v56 = vmul.f32 %v4940_v24, %v3339_v43 }
 0x314   : > { %v3274_v15 = vmul.f32 %v8081_v33, %v8081_v33 }
 0x315   : > { %v3401_v14 = vmul.f32 %v3400_v54, %v8051_v48  ;;  %v3373_v7 = vmul.f32 %v4940_v24, %v3372_v56 }
 0x316   : > { %3337 = vadd.xlane.f32.xlu0 %v3274_v15 }
 0x317   : > { %v3403_v12 = vsel %vm3402_vm2, %v8051_v48, %v3401_v14  ;;  %v3374_v19 = vmul.f32 0.5, %v3373_v7  ;;  %v3342_v14 = vadd.f32 1.0, %v3282_v34 }
 0x318   : > { %v3406_v6 = vsel %vm3404_vm3, %v3405_v4, %v3403_v12 }
 0x319   : > { %v3757_v37 = vadd.f32 1.0, %v3406_v6  ;;  %v3375_v25 = vsub.f32 1.5, %v3374_v19  ;;  %vm3414_vm0 = vcmp.eq.f32.partialorder %v3342_v14, inf  ;;  %vm3416_vm1 = vcmp.eq.f32.partialorder %v3342_v14, 0.0 }
 0x31b   : > { %4941 = vrcp.f32 %v3757_v37  ;;  %v3376_v16 = vmul.f32 %v4940_v24, %v3375_v25  ;;  %v3828_v48 = vand.u32 2147483648, %v3757_v37  ;;  %v3826_v57 = vand.u32 2147483647, %v3757_v37 }
 0x31c   : > { %4943 = vrsqrt.f32 %v3344_v21  ;;  %vm3822_vm7 = vweird.f32 %v3757_v37 }
 0x31d   : > { %v3377_v46 = vmul.f32 %v3376_v16, %v3339_v43  ;;  %v3829_v54 = vor.u32 1.1754944e-38, %v3828_v48  ;;  %vm3827_vm9 = vcmp.eq.f32.partialorder %v3826_v57, 8.507059e+37 }
 0x31f   : > { %v3379_v9 = vsel %vm3378_vm4, %v3339_v43, %v3377_v46 }
 0x320   : > { %v3382_v13 = vsel %vm3380_vm5, %v3381_v5, %v3379_v9 }
 0x321   : > { %v4942_v49 = vpop.eup %4941  ;;  %v3755_v61 = vadd.f32 1.0, %v3382_v13 }
 0x322   : > { %v3818_v20 = vmul.f32 %v4942_v49, %v3757_v37  ;;  %v4944_v60 = vpop.eup %4943  ;;  %vm3823_vm6 = vweird.f32 %v4942_v49 }
 0x323   : > { %v3432_v27 = vmul.f32 %v4944_v60, %v3344_v21  ;;  %4945 = vrcp.f32 %v3755_v61  ;;  %vm3824_vm8 = vmor %vm3822_vm7, %vm3823_vm6  ;;  %vm3792_vm13 = vweird.f32 %v3755_v61 }
 0x324   : > { %v3819_v11 = vsub.f32 1.0, %v3818_v20  ;;  %4947 = vrsqrt.f32 %v3342_v14 }
 0x325   : > { %v3433_v23 = vmul.f32 %v4944_v60, %v3432_v27 }
 0x326   : > { %v3820_v38 = vmul.f32 %v4942_v49, %v3819_v11  ;;  %v3796_v11 = vand.u32 2147483647, %v3755_v61 }
 0x327   : > { %v3434_v15 = vmul.f32 0.5, %v3433_v23 }
 0x328   : > { %v3821_v30 = vadd.f32 %v4942_v49, %v3820_v38  ;;  %vm3797_vm15 = vcmp.eq.f32.partialorder %v3796_v11, 8.507059e+37 }
 0x329   : > { %v3435_v24 = vsub.f32 1.5, %v3434_v15  ;;  %v4946_v56 = vpop.eup %4945 }
 0x32a   : > { %v3825_v4 = vsel %vm3824_vm8, %v4942_v49, %v3821_v30  ;;  %v3788_v37 = vmul.f32 %v4946_v56, %v3755_v61  ;;  %v4948_v19 = vpop.eup %4947  ;;  %v3798_v49 = vand.u32 2147483648, %v3755_v61  ;;  %vm3793_vm12 = vweird.f32 %v4946_v56 }
 0x32b   : > { %v3830_v43 = vsel %vm3827_vm9, %v3829_v54, %v3825_v4  ;;  %v3436_v6 = vmul.f32 %v4944_v60, %v3435_v24  ;;  %v3408_v46 = vmul.f32 %v4948_v19, %v3342_v14  ;;  %v3278_v60 = vpop.xlane.xlu0 %3277  ;;  %vm3794_vm14 = vmor %vm3792_vm13, %vm3793_vm12  ;;  %v3417_v61 = vand.u32 2147483648, %v3342_v14 }
 0x32c   : > { %v3831_v12 = vmul.f32 %v3830_v43, %v7553_v1  ;;  %v3789_v25 = vsub.f32 1.0, %v3788_v37  ;;  %v3799_v13 = vor.u32 1.1754944e-38, %v3798_v49  ;;  %v3340_v38 = vadd.f32 1.0, %v3278_v60 }
 0x32d   : > { %v3437_v7 = vmul.f32 %v3436_v6, %v3344_v21  ;;  %v3409_v48 = vmul.f32 %v4948_v19, %v3408_v46 }
 0x32e   : > { %4269 = vst [vmem:[%s8095_s14 + $0x10] sm:$0xff] %v3831_v12  ;;  %v3790_v5 = vmul.f32 %v4946_v56, %v3789_v25  ;;  %vm3390_vm6 = vcmp.eq.f32.partialorder %v3340_v38, inf  ;;  %vm3392_vm7 = vcmp.eq.f32.partialorder %v3340_v38, 0.0 }
 0x32f   : > { %v3439_v16 = vsel %vm3438_vm10, %v3344_v21, %v3437_v7  ;;  %v3410_v27 = vmul.f32 0.5, %v3409_v48 }
 0x330   : > { %v3442_v20 = vsel %vm3440_vm11, %v3441_v17, %v3439_v16  ;;  %v3791_v1 = vadd.f32 %v4946_v56, %v3790_v5 }
 0x331   : > { %v3760_v9 = vadd.f32 1.0, %v3442_v20  ;;  %v3411_v23 = vsub.f32 1.5, %v3410_v27 }
 0x332   : > { %v3795_v57 = vsel %vm3794_vm14, %v4946_v56, %v3791_v1 }
 0x333   : > { %4949 = vrcp.f32 %v3760_v9  ;;  %v3800_v21 = vsel %vm3797_vm15, %v3799_v13, %v3795_v57  ;;  %v3412_v34 = vmul.f32 %v4948_v19, %v3411_v23  ;;  %v3873_v6 = vand.u32 2147483648, %v3760_v9  ;;  %v3292_v19 = vpop.xlane.xlu1 %3291 }
 0x334   : > { %4951 = vrsqrt.f32 %v3340_v38  ;;  %v3801_v30 = vmul.f32 %v3800_v21, %v7570_v22  ;;  %v3871_v17 = vand.u32 2147483647, %v3760_v9  ;;  %vm3867_vm3 = vweird.f32 %v3760_v9 }
 0x335   : > { %v3413_v4 = vmul.f32 %v3412_v34, %v3342_v14  ;;  %v3874_v49 = vor.u32 1.1754944e-38, %v3873_v6  ;;  %v3347_v46 = vadd.f32 1.0, %v3292_v19 }
 0x336   : > { %4267 = vst [vmem:[%s8095_s14] sm:$0xff] %v3801_v30  ;;  %vm3872_vm5 = vcmp.eq.f32.partialorder %v3871_v17, 8.507059e+37 }
 0x337   : > { %v3415_v12 = vsel %vm3414_vm0, %v3342_v14, %v3413_v4  ;;  %vm3474_vm12 = vcmp.eq.f32.partialorder %v3347_v46, inf  ;;  %vm3476_vm13 = vcmp.eq.f32.partialorder %v3347_v46, 0.0 }
 0x338   : > { %v3418_v37 = vsel %vm3416_vm1, %v3417_v61, %v3415_v12 }
 0x339   : > { %v4950_v54 = vpop.eup %4949  ;;  %v3758_v25 = vadd.f32 1.0, %v3418_v37 }
 0x33a   : > { %v3863_v15 = vmul.f32 %v4950_v54, %v3760_v9  ;;  %v4952_v43 = vpop.eup %4951  ;;  %vm3868_vm2 = vweird.f32 %v4950_v54  ;;  %v3393_v9 = vand.u32 2147483648, %v3340_v38 }
 0x33b   : > { %v3384_v56 = vmul.f32 %v4952_v43, %v3340_v38  ;;  %4953 = vrcp.f32 %v3758_v25  ;;  %vm3869_vm4 = vmor %vm3867_vm3, %vm3868_vm2  ;;  %v3843_v30 = vand.u32 2147483648, %v3758_v25  ;;  %v3841_v4 = vand.u32 2147483647, %v3758_v25 }
 0x33c   : > { %v3864_v24 = vsub.f32 1.0, %v3863_v15  ;;  %4955 = vrsqrt.f32 %v3347_v46  ;;  %vm3837_vm9 = vweird.f32 %v3758_v25 }
 0x33d   : > { %v3385_v16 = vmul.f32 %v4952_v43, %v3384_v56  ;;  %v3844_v12 = vor.u32 1.1754944e-38, %v3843_v30  ;;  %vm3842_vm11 = vcmp.eq.f32.partialorder %v3841_v4, 8.507059e+37 }
 0x33e   : > { %v3865_v7 = vmul.f32 %v4950_v54, %v3864_v24 }
 0x33f   : > { %v3386_v20 = vmul.f32 0.5, %v3385_v16 }
 0x340   : > { %v3866_v22 = vadd.f32 %v4950_v54, %v3865_v7 }
 0x341   : > { %v3387_v11 = vsub.f32 1.5, %v3386_v20  ;;  %v4954_v60 = vpop.eup %4953 }
 0x342   : > { %v3870_v5 = vsel %vm3869_vm4, %v4950_v54, %v3866_v22  ;;  %v3833_v13 = vmul.f32 %v4954_v60, %v3758_v25  ;;  %v4956_v57 = vpop.eup %4955  ;;  %vm3838_vm8 = vweird.f32 %v4954_v60  ;;  %v3477_v25 = vand.u32 2147483648, %v3347_v46 }
 0x343   : > { %v3875_v14 = vsel %vm3872_vm5, %v3874_v49, %v3870_v5  ;;  %v3388_v1 = vmul.f32 %v4952_v43, %v3387_v11  ;;  %v3468_v54 = vmul.f32 %v4956_v57, %v3347_v46  ;;  %v3288_v43 = vpop.xlane.xlu2 %3287  ;;  %vm3839_vm10 = vmor %vm3837_vm9, %vm3838_vm8 }
 0x344   : > { %v3876_v48 = vmul.f32 %v3875_v14, %v7607_v63  ;;  %v3834_v21 = vsub.f32 1.0, %v3833_v13  ;;  %v3345_v37 = vadd.f32 1.0, %v3288_v43 }
 0x345   : > { %v3389_v27 = vmul.f32 %v3388_v1, %v3340_v38  ;;  %v3469_v24 = vmul.f32 %v4956_v57, %v3468_v54 }
 0x346   : > { %4272 = vst [vmem:[%s8095_s14 + $0x28] sm:$0xff] %v3876_v48  ;;  %v3835_v15 = vmul.f32 %v4954_v60, %v3834_v21  ;;  %vm3450_vm2 = vcmp.eq.f32.partialorder %v3345_v37, inf  ;;  %vm3452_vm3 = vcmp.eq.f32.partialorder %v3345_v37, 0.0 }
 0x347   : > { %v3391_v23 = vsel %vm3390_vm6, %v3340_v38, %v3389_v27  ;;  %v3470_v6 = vmul.f32 0.5, %v3469_v24 }
 0x348   : > { %v3394_v34 = vsel %vm3392_vm7, %v3393_v9, %v3391_v23  ;;  %v3836_v63 = vadd.f32 %v4954_v60, %v3835_v15 }
 0x349   : > { %v3756_v61 = vadd.f32 1.0, %v3394_v34  ;;  %v3471_v7 = vsub.f32 1.5, %v3470_v6 }
 0x34a   : > { %v3840_v56 = vsel %vm3839_vm10, %v4954_v60, %v3836_v63 }
 0x34b   : > { %4957 = vrcp.f32 %v3756_v61  ;;  %v3845_v38 = vsel %vm3842_vm11, %v3844_v12, %v3840_v56  ;;  %v3472_v16 = vmul.f32 %v4956_v57, %v3471_v7  ;;  %v3813_v11 = vand.u32 2147483648, %v3756_v61  ;;  %v3284_v57 = vpop.xlane.xlu0 %3283 }
 0x34c   : > { %4959 = vrsqrt.f32 %v3345_v37  ;;  %v3846_v17 = vmul.f32 %v3845_v38, %v7641_v44  ;;  %v3811_v13 = vand.u32 2147483647, %v3756_v61  ;;  %vm3807_vm15 = vweird.f32 %v3756_v61 }
 0x34d   : > { %v3473_v49 = vmul.f32 %v3472_v16, %v3347_v46  ;;  %v3814_v21 = vor.u32 1.1754944e-38, %v3813_v11  ;;  %v3343_v30 = vadd.f32 1.0, %v3284_v57 }
 0x34e   : > { %4270 = vst [vmem:[%s8095_s14 + $0x18] sm:$0xff] %v3846_v17  ;;  %vm3812_vm1 = vcmp.eq.f32.partialorder %v3811_v13, 8.507059e+37 }
 0x34f   : > { %v3475_v14 = vsel %vm3474_vm12, %v3347_v46, %v3473_v49  ;;  %vm3426_vm8 = vcmp.eq.f32.partialorder %v3343_v30, inf  ;;  %vm3428_vm9 = vcmp.eq.f32.partialorder %v3343_v30, 0.0 }
 0x350   : > { %v3478_v48 = vsel %vm3476_vm13, %v3477_v25, %v3475_v14  ;;  %v3298_v25 = vpop.xlane.xlu1 %3297 }
 0x351   : > { %v4958_v22 = vpop.eup %4957  ;;  %v3763_v27 = vadd.f32 1.0, %v3478_v48  ;;  %v3350_v14 = vadd.f32 1.0, %v3298_v25 }
 0x352   : > { %v3803_v19 = vmul.f32 %v4958_v22, %v3756_v61  ;;  %v4960_v20 = vpop.eup %4959  ;;  %vm3808_vm14 = vweird.f32 %v4958_v22  ;;  %v3453_v61 = vand.u32 2147483648, %v3345_v37 }
 0x353   : > { %v3444_v1 = vmul.f32 %v4960_v20, %v3345_v37  ;;  %4961 = vrcp.f32 %v3763_v27  ;;  %vm3809_vm0 = vmor %vm3807_vm15, %vm3808_vm14  ;;  %v3918_v38 = vand.u32 2147483648, %v3763_v27  ;;  %vm3912_vm5 = vweird.f32 %v3763_v27 }
 0x354   : > { %v3804_v5 = vsub.f32 1.0, %v3803_v19  ;;  %4963 = vrsqrt.f32 %v3343_v30  ;;  %vm3510_vm14 = vcmp.eq.f32.partialorder %v3350_v14, inf  ;;  %vm3512_vm15 = vcmp.eq.f32.partialorder %v3350_v14, 0.0 }
 0x355   : > { %v3445_v9 = vmul.f32 %v4960_v20, %v3444_v1 }
 0x356   : > { %v3805_v60 = vmul.f32 %v4958_v22, %v3804_v5 }
 0x357   : > { %v3446_v23 = vmul.f32 0.5, %v3445_v9 }
 0x358   : > { %v3806_v44 = vadd.f32 %v4958_v22, %v3805_v60 }
 0x359   : > { %v3447_v54 = vsub.f32 1.5, %v3446_v23  ;;  %v4962_v24 = vpop.eup %4961 }
 0x35a   : > { %v3810_v34 = vsel %vm3809_vm0, %v4958_v22, %v3806_v44  ;;  %v3908_v63 = vmul.f32 %v4962_v24, %v3763_v27  ;;  %v4964_v12 = vpop.eup %4963  ;;  %vm3913_vm4 = vweird.f32 %v4962_v24  ;;  %v3916_v22 = vand.u32 2147483647, %v3763_v27 }
 0x35b   : > { %v3815_v46 = vsel %vm3812_vm1, %v3814_v21, %v3810_v34  ;;  %v3448_v4 = vmul.f32 %v4960_v20, %v3447_v54  ;;  %v3420_v17 = vmul.f32 %v4964_v12, %v3343_v30  ;;  %vm3914_vm6 = vmor %vm3912_vm5, %vm3913_vm4  ;;  %v3919_v20 = vor.u32 1.1754944e-38, %v3918_v38 }
 0x35c   : > { %v3816_v15 = vmul.f32 %v3815_v46, %v7658_v47  ;;  %v3909_v6 = vsub.f32 1.0, %v3908_v63  ;;  %vm3917_vm7 = vcmp.eq.f32.partialorder %v3916_v22, 8.507059e+37  ;;  %v3429_v27 = vand.u32 2147483648, %v3343_v30 }
 0x35d   : > { %v3449_v43 = vmul.f32 %v3448_v4, %v3345_v37  ;;  %v3421_v49 = vmul.f32 %v4964_v12, %v3420_v17 }
 0x35e   : > { %4268 = vst [vmem:[%s8095_s14 + $0x8] sm:$0xff] %v3816_v15  ;;  %v3910_v16 = vmul.f32 %v4962_v24, %v3909_v6 }
 0x35f   : > { %v3451_v56 = vsel %vm3450_vm2, %v3345_v37, %v3449_v43  ;;  %v3422_v5 = vmul.f32 0.5, %v3421_v49  ;;  %v3294_v43 = vpop.xlane.xlu2 %3293 }
 0x360   : > { %v3454_v7 = vsel %vm3452_vm3, %v3453_v61, %v3451_v56  ;;  %v3911_v47 = vadd.f32 %v4962_v24, %v3910_v16  ;;  %v3348_v6 = vadd.f32 1.0, %v3294_v43 }
 0x361   : > { %v3761_v19 = vadd.f32 1.0, %v3454_v7  ;;  %v3423_v48 = vsub.f32 1.5, %v3422_v5 }
 0x362   : > { %v3915_v11 = vsel %vm3914_vm6, %v4962_v24, %v3911_v47  ;;  %vm3486_vm4 = vcmp.eq.f32.partialorder %v3348_v6, inf  ;;  %vm3488_vm5 = vcmp.eq.f32.partialorder %v3348_v6, 0.0 }
 0x363   : > { %4965 = vrcp.f32 %v3761_v19  ;;  %v3920_v37 = vsel %vm3917_vm7, %v3919_v20, %v3915_v11  ;;  %v3424_v60 = vmul.f32 %v4964_v12, %v3423_v48  ;;  %v3888_v34 = vand.u32 2147483648, %v3761_v19 }
 0x364   : > { %4967 = vrsqrt.f32 %v3350_v14  ;;  %v3921_v1 = vmul.f32 %v3920_v37, %v7672_v26  ;;  %v3886_v4 = vand.u32 2147483647, %v3761_v19  ;;  %vm3882_vm11 = vweird.f32 %v3761_v19 }
 0x365   : > { %v3425_v44 = vmul.f32 %v3424_v60, %v3343_v30  ;;  %v3889_v61 = vor.u32 1.1754944e-38, %v3888_v34 }
 0x366   : > { %4275 = vst [vmem:[%s8095_s14 + $0x40] sm:$0xff] %v3921_v1  ;;  %vm3887_vm13 = vcmp.eq.f32.partialorder %v3886_v4, 8.507059e+37 }
 0x367   : > { %v3427_v23 = vsel %vm3426_vm8, %v3343_v30, %v3425_v44 }
 0x368   : > { %v3430_v46 = vsel %vm3428_vm9, %v3429_v27, %v3427_v23 }
 0x369   : > { %v4966_v13 = vpop.eup %4965  ;;  %v3759_v24 = vadd.f32 1.0, %v3430_v46 }
 0x36a   : > { %v3878_v9 = vmul.f32 %v4966_v13, %v3761_v19  ;;  %v4968_v57 = vpop.eup %4967  ;;  %vm3883_vm10 = vweird.f32 %v4966_v13  ;;  %v3513_v19 = vand.u32 2147483648, %v3350_v14 }
 0x36b   : > { %v3504_v54 = vmul.f32 %v4968_v57, %v3350_v14  ;;  %4969 = vrcp.f32 %v3759_v24  ;;  %vm3884_vm12 = vmor %vm3882_vm11, %vm3883_vm10  ;;  %v3858_v5 = vand.u32 2147483648, %v3759_v24  ;;  %v3856_v1 = vand.u32 2147483647, %v3759_v24 }
 0x36c   : > { %v3879_v21 = vsub.f32 1.0, %v3878_v9  ;;  %4971 = vrsqrt.f32 %v3348_v6  ;;  %vm3852_vm1 = vweird.f32 %v3759_v24  ;;  %v3296_v9 = vpop.xlane.xlu0 %3295 }
 0x36d   : > { %v3505_v63 = vmul.f32 %v4968_v57, %v3504_v54  ;;  %v3859_v44 = vor.u32 1.1754944e-38, %v3858_v5  ;;  %vm3857_vm3 = vcmp.eq.f32.partialorder %v3856_v1, 8.507059e+37 }
 0x36e   : > { %v3880_v15 = vmul.f32 %v4966_v13, %v3879_v21 }
 0x36f   : > { %v3506_v12 = vmul.f32 0.5, %v3505_v63 }
 0x370   : > { %v3881_v26 = vadd.f32 %v4966_v13, %v3880_v15 }
 0x371   : > { %v3507_v38 = vsub.f32 1.5, %v3506_v12  ;;  %v4970_v16 = vpop.eup %4969 }
 0x372   : > { %v3885_v56 = vsel %vm3884_vm12, %v4966_v13, %v3881_v26  ;;  %v3848_v22 = vmul.f32 %v4970_v16, %v3759_v24  ;;  %v4972_v47 = vpop.eup %4971  ;;  %vm3853_vm0 = vweird.f32 %v4970_v16  ;;  %v3489_v24 = vand.u32 2147483648, %v3348_v6 }
 0x373   : > { %v3890_v30 = vsel %vm3887_vm13, %v3889_v61, %v3885_v56  ;;  %v3508_v17 = vmul.f32 %v4968_v57, %v3507_v38  ;;  %v3480_v37 = vmul.f32 %v4972_v47, %v3348_v6  ;;  %vm3854_vm2 = vmor %vm3852_vm1, %vm3853_vm0  ;;  %v3349_v57 = vadd.f32 1.0, %v3296_v9 }
 0x374   : > { %v3891_v7 = vmul.f32 %v3890_v30, %v7740_v51  ;;  %v3849_v25 = vsub.f32 1.0, %v3848_v22 }
 0x375   : > { %v3509_v49 = vmul.f32 %v3508_v17, %v3350_v14  ;;  %v3481_v13 = vmul.f32 %v4972_v47, %v3480_v37  ;;  %vm3498_vm10 = vcmp.eq.f32.partialorder %v3349_v57, inf  ;;  %v3501_v1 = vand.u32 2147483648, %v3349_v57 }
 0x376   : > { %4273 = vst [vmem:[%s8095_s14 + $0x30] sm:$0xff] %v3891_v7  ;;  %v3850_v48 = vmul.f32 %v4970_v16, %v3849_v25  ;;  %vm3500_vm11 = vcmp.eq.f32.partialorder %v3349_v57, 0.0 }
 0x377   : > { %v3511_v20 = vsel %vm3510_vm14, %v3350_v14, %v3509_v49  ;;  %v3482_v27 = vmul.f32 0.5, %v3481_v13 }
 0x378   : > { %v3514_v11 = vsel %vm3512_vm15, %v3513_v19, %v3511_v20  ;;  %v3851_v51 = vadd.f32 %v4970_v16, %v3850_v48 }
 0x379   : > { %v3766_v60 = vadd.f32 1.0, %v3514_v11  ;;  %v3483_v23 = vsub.f32 1.5, %v3482_v27 }
 0x37a   : > { %v3855_v21 = vsel %vm3854_vm2, %v4970_v16, %v3851_v51  ;;  %v3304_v16 = vpop.xlane.xlu1 %3303 }
 0x37b   : > { %4973 = vrcp.f32 %v3766_v60  ;;  %v3860_v14 = vsel %vm3857_vm3, %v3859_v44, %v3855_v21  ;;  %v3484_v46 = vmul.f32 %v4972_v47, %v3483_v23  ;;  %v3963_v61 = vand.u32 2147483648, %v3766_v60 }
 0x37c   : > { %4975 = vrsqrt.f32 %v3349_v57  ;;  %v3861_v34 = vmul.f32 %v3860_v14, %v7697_v3  ;;  %v3961_v38 = vand.u32 2147483647, %v3766_v60  ;;  %vm3957_vm7 = vweird.f32 %v3766_v60 }
 0x37d   : > { %v3485_v4 = vmul.f32 %v3484_v46, %v3348_v6  ;;  %v3964_v22 = vor.u32 1.1754944e-38, %v3963_v61  ;;  %v3353_v19 = vadd.f32 1.0, %v3304_v16  ;;  %v3300_v46 = vpop.xlane.xlu2 %3299 }
 0x37e   : > { %4271 = vst [vmem:[%s8095_s14 + $0x20] sm:$0xff] %v3861_v34  ;;  %vm3962_vm9 = vcmp.eq.f32.partialorder %v3961_v38, 8.507059e+37  ;;  %v3302_v38 = vpop.xlane.xlu0 %3301 }
 0x37f   : > { %v3487_v43 = vsel %vm3486_vm4, %v3348_v6, %v3485_v4  ;;  %v8115_v4 = vadd.f32 1.0, %v3300_v46  ;;  %vm3546_vm0 = vcmp.eq.f32.partialorder %v3353_v19, inf  ;;  %vm3548_vm1 = vcmp.eq.f32.partialorder %v3353_v19, 0.0 }
 0x380   : > { %v3490_v12 = vsel %vm3488_vm5, %v3489_v24, %v3487_v43  ;;  %v8120_v16 = vadd.f32 1.0, %v3302_v38 }
 0x381   : > { %v4974_v54 = vpop.eup %4973  ;;  %v3764_v7 = vadd.f32 1.0, %v3490_v12 }
 0x382   : > { %v3953_v15 = vmul.f32 %v4974_v54, %v3766_v60  ;;  %v4976_v63 = vpop.eup %4975  ;;  %vm3958_vm6 = vweird.f32 %v4974_v54 }
 0x383   : > { %v3492_v56 = vmul.f32 %v4976_v63, %v3349_v57  ;;  %4977 = vrcp.f32 %v3764_v7  ;;  %vm3959_vm8 = vmor %vm3957_vm7, %vm3958_vm6  ;;  %v3933_v9 = vand.u32 2147483648, %v3764_v7  ;;  %v3931_v14 = vand.u32 2147483647, %v3764_v7 }
 0x384   : > { %v3954_v26 = vsub.f32 1.0, %v3953_v15  ;;  %4979 = vrsqrt.f32 %v3353_v19  ;;  %vm3927_vm13 = vweird.f32 %v3764_v7  ;;  %vm3522_vm6 = vcmp.eq.f32.partialorder %v8115_v4, inf }
 0x385   : > { %v3493_v17 = vmul.f32 %v4976_v63, %v3492_v56  ;;  %vm3932_vm15 = vcmp.eq.f32.partialorder %v3931_v14, 8.507059e+37  ;;  %vm3524_vm7 = vcmp.eq.f32.partialorder %v8115_v4, 0.0 }
 0x386   : > { %v3955_v30 = vmul.f32 %v4974_v54, %v3954_v26 }
 0x387   : > { %v3494_v49 = vmul.f32 0.5, %v3493_v17 }
 0x388   : > { %v3956_v3 = vadd.f32 %v4974_v54, %v3955_v30  ;;  %v3549_v30 = vand.u32 2147483648, %v3353_v19 }
 0x389   : > { %v3495_v25 = vsub.f32 1.5, %v3494_v49  ;;  %v4978_v11 = vpop.eup %4977 }
 0x38a   : > { %v3960_v47 = vsel %vm3959_vm8, %v4974_v54, %v3956_v3  ;;  %v3923_v37 = vmul.f32 %v4978_v11, %v3764_v7  ;;  %v4980_v60 = vpop.eup %4979  ;;  %vm3928_vm12 = vweird.f32 %v4978_v11  ;;  %v3934_v54 = vor.u32 1.1754944e-38, %v3933_v9 }
 0x38b   : > { %v3965_v6 = vsel %vm3962_vm9, %v3964_v22, %v3960_v47  ;;  %v3496_v5 = vmul.f32 %v4976_v63, %v3495_v25  ;;  %v3540_v27 = vmul.f32 %v4980_v60, %v3353_v19  ;;  %vm3929_vm14 = vmor %vm3927_vm13, %vm3928_vm12  ;;  %vm3534_vm12 = vcmp.eq.f32.partialorder %v8120_v16, inf }
 0x38c   : > { %v3966_v20 = vmul.f32 %v3965_v6, %v7768_v41  ;;  %v3924_v13 = vsub.f32 1.0, %v3923_v37  ;;  %vm3536_vm13 = vcmp.eq.f32.partialorder %v8120_v16, 0.0 }
 0x38d   : > { %v3497_v48 = vmul.f32 %v3496_v5, %v3349_v57  ;;  %v3541_v34 = vmul.f32 %v4980_v60, %v3540_v27 }
 0x38e   : > { %4278 = vst [vmem:[%s8095_s14 + $0x58] sm:$0xff] %v3966_v20  ;;  %v3925_v21 = vmul.f32 %v4978_v11, %v3924_v13  ;;  %v3308_v13 = vpop.xlane.xlu0 %3307 }
 0x38f   : > { %v3499_v51 = vsel %vm3498_vm10, %v3349_v57, %v3497_v48  ;;  %v3542_v15 = vmul.f32 0.5, %v3541_v34  ;;  %v8127_v27 = vadd.f32 1.0, %v3308_v13 }
 0x390   : > { %v3502_v44 = vsel %vm3500_vm11, %v3501_v1, %v3499_v51  ;;  %v3926_v41 = vadd.f32 %v4978_v11, %v3925_v21 }
 0x391   : > { %v3765_v23 = vadd.f32 1.0, %v3502_v44  ;;  %v3543_v63 = vsub.f32 1.5, %v3542_v15 }
 0x392   : > { %v3930_v24 = vsel %vm3929_vm14, %v4978_v11, %v3926_v41 }
 0x393   : > { %4981 = vrcp.f32 %v3765_v23  ;;  %v3935_v57 = vsel %vm3932_vm15, %v3934_v54, %v3930_v24  ;;  %v3544_v43 = vmul.f32 %v4980_v60, %v3543_v63  ;;  %v3946_v22 = vand.u32 2147483647, %v3765_v23  ;;  %v3310_v60 = vpop.xlane.xlu1 %3309 }
 0x394   : > { %4983 = vrsqrt.f32 %v8115_v4  ;;  %v3936_v26 = vmul.f32 %v3935_v57, %v7791_v18  ;;  %v3948_v49 = vand.u32 2147483648, %v3765_v23  ;;  %vm3942_vm3 = vweird.f32 %v3765_v23 }
 0x395   : > { %v3545_v56 = vmul.f32 %v3544_v43, %v3353_v19  ;;  %4985 = vrsqrt.f32 %v8120_v16  ;;  %vm3947_vm5 = vcmp.eq.f32.partialorder %v3946_v22, 8.507059e+37  ;;  %v8125_v44 = vadd.f32 1.0, %v3310_v60 }
 0x396   : > { %4276 = vst [vmem:[%s8095_s14 + $0x48] sm:$0xff] %v3936_v26  ;;  %v3949_v11 = vor.u32 1.1754944e-38, %v3948_v49  ;;  %v3314_v60 = vpop.xlane.xlu0 %3313 }
 0x397   : > { %v3547_v3 = vsel %vm3546_vm0, %v3353_v19, %v3545_v56  ;;  %vm3582_vm14 = vcmp.eq.f32.partialorder %v8125_v44, inf  ;;  %vm3584_vm15 = vcmp.eq.f32.partialorder %v8125_v44, 0.0  ;;  %vm3570_vm0 = vcmp.eq.f32.partialorder %v8127_v27, inf }
 0x398   : > { %v3550_v47 = vsel %vm3548_vm1, %v3549_v30, %v3547_v3  ;;  %v3312_v30 = vpop.xlane.xlu2 %3311  ;;  %vm3572_vm1 = vcmp.eq.f32.partialorder %v8127_v27, 0.0 }
 0x399   : > { %v4982_v61 = vpop.eup %4981  ;;  %v3769_v25 = vadd.f32 1.0, %v3550_v47  ;;  %v8145_v47 = vadd.f32 1.0, %v3312_v30  ;;  %v3573_v30 = vand.u32 2147483648, %v8127_v27 }
 0x39a   : > { %v3938_v12 = vmul.f32 %v4982_v61, %v3765_v23  ;;  %v4984_v7 = vpop.eup %4983  ;;  %vm3943_vm2 = vweird.f32 %v4982_v61 }
 0x39b   : > { %v3516_v6 = vmul.f32 %v4984_v7, %v8115_v4  ;;  %4987 = vrcp.f32 %v3769_v25  ;;  %vm3944_vm4 = vmor %vm3942_vm3, %vm3943_vm2  ;;  %v4986_v51 = vpop.eup %4985  ;;  %v4008_v15 = vand.u32 2147483648, %v3769_v25  ;;  %v4006_v63 = vand.u32 2147483647, %v3769_v25  ;;  %v3316_v56 = vpop.xlane.xlu1 %3315 }
 0x39c   : > { %v3939_v17 = vsub.f32 1.0, %v3938_v12  ;;  %v3528_v14 = vmul.f32 %v4986_v51, %v8120_v16  ;;  %4989 = vrsqrt.f32 %v8125_v44  ;;  %vm4002_vm9 = vweird.f32 %v3769_v25 }
 0x39d   : > { %v3517_v20 = vmul.f32 %v4984_v7, %v3516_v6  ;;  %4991 = vrsqrt.f32 %v8127_v27  ;;  %v4009_v3 = vor.u32 1.1754944e-38, %v4008_v15  ;;  %vm4007_vm11 = vcmp.eq.f32.partialorder %v4006_v63, 8.507059e+37 }
 0x39e   : > { %v3940_v18 = vmul.f32 %v4982_v61, %v3939_v17  ;;  %v3529_v46 = vmul.f32 %v4986_v51, %v3528_v14 }
 0x39f   : > { %v3518_v19 = vmul.f32 0.5, %v3517_v20 }
 0x3a0   : > { %v3941_v5 = vadd.f32 %v4982_v61, %v3940_v18  ;;  %v3530_v57 = vmul.f32 0.5, %v3529_v46 }
 0x3a1   : > { %v3519_v1 = vsub.f32 1.5, %v3518_v19  ;;  %v4988_v23 = vpop.eup %4987  ;;  %v3537_v19 = vand.u32 2147483648, %v8120_v16 }
 0x3a2   : > { %v3945_v37 = vsel %vm3944_vm4, %v4982_v61, %v3941_v5  ;;  %v3998_v34 = vmul.f32 %v4988_v23, %v3769_v25  ;;  %vm4003_vm8 = vweird.f32 %v4988_v23  ;;  %v3531_v12 = vsub.f32 1.5, %v3530_v57  ;;  %v4990_v38 = vpop.eup %4989 }
 0x3a3   : > { %v3950_v48 = vsel %vm3947_vm5, %v3949_v11, %v3945_v37  ;;  %v3520_v21 = vmul.f32 %v4984_v7, %v3519_v1  ;;  %v8140_v7 = vadd.f32 1.0, %v3316_v56  ;;  %v4992_v22 = vpop.eup %4991  ;;  %vm4004_vm10 = vmor %vm4002_vm9, %vm4003_vm8  ;;  %v3576_v49 = vmul.f32 %v4990_v38, %v8125_v44 }
 0x3a4   : > { %v3951_v9 = vmul.f32 %v3950_v48, %v7777_v53  ;;  %v3525_v53 = vand.u32 2147483648, %v8115_v4  ;;  %v3999_v54 = vsub.f32 1.0, %v3998_v34  ;;  %v3564_v18 = vmul.f32 %v4992_v22, %v8127_v27  ;;  %v3318_v34 = vpop.xlane.xlu2 %3317 }
 0x3a5   : > { %v3521_v41 = vmul.f32 %v3520_v21, %v8115_v4  ;;  %v3577_v5 = vmul.f32 %v4990_v38, %v3576_v49  ;;  %vm3594_vm8 = vcmp.eq.f32.partialorder %v8145_v47, inf }
 0x3a6   : > { %4277 = vst [vmem:[%s8095_s14 + $0x50] sm:$0xff] %v3951_v9  ;;  %v4000_v43 = vmul.f32 %v4988_v23, %v3999_v54  ;;  %v3565_v37 = vmul.f32 %v4992_v22, %v3564_v18 }
 0x3a7   : > { %v3523_v24 = vsel %vm3522_vm6, %v8115_v4, %v3521_v41  ;;  %v3532_v4 = vmul.f32 %v4986_v51, %v3531_v12  ;;  %v3578_v1 = vmul.f32 0.5, %v3577_v5  ;;  %vm3618_vm6 = vcmp.eq.f32.partialorder %v8140_v7, inf }
 0x3a8   : > { %v3526_v26 = vsel %vm3524_vm7, %v3525_v53, %v3523_v24  ;;  %v4001_v17 = vadd.f32 %v4988_v23, %v4000_v43  ;;  %v3566_v9 = vmul.f32 0.5, %v3565_v37  ;;  %v8165_v53 = vadd.f32 1.0, %v3314_v60 }
 0x3a9   : > { %v8138_v61 = vadd.f32 1.0, %v3526_v26  ;;  %v3533_v25 = vmul.f32 %v3532_v4, %v8120_v16  ;;  %v8170_v43 = vadd.f32 1.0, %v3318_v34  ;;  %vm3620_vm7 = vcmp.eq.f32.partialorder %v8140_v7, 0.0 }
 0x3aa   : > { %v4005_v6 = vsel %vm4004_vm10, %v4988_v23, %v4001_v17  ;;  %v3567_v41 = vsub.f32 1.5, %v3566_v9  ;;  %vm3596_vm10 = vcmp.eq.f32.partialorder %v8145_v47, 0.0 }
 0x3ab   : > { %4993 = vrcp.f32 %v8138_v61  ;;  %v4010_v20 = vsel %vm4007_vm11, %v4009_v3, %v4005_v6  ;;  %v3535_v48 = vsel %vm3534_vm12, %v8120_v16, %v3533_v25  ;;  %v3579_v16 = vsub.f32 1.5, %v3578_v1 }
 0x3ac   : > { %4995 = vrsqrt.f32 %v8140_v7  ;;  %v4011_v11 = vmul.f32 %v4010_v20, %v7812_v40  ;;  %v3538_v51 = vsel %vm3536_vm13, %v3537_v19, %v3535_v48  ;;  %v3585_v40 = vand.u32 2147483648, %v8125_v44 }
 0x3ad   : > { %4997 = vrsqrt.f32 %v8145_v47  ;;  %v8160_v23 = vadd.f32 1.0, %v3538_v51  ;;  %v3976_v15 = vand.u32 2147483647, %v8138_v61  ;;  %v3978_v24 = vand.u32 2147483648, %v8138_v61 }
 0x3ae   : > { %4281 = vst [vmem:[%s8095_s14 + $0x70] sm:$0xff] %v4011_v11  ;;  %v3580_v57 = vmul.f32 %v4990_v38, %v3579_v16  ;;  %v3568_v63 = vmul.f32 %v4992_v22, %v3567_v41  ;;  %vm3972_vm2 = vweird.f32 %v8138_v61  ;;  %v3597_v41 = vand.u32 2147483648, %v8145_v47 }
 0x3af   : > { %4999 = vrcp.f32 %v8160_v23  ;;  %vm3977_vm4 = vcmp.eq.f32.partialorder %v3976_v15, 8.507059e+37  ;;  %v3979_v38 = vor.u32 1.1754944e-38, %v3978_v24  ;;  %v3991_v1 = vand.u32 2147483647, %v8160_v23 }
 0x3b0   : > { %v3581_v17 = vmul.f32 %v3580_v57, %v8125_v44  ;;  %v3569_v3 = vmul.f32 %v3568_v63, %v8127_v27  ;;  %5001 = vrsqrt.f32 %v8165_v53  ;;  %vm3987_vm11 = vweird.f32 %v8160_v23 }
 0x3b1   : > { %v4994_v13 = vpop.eup %4993  ;;  %5003 = vrsqrt.f32 %v8170_v43  ;;  %vm8212_vm12 = vcmp.eq.f32.partialorder %v3991_v1, 8.507059e+37 }
 0x3b2   : > { %v4996_v21 = vpop.eup %4995  ;;  %v3968_v14 = vmul.f32 %v4994_v13, %v8138_v61  ;;  %vm3973_vm3 = vweird.f32 %v4994_v13  ;;  %v3583_v61 = vsel %vm3582_vm14, %v8125_v44, %v3581_v17  ;;  %v3571_v6 = vsel %vm3570_vm0, %v8127_v27, %v3569_v3 }
 0x3b3   : > { %v3612_v46 = vmul.f32 %v4996_v21, %v8140_v7  ;;  %v4998_v12 = vpop.eup %4997  ;;  %vm3974_vm5 = vmor %vm3972_vm2, %vm3973_vm3  ;;  %v3586_v5 = vsel %vm3584_vm15, %v3585_v40, %v3583_v61  ;;  %v3574_v11 = vsel %vm3572_vm1, %v3573_v30, %v3571_v6  ;;  %v3993_v27 = vand.u32 2147483648, %v8160_v23 }
 0x3b4   : > { %v3969_v54 = vsub.f32 1.0, %v3968_v14  ;;  %v3588_v22 = vmul.f32 %v4998_v12, %v8145_v47  ;;  %v8191_v60 = vadd.f32 1.0, %v3586_v5  ;;  %v8194_v9 = vadd.f32 1.0, %v3574_v11 }
 0x3b5   : > { %v3613_v26 = vmul.f32 %v4996_v21, %v3612_v46  ;;  %v5000_v20 = vpop.eup %4999  ;;  %v3994_v57 = vor.u32 1.1754944e-38, %v3993_v27  ;;  %v3609_v30 = vand.u32 2147483648, %v8165_v53  ;;  %vm3606_vm2 = vcmp.eq.f32.partialorder %v8165_v53, inf }
 0x3b6   : > { %v3970_v56 = vmul.f32 %v4994_v13, %v3969_v54  ;;  %v3589_v19 = vmul.f32 %v4998_v12, %v3588_v22  ;;  %v3983_v48 = vmul.f32 %v5000_v20, %v8160_v23  ;;  %v8196_v44 = vpop.eup %5001  ;;  %5005 = vrcp.f32 %v8191_v60 }
 0x3b7   : > { %v3614_v4 = vmul.f32 0.5, %v3613_v26  ;;  %5007 = vrcp.f32 %v8194_v9  ;;  %vm3988_vm9 = vweird.f32 %v5000_v20  ;;  %v3600_v15 = vmul.f32 %v8196_v44, %v8165_v53 }
 0x3b8   : > { %v3971_v49 = vadd.f32 %v4994_v13, %v3970_v56  ;;  %v3590_v14 = vmul.f32 0.5, %v3589_v19  ;;  %v3984_v40 = vsub.f32 1.0, %v3983_v48  ;;  %vm3989_vm13 = vmor %vm3987_vm11, %vm3988_vm9  ;;  %vm4047_vm14 = vweird.f32 %v8191_v60 }
 0x3b9   : > { %v3615_v18 = vsub.f32 1.5, %v3614_v4  ;;  %vm4032_vm15 = vweird.f32 %v8194_v9  ;;  %v4036_v11 = vand.u32 2147483647, %v8194_v9  ;;  %v4038_v19 = vand.u32 2147483648, %v8194_v9 }
 0x3ba   : > { %v3975_v25 = vsel %vm3974_vm5, %v4994_v13, %v3971_v49  ;;  %v3985_v16 = vmul.f32 %v5000_v20, %v3984_v40  ;;  %v3591_v54 = vsub.f32 1.5, %v3590_v14  ;;  %v3601_v49 = vmul.f32 %v8196_v44, %v3600_v15  ;;  %v3328_v40 = vpop.xlane.xlu1 %3327 }
 0x3bb   : > { %v3980_v37 = vsel %vm3977_vm4, %v3979_v38, %v3975_v25  ;;  %v3616_v13 = vmul.f32 %v4996_v21, %v3615_v18  ;;  %v8206_v21 = vpop.eup %5003  ;;  %vm3608_vm4 = vcmp.eq.f32.partialorder %v8165_v53, 0.0  ;;  %vm8257_vm5 = vcmp.eq.f32.partialorder %v4036_v11, 8.507059e+37 }
 0x3bc   : > { %v3981_v51 = vmul.f32 %v3980_v37, %v7840_v8  ;;  %v3621_v8 = vand.u32 2147483648, %v8140_v7  ;;  %v3986_v24 = vadd.f32 %v5000_v20, %v3985_v16  ;;  %v3624_v26 = vmul.f32 %v8206_v21, %v8170_v43  ;;  %v5006_v17 = vpop.eup %5005 }
 0x3bd   : > { %v3617_v34 = vmul.f32 %v3616_v13, %v8140_v7  ;;  %v3592_v56 = vmul.f32 %v4998_v12, %v3591_v54  ;;  %v5008_v22 = vpop.eup %5007  ;;  %v4043_v6 = vmul.f32 %v5006_v17, %v8191_v60  ;;  %vm4048_vm0 = vweird.f32 %v5006_v17 }
 0x3be   : > { %4279 = vst [vmem:[%s8095_s14 + $0x60] sm:$0xff] %v3981_v51  ;;  %v3990_v3 = vsel %vm3989_vm13, %v5000_v20, %v3986_v24  ;;  %v3625_v38 = vmul.f32 %v8206_v21, %v3624_v26  ;;  %v4053_v20 = vand.u32 2147483648, %v8191_v60  ;;  %v4028_v25 = vmul.f32 %v5008_v22, %v8194_v9  ;;  %v3324_v24 = vpop.xlane.xlu2 %3323 }
 0x3bf   : > { %v3619_v63 = vsel %vm3618_vm6, %v8140_v7, %v3617_v34  ;;  %v3995_v61 = vsel %vm8212_vm12, %v3994_v57, %v3990_v3  ;;  %v4051_v7 = vand.u32 2147483647, %v8191_v60  ;;  %v3593_v12 = vmul.f32 %v3592_v56, %v8145_v47  ;;  %vm4049_vm6 = vmor %vm4047_vm14, %vm4048_vm0 }
 0x3c0   : > { %v3622_v23 = vsel %vm3620_vm7, %v3621_v8, %v3619_v63  ;;  %v3996_v18 = vmul.f32 %v3995_v61, %v7824_v28  ;;  %v4044_v5 = vsub.f32 1.0, %v4043_v6  ;;  %v4029_v37 = vsub.f32 1.0, %v4028_v25 }
 0x3c1   : > { %v8227_v4 = vadd.f32 1.0, %v3622_v23  ;;  %v3595_v48 = vsel %vm3594_vm8, %v8145_v47, %v3593_v12  ;;  %v3602_v28 = vmul.f32 0.5, %v3601_v49  ;;  %v3626_v1 = vmul.f32 0.5, %v3625_v38 }
 0x3c2   : > { %4280 = vst [vmem:[%s8095_s14 + $0x68] sm:$0xff] %v3996_v18  ;;  %v4045_v51 = vmul.f32 %v5006_v17, %v4044_v5  ;;  %vm8247_vm1 = vcmp.eq.f32.partialorder %v4051_v7, 8.507059e+37  ;;  %v3598_v14 = vsel %vm3596_vm10, %v3597_v41, %v3595_v48  ;;  %v4030_v27 = vmul.f32 %v5008_v22, %v4029_v37  ;;  %v3322_v54 = vpop.xlane.xlu1 %3321 }
 0x3c3   : > { %5009 = vrcp.f32 %v8227_v4  ;;  %vm4033_vm3 = vweird.f32 %v5008_v22  ;;  %v8254_v8 = vadd.f32 1.0, %v3598_v14  ;;  %v3603_v16 = vsub.f32 1.5, %v3602_v28 }
 0x3c4   : > { %v4046_v34 = vadd.f32 %v5006_v17, %v4045_v51  ;;  %v4054_v46 = vor.u32 1.1754944e-38, %v4053_v20  ;;  %v4039_v15 = vor.u32 1.1754944e-38, %v4038_v19  ;;  %v4031_v41 = vadd.f32 %v5008_v22, %v4030_v27  ;;  %vm4034_vm7 = vmor %vm4032_vm15, %vm4033_vm3  ;;  %v3326_v20 = vpop.xlane.xlu0 %3325 }
 0x3c5   : > { %5011 = vrcp.f32 %v8254_v8  ;;  %v3627_v57 = vsub.f32 1.5, %v3626_v1  ;;  %v8265_v63 = vadd.f32 1.0, %v3328_v40  ;;  %v4096_v56 = vand.u32 2147483647, %v8227_v4 }
 0x3c6   : > { %v4050_v26 = vsel %vm4049_vm6, %v5006_v17, %v4046_v34  ;;  %vm3630_vm8 = vcmp.eq.f32.partialorder %v8170_v43, inf  ;;  %v4035_v3 = vsel %vm4034_vm7, %v5008_v22, %v4031_v41  ;;  %v3604_v49 = vmul.f32 %v8196_v44, %v3603_v16 }
 0x3c7   : > { %v4055_v60 = vsel %vm8247_vm1, %v4054_v46, %v4050_v26  ;;  %v8276_v38 = vadd.f32 1.0, %v3324_v24  ;;  %v4040_v9 = vsel %vm8257_vm5, %v4039_v15, %v4035_v3  ;;  %v4098_v6 = vand.u32 2147483648, %v8227_v4 }
 0x3c8   : > { %v4056_v17 = vmul.f32 %v4055_v60, %v7874_v31  ;;  %v4041_v7 = vmul.f32 %v4040_v9, %v7881_v36  ;;  %v3605_v12 = vmul.f32 %v3604_v49, %v8165_v53  ;;  %v3628_v18 = vmul.f32 %v8206_v21, %v3627_v57 }
 0x3c9   : > { %v5010_v47 = vpop.eup %5009  ;;  %5013 = vrsqrt.f32 %v8265_v63  ;;  %vm4092_vm9 = vweird.f32 %v8227_v4  ;;  %vm3632_vm11 = vcmp.eq.f32.partialorder %v8170_v43, 0.0  ;;  %vm8290_vm12 = vcmp.eq.f32.partialorder %v4096_v56, 8.507059e+37 }
 0x3ca   : > { %v4088_v23 = vmul.f32 %v5010_v47, %v8227_v4  ;;  %4284 = vst [vmem:[%s8095_s14 + $0x88] sm:$0xff] %v4056_v17  ;;  %vm4093_vm10 = vweird.f32 %v5010_v47  ;;  %v3607_v36 = vsel %vm3606_vm2, %v8165_v53, %v3605_v12  ;;  %v3629_v21 = vmul.f32 %v3628_v18, %v8170_v43 }
 0x3cb   : > { %v5012_v31 = vpop.eup %5011  ;;  %4283 = vst [vmem:[%s8095_s14 + $0x80] sm:$0xff] %v4041_v7  ;;  %5015 = vrsqrt.f32 %v8276_v38  ;;  %v3610_v5 = vsel %vm3608_vm4, %v3609_v30, %v3607_v36  ;;  %v3633_v11 = vand.u32 2147483648, %v8170_v43  ;;  %vm4094_vm13 = vmor %vm4092_vm9, %vm4093_vm10  ;;  %v4099_v19 = vor.u32 1.1754944e-38, %v4098_v6  ;;  %v3330_v6 = vpop.xlane.xlu2 %3329 }
 0x3cc   : > { %v4089_v61 = vsub.f32 1.0, %v4088_v23  ;;  %v4058_v4 = vmul.f32 %v5012_v31, %v8254_v8  ;;  %v4068_v37 = vand.u32 2147483648, %v8254_v8  ;;  %v8306_v48 = vadd.f32 1.0, %v3610_v5 }
 0x3cd   : > { %v3631_v28 = vsel %vm3630_vm8, %v8170_v43, %v3629_v21  ;;  %v8313_v53 = vadd.f32 1.0, %v3326_v20  ;;  %v4066_v40 = vand.u32 2147483647, %v8254_v8  ;;  %vm4063_vm14 = vweird.f32 %v5012_v31 }
 0x3ce   : > { %v4090_v44 = vmul.f32 %v5010_v47, %v4089_v61  ;;  %v4059_v51 = vsub.f32 1.0, %v4058_v4  ;;  %v3634_v13 = vsel %vm3632_vm11, %v3633_v11, %v3631_v28  ;;  %5017 = vrcp.f32 %v8306_v48 }
 0x3cf   : > { %v5014_v30 = vpop.eup %5013  ;;  %v8320_v34 = vadd.f32 1.0, %v3634_v13  ;;  %5019 = vrsqrt.f32 %v8313_v53  ;;  %vm4062_vm15 = vweird.f32 %v8254_v8  ;;  %v4069_v24 = vor.u32 1.1754944e-38, %v4068_v37 }
 0x3d0   : > { %v4091_v25 = vadd.f32 %v5010_v47, %v4090_v44  ;;  %v4060_v16 = vmul.f32 %v5012_v31, %v4059_v51  ;;  %v3684_v43 = vmul.f32 %v5014_v30, %v8265_v63  ;;  %vm4064_vm0 = vmor %vm4062_vm15, %vm4063_vm14  ;;  %vm4067_vm1 = vcmp.eq.f32.partialorder %v4066_v40, 8.507059e+37 }
 0x3d1   : > { %v5016_v46 = vpop.eup %5015  ;;  %5021 = vrcp.f32 %v8320_v34  ;;  %vm3690_vm2 = vcmp.eq.f32.partialorder %v8265_v63, inf  ;;  %v8331_v23 = vadd.f32 1.0, %v3322_v54  ;;  %vm3692_vm3 = vcmp.eq.f32.partialorder %v8265_v63, 0.0 }
 0x3d2   : > { %v4095_v1 = vsel %vm4094_vm13, %v5010_v47, %v4091_v25  ;;  %v4061_v15 = vadd.f32 %v5012_v31, %v4060_v16  ;;  %v4083_v47 = vand.u32 2147483648, %v8306_v48  ;;  %v3685_v41 = vmul.f32 %v5014_v30, %v3684_v43 }
 0x3d3   : > { %v4100_v14 = vsel %vm8290_vm12, %v4099_v19, %v4095_v1  ;;  %v3660_v57 = vmul.f32 %v5016_v46, %v8276_v38  ;;  %v3693_v3 = vand.u32 2147483648, %v8265_v63  ;;  %v3669_v49 = vand.u32 2147483648, %v8276_v38 }
 0x3d4   : > { %v4101_v27 = vmul.f32 %v4100_v14, %v7893_v42  ;;  %v4081_v42 = vand.u32 2147483647, %v8306_v48  ;;  %v4065_v26 = vsel %vm4064_vm0, %v5012_v31, %v4061_v15  ;;  %v5018_v56 = vpop.eup %5017  ;;  %v3686_v8 = vmul.f32 0.5, %v3685_v41  ;;  %v3332_v31 = vpop.xlane.xlu0 %3331 }
 0x3d5   : > { %v4070_v60 = vsel %vm4067_vm1, %v4069_v24, %v4065_v26  ;;  %v4073_v9 = vmul.f32 %v5018_v56, %v8306_v48  ;;  %vm4077_vm4 = vweird.f32 %v8306_v48  ;;  %v3661_v61 = vmul.f32 %v5016_v46, %v3660_v57  ;;  %v5020_v7 = vpop.eup %5019 }
 0x3d6   : > { %4287 = vst [vmem:[%s8095_s14 + $0xa0] sm:$0xff] %v4101_v27  ;;  %v4071_v17 = vmul.f32 %v4070_v60, %v7920_v55  ;;  %vm8339_vm5 = vcmp.eq.f32.partialorder %v4081_v42, 8.507059e+37  ;;  %v4084_v18 = vor.u32 1.1754944e-38, %v4083_v47  ;;  %v3687_v44 = vsub.f32 1.5, %v3686_v8 }
 0x3d7   : > { %vm3666_vm6 = vcmp.eq.f32.partialorder %v8276_v38, inf  ;;  %5023 = vrsqrt.f32 %v8331_v23  ;;  %v5022_v22 = vpop.eup %5021  ;;  %v4074_v55 = vsub.f32 1.0, %v4073_v9  ;;  %vm4107_vm7 = vweird.f32 %v8320_v34 }
 0x3d8   : > { %4285 = vst [vmem:[%s8095_s14 + $0x90] sm:$0xff] %v4071_v17  ;;  %v3662_v36 = vmul.f32 0.5, %v3661_v61  ;;  %v3672_v21 = vmul.f32 %v5020_v7, %v8313_v53  ;;  %vm4078_vm8 = vweird.f32 %v5018_v56  ;;  %v4103_v20 = vmul.f32 %v5022_v22, %v8320_v34 }
 0x3d9   : > { %v3688_v25 = vmul.f32 %v5014_v30, %v3687_v44  ;;  %v8349_v4 = vadd.f32 1.0, %v3330_v6  ;;  %v4075_v5 = vmul.f32 %v5018_v56, %v4074_v55  ;;  %v8351_v37 = vadd.f32 1.0, %v3332_v31  ;;  %vm4079_vm9 = vmor %vm4077_vm4, %vm4078_vm8 }
 0x3da   : > { %v3663_v11 = vsub.f32 1.5, %v3662_v36  ;;  %v3673_v19 = vmul.f32 %v5020_v7, %v3672_v21  ;;  %v4104_v28 = vsub.f32 1.0, %v4103_v20  ;;  %v4111_v1 = vand.u32 2147483647, %v8320_v34 }
 0x3db   : > { %v3689_v51 = vmul.f32 %v3688_v25, %v8265_v63  ;;  %5025 = vrsqrt.f32 %v8349_v4  ;;  %v4076_v13 = vadd.f32 %v5018_v56, %v4075_v5  ;;  %v4113_v14 = vand.u32 2147483648, %v8320_v34 }
 0x3dc   : > { %v3664_v40 = vmul.f32 %v5016_v46, %v3663_v11  ;;  %v3674_v27 = vmul.f32 0.5, %v3673_v19  ;;  %v4105_v16 = vmul.f32 %v5022_v22, %v4104_v28  ;;  %vm4108_vm10 = vweird.f32 %v5022_v22  ;;  %v3334_v19 = vpop.xlane.xlu1 %3333 }
 0x3dd   : > { %v8357_v30 = vpop.eup %5023  ;;  %v3691_v43 = vsel %vm3690_vm2, %v8265_v63, %v3689_v51  ;;  %5027 = vrsqrt.f32 %v8351_v37  ;;  %v4080_v54 = vsel %vm4079_vm9, %v5018_v56, %v4076_v13  ;;  %vm4109_vm11 = vmor %vm4107_vm7, %vm4108_vm10  ;;  %v4114_v63 = vor.u32 1.1754944e-38, %v4113_v14 }
 0x3de   : > { %v3694_v15 = vsel %vm3692_vm3, %v3693_v3, %v3691_v43  ;;  %v3665_v46 = vmul.f32 %v3664_v40, %v8276_v38  ;;  %v3675_v24 = vsub.f32 1.5, %v3674_v27  ;;  %v4085_v48 = vsel %vm8339_vm5, %v4084_v18, %v4080_v54 }
 0x3df   : > { %v4106_v42 = vadd.f32 %v5022_v22, %v4105_v16  ;;  %v8371_v47 = vadd.f32 1.0, %v3694_v15  ;;  %v3648_v41 = vmul.f32 %v8357_v30, %v8331_v23  ;;  %v4086_v57 = vmul.f32 %v4085_v48, %v7908_v10 }
 0x3e0   : > { %v3667_v26 = vsel %vm3666_vm6, %v8276_v38, %v3665_v46  ;;  %v3676_v56 = vmul.f32 %v5020_v7, %v3675_v24  ;;  %vm4112_vm12 = vcmp.eq.f32.partialorder %v4111_v1, 8.507059e+37  ;;  %vm3668_vm13 = vcmp.eq.f32.partialorder %v8276_v38, 0.0 }
 0x3e1   : > { %v5026_v60 = vpop.eup %5025  ;;  %v4110_v8 = vsel %vm4109_vm11, %v5022_v22, %v4106_v42  ;;  %5029 = vrcp.f32 %v8371_v47  ;;  %4286 = vst [vmem:[%s8095_s14 + $0x98] sm:$0xff] %v4086_v57  ;;  %v3670_v10 = vsel %vm3668_vm13, %v3669_v49, %v3667_v26  ;;  %vm3678_vm14 = vcmp.eq.f32.partialorder %v8313_v53, inf }
 0x3e2   : > { %v4115_v3 = vsel %vm4112_vm12, %v4114_v63, %v4110_v8  ;;  %v3677_v34 = vmul.f32 %v3676_v56, %v8313_v53  ;;  %v8388_v61 = vadd.f32 1.0, %v3670_v10  ;;  %v3649_v6 = vmul.f32 %v8357_v30, %v3648_v41  ;;  %v3306_v56 = vpop.xlane.xlu2 %3305 }
 0x3e3   : > { %v8385_v17 = vpop.eup %5027  ;;  %v4116_v9 = vmul.f32 %v4115_v3, %v7934_v59  ;;  %v3681_v12 = vand.u32 2147483648, %v8313_v53  ;;  %v3696_v38 = vmul.f32 %v5026_v60, %v8349_v4  ;;  %vm3680_vm15 = vcmp.eq.f32.partialorder %v8313_v53, 0.0 }
 0x3e4   : > { %v3679_v7 = vsel %vm3678_vm14, %v8313_v53, %v3677_v34  ;;  %v3708_v49 = vmul.f32 %v8385_v17, %v8351_v37  ;;  %5031 = vrcp.f32 %v8388_v61  ;;  %vm3654_vm0 = vcmp.eq.f32.partialorder %v8331_v23, inf }
 0x3e5   : > { %4288 = vst [vmem:[%s8095_s14 + $0xa8] sm:$0xff] %v4116_v9  ;;  %v3682_v59 = vsel %vm3680_vm15, %v3681_v12, %v3679_v7  ;;  %v3650_v18 = vmul.f32 0.5, %v3649_v6  ;;  %vm3656_vm1 = vcmp.eq.f32.partialorder %v8331_v23, 0.0  ;;  %v3697_v44 = vmul.f32 %v5026_v60, %v3696_v38 }
 0x3e6   : > { %v3709_v31 = vmul.f32 %v8385_v17, %v3708_v49  ;;  %v4186_v55 = vand.u32 2147483647, %v8371_v47  ;;  %v4188_v36 = vand.u32 2147483648, %v8371_v47  ;;  %v8405_v21 = vadd.f32 1.0, %v3682_v59  ;;  %v3320_v49 = vpop.xlane.xlu0 %3319 }
 0x3e7   : > { %v5030_v22 = vpop.eup %5029  ;;  %v3657_v20 = vand.u32 2147483648, %v8331_v23  ;;  %v4156_v25 = vand.u32 2147483647, %v8388_v61  ;;  %v3651_v5 = vsub.f32 1.5, %v3650_v18  ;;  %v3698_v11 = vmul.f32 0.5, %v3697_v44 }
 0x3e8   : > { %v4178_v53 = vmul.f32 %v5030_v22, %v8371_v47  ;;  %vm3702_vm2 = vcmp.eq.f32.partialorder %v8349_v4, inf  ;;  %vm4182_vm3 = vweird.f32 %v8371_v47  ;;  %v4158_v28 = vand.u32 2147483648, %v8388_v61 }
 0x3e9   : > { %5033 = vrcp.f32 %v8405_v21  ;;  %vm3704_vm4 = vcmp.eq.f32.partialorder %v8349_v4, 0.0  ;;  %v3705_v1 = vand.u32 2147483648, %v8349_v4  ;;  %v3652_v13 = vmul.f32 %v8357_v30, %v3651_v5 }
 0x3ea   : > { %v4179_v51 = vsub.f32 1.0, %v4178_v53  ;;  %v3699_v14 = vsub.f32 1.5, %v3698_v11  ;;  %v3710_v40 = vmul.f32 0.5, %v3709_v31  ;;  %v5032_v27 = vpop.eup %5031  ;;  %vm8417_vm5 = vcmp.eq.f32.partialorder %v4186_v55, 8.507059e+37 }
 0x3eb   : > { %v4189_v43 = vor.u32 1.1754944e-38, %v4188_v36  ;;  %vm4152_vm6 = vweird.f32 %v8388_v61  ;;  %vm3714_vm7 = vcmp.eq.f32.partialorder %v8351_v37, inf  ;;  %v8423_v54 = vadd.f32 1.0, %v3334_v19 }
 0x3ec   : > { %v4180_v15 = vmul.f32 %v5030_v22, %v4179_v51  ;;  %vm4183_vm8 = vweird.f32 %v5030_v22  ;;  %v4148_v46 = vmul.f32 %v5032_v27, %v8388_v61  ;;  %vm8426_vm9 = vcmp.eq.f32.partialorder %v4156_v25, 8.507059e+37 }
 0x3ed   : > { %v3653_v24 = vmul.f32 %v3652_v13, %v8331_v23  ;;  %v4159_v48 = vor.u32 1.1754944e-38, %v4158_v28  ;;  %v3700_v42 = vmul.f32 %v5026_v60, %v3699_v14  ;;  %v3711_v41 = vsub.f32 1.5, %v3710_v40  ;;  %vm4184_vm11 = vmor %vm4182_vm3, %vm4183_vm8 }
 0x3ee   : > { %vm3716_vm10 = vcmp.eq.f32.partialorder %v8351_v37, 0.0  ;;  %v4181_v57 = vadd.f32 %v5030_v22, %v4180_v15  ;;  %v4149_v63 = vsub.f32 1.0, %v4148_v46  ;;  %5035 = vrsqrt.f32 %v8423_v54 }
 0x3ef   : > { %v3655_v26 = vsel %vm3654_vm0, %v8331_v23, %v3653_v24  ;;  %v5034_v8 = vpop.eup %5033  ;;  %v4171_v3 = vand.u32 2147483647, %v8405_v21  ;;  %v3701_v10 = vmul.f32 %v3700_v42, %v8349_v4  ;;  %v3712_v34 = vmul.f32 %v8385_v17, %v3711_v41  ;;  %v3290_v24 = vpop.xlane.xlu0 %3289 }
 0x3f0   : > { %v3658_v60 = vsel %vm3656_vm1, %v3657_v20, %v3655_v26  ;;  %v4185_v9 = vsel %vm4184_vm11, %v5030_v22, %v4181_v57  ;;  %v4150_v6 = vmul.f32 %v5032_v27, %v4149_v63  ;;  %vm4153_vm12 = vweird.f32 %v5032_v27 }
 0x3f1   : > { %v4163_v7 = vmul.f32 %v5034_v8, %v8405_v21  ;;  %v4190_v12 = vsel %vm8417_vm5, %v4189_v43, %v4185_v9  ;;  %v8446_v47 = vadd.f32 1.0, %v3658_v60  ;;  %v3703_v23 = vsel %vm3702_vm2, %v8349_v4, %v3701_v10  ;;  %vm4154_vm13 = vmor %vm4152_vm6, %vm4153_vm12 }
 0x3f2   : > { %v3713_v38 = vmul.f32 %v3712_v34, %v8351_v37  ;;  %v4191_v17 = vmul.f32 %v4190_v12, %v7950_v58  ;;  %v4151_v59 = vadd.f32 %v5032_v27, %v4150_v6  ;;  %v3706_v44 = vsel %vm3704_vm4, %v3705_v1, %v3703_v23 }
 0x3f3   : > { %v4164_v18 = vsub.f32 1.0, %v4163_v7  ;;  %vm4168_vm14 = vweird.f32 %v5034_v8  ;;  %v4173_v31 = vand.u32 2147483648, %v8405_v21  ;;  %5037 = vrcp.f32 %v8446_v47 }
 0x3f4   : > { %v3717_v22 = vand.u32 2147483648, %v8351_v37  ;;  %v8460_v55 = vpop.eup %5035  ;;  %4293 = vst [vmem:[%s8095_s14 + $0xd0] sm:$0xff] %v4191_v17  ;;  %v4155_v58 = vsel %vm4154_vm13, %v5032_v27, %v4151_v59  ;;  %v8463_v20 = vadd.f32 1.0, %v3706_v44  ;;  %v3715_v4 = vsel %vm3714_vm7, %v8351_v37, %v3713_v38 }
 0x3f5   : > { %v4165_v36 = vmul.f32 %v5034_v8, %v4164_v18  ;;  %v4160_v61 = vsel %vm8426_vm9, %v4159_v48, %v4155_v58  ;;  %vm4167_vm15 = vweird.f32 %v8405_v21  ;;  %v4174_v11 = vor.u32 1.1754944e-38, %v4173_v31 }
 0x3f6   : > { %v3718_v53 = vsel %vm3716_vm10, %v3717_v22, %v3715_v4  ;;  %v4161_v25 = vmul.f32 %v4160_v61, %v7979_v2  ;;  %5039 = vrcp.f32 %v8463_v20  ;;  %vm4169_vm0 = vmor %vm4167_vm15, %vm4168_vm14  ;;  %v3720_v28 = vmul.f32 %v8460_v55, %v8423_v54  ;;  %v3336_v2 = vpop.xlane.xlu2 %3335 }
 0x3f7   : > { %v4166_v5 = vadd.f32 %v5034_v8, %v4165_v36  ;;  %v8476_v19 = vadd.f32 1.0, %v3718_v53  ;;  %vm4172_vm1 = vcmp.eq.f32.partialorder %v4171_v3, 8.507059e+37  ;;  %v4141_v37 = vand.u32 2147483647, %v8446_v47 }
 0x3f8   : > { %4291 = vst [vmem:[%s8095_s14 + $0xc0] sm:$0xff] %v4161_v25  ;;  %v8482_v51 = vadd.f32 1.0, %v3306_v56  ;;  %v4143_v14 = vand.u32 2147483648, %v8446_v47  ;;  %v4201_v16 = vand.u32 2147483647, %v8463_v20  ;;  %v8489_v43 = vadd.f32 1.0, %v3320_v49 }
 0x3f9   : > { %v4170_v1 = vsel %vm4169_vm0, %v5034_v8, %v4166_v5  ;;  %v5038_v21 = vpop.eup %5037  ;;  %5041 = vrcp.f32 %v8476_v19  ;;  %v4203_v15 = vand.u32 2147483648, %v8463_v20  ;;  %v3721_v46 = vmul.f32 %v8460_v55, %v3720_v28  ;;  %v3338_v28 = vpop.xlane.xlu0 %3337 }
 0x3fa   : > { %v4175_v13 = vsel %vm4172_vm1, %v4174_v11, %v4170_v1  ;;  %v4133_v27 = vmul.f32 %v5038_v21, %v8446_v47  ;;  %5043 = vrsqrt.f32 %v8482_v51  ;;  %v8494_v30 = vadd.f32 1.0, %v3336_v2 }
 0x3fb   : > { %v4176_v40 = vmul.f32 %v4175_v13, %v7961_v0  ;;  %vm4137_vm2 = vweird.f32 %v8446_v47  ;;  %vm8498_vm3 = vcmp.eq.f32.partialorder %v4141_v37, 8.507059e+37  ;;  %v3729_v41 = vand.u32 2147483648, %v8423_v54 }
 0x3fc   : > { %v5040_v48 = vpop.eup %5039  ;;  %v4134_v42 = vsub.f32 1.0, %v4133_v27  ;;  %v4144_v57 = vor.u32 1.1754944e-38, %v4143_v14  ;;  %vm4197_vm4 = vweird.f32 %v8463_v20  ;;  %v4216_v26 = vand.u32 2147483647, %v8476_v19 }
 0x3fd   : > { %4292 = vst [vmem:[%s8095_s14 + $0xc8] sm:$0xff] %v4176_v40  ;;  %v4193_v63 = vmul.f32 %v5040_v48, %v8463_v20  ;;  %vm3726_vm5 = vcmp.eq.f32.partialorder %v8423_v54, inf  ;;  %vm4138_vm6 = vweird.f32 %v5038_v21  ;;  %v3722_v8 = vmul.f32 0.5, %v3721_v46 }
 0x3fe   : > { %v4135_v56 = vmul.f32 %v5038_v21, %v4134_v42  ;;  %vm3728_vm7 = vcmp.eq.f32.partialorder %v8423_v54, 0.0  ;;  %5045 = vrsqrt.f32 %v8489_v43  ;;  %vm8509_vm8 = vcmp.eq.f32.partialorder %v4201_v16, 8.507059e+37  ;;  %vm4139_vm10 = vmor %vm4137_vm2, %vm4138_vm6 }
 0x3ff   : > { %v5042_v3 = vpop.eup %5041  ;;  %v4194_v60 = vsub.f32 1.0, %v4193_v63  ;;  %v4204_v34 = vor.u32 1.1754944e-38, %v4203_v15  ;;  %5047 = vrsqrt.f32 %v8494_v30  ;;  %vm4212_vm9 = vweird.f32 %v8476_v19 }
 0x400   : > { %v4136_v9 = vadd.f32 %v5038_v21, %v4135_v56  ;;  %v4208_v6 = vmul.f32 %v5042_v3, %v8476_v19  ;;  %v3723_v7 = vsub.f32 1.5, %v3722_v8  ;;  %v5044_v12 = vpop.eup %5043  ;;  %vm4198_vm11 = vweird.f32 %v5040_v48 }
 0x401   : > { %v4195_v23 = vmul.f32 %v5040_v48, %v4194_v60  ;;  %vm8518_vm12 = vcmp.eq.f32.partialorder %v4216_v26, 8.507059e+37  ;;  %v4218_v49 = vand.u32 2147483648, %v8476_v19  ;;  %v3552_v44 = vmul.f32 %v5044_v12, %v8482_v51  ;;  %vm4199_vm14 = vmor %vm4197_vm4, %vm4198_vm11 }
 0x402   : > { %v4140_v17 = vsel %vm4139_vm10, %v5038_v21, %v4136_v9  ;;  %v4209_v59 = vsub.f32 1.0, %v4208_v6  ;;  %v3724_v18 = vmul.f32 %v8460_v55, %v3723_v7  ;;  %vm4213_vm13 = vweird.f32 %v5042_v3 }
 0x403   : > { %v4145_v31 = vsel %vm8498_vm3, %v4144_v57, %v4140_v17  ;;  %v4196_v47 = vadd.f32 %v5040_v48, %v4195_v23  ;;  %v8527_v22 = vadd.f32 1.0, %v3290_v24  ;;  %v3553_v55 = vmul.f32 %v5044_v12, %v3552_v44  ;;  %vm4214_vm15 = vmor %vm4212_vm9, %vm4213_vm13 }
 0x404   : > { %v5046_v58 = vpop.eup %5045  ;;  %v4146_v36 = vmul.f32 %v4145_v31, %v7996_v50  ;;  %v4210_v4 = vmul.f32 %v5042_v3, %v4209_v59  ;;  %v3725_v61 = vmul.f32 %v3724_v18, %v8423_v54  ;;  %v4219_v5 = vor.u32 1.1754944e-38, %v4218_v49 }
 0x405   : > { %v5048_v53 = vpop.eup %5047  ;;  %v4200_v25 = vsel %vm4199_vm14, %v5040_v48, %v4196_v47  ;;  %v3636_v11 = vmul.f32 %v5046_v58, %v8489_v43  ;;  %5049 = vrsqrt.f32 %v8527_v22  ;;  %v3554_v37 = vmul.f32 0.5, %v3553_v55 }
 0x406   : > { %4290 = vst [vmem:[%s8095_s14 + $0xb8] sm:$0xff] %v4146_v36  ;;  %v4205_v50 = vsel %vm8509_vm8, %v4204_v34, %v4200_v25  ;;  %v4211_v1 = vadd.f32 %v5042_v3, %v4210_v4  ;;  %v3727_v20 = vsel %vm3726_vm5, %v8423_v54, %v3725_v61  ;;  %v3732_v14 = vmul.f32 %v5048_v53, %v8494_v30 }
 0x407   : > { %v4206_v2 = vmul.f32 %v4205_v50, %v8022_v39  ;;  %v3730_v21 = vsel %vm3728_vm7, %v3729_v41, %v3727_v20  ;;  %v3637_v13 = vmul.f32 %v5046_v58, %v3636_v11  ;;  %v3555_v16 = vsub.f32 1.5, %v3554_v37 }
 0x408   : > { %v4215_v40 = vsel %vm4214_vm15, %v5042_v3, %v4211_v1  ;;  %v8548_v27 = vadd.f32 1.0, %v3730_v21  ;;  %v8550_v15 = vadd.f32 1.0, %v3338_v28  ;;  %v3733_v19 = vmul.f32 %v5048_v53, %v3732_v14 }
 0x409   : > { %4294 = vst [vmem:[%s8095_s14 + $0xd8] sm:$0xff] %v4206_v2  ;;  %v4220_v39 = vsel %vm8518_vm12, %v4219_v5, %v4215_v40  ;;  %v3638_v46 = vmul.f32 0.5, %v3637_v13  ;;  %v3556_v48 = vmul.f32 %v5044_v12, %v3555_v16  ;;  %vm3558_vm0 = vcmp.eq.f32.partialorder %v8482_v51, inf }
 0x40a   : > { %v4221_v24 = vmul.f32 %v4220_v39, %v8009_v45  ;;  %5051 = vrcp.f32 %v8548_v27  ;;  %v3734_v0 = vmul.f32 0.5, %v3733_v19  ;;  %vm3560_vm1 = vcmp.eq.f32.partialorder %v8482_v51, 0.0 }
 0x40b   : > { %v5050_v54 = vpop.eup %5049  ;;  %v3639_v42 = vsub.f32 1.5, %v3638_v46  ;;  %5053 = vrsqrt.f32 %v8550_v15  ;;  %v3557_v57 = vmul.f32 %v3556_v48, %v8482_v51  ;;  %v3561_v45 = vand.u32 2147483648, %v8482_v51 }
 0x40c   : > { %4295 = vst [vmem:[%s8095_s14 + $0xe0] sm:$0xff] %v4221_v24  ;;  %v3456_v41 = vmul.f32 %v5050_v54, %v8527_v22  ;;  %v3735_v26 = vsub.f32 1.5, %v3734_v0  ;;  %vm3642_vm2 = vcmp.eq.f32.partialorder %v8489_v43, inf  ;;  %vm3644_vm3 = vcmp.eq.f32.partialorder %v8489_v43, 0.0 }
 0x40d   : > { %v3640_v63 = vmul.f32 %v5046_v58, %v3639_v42  ;;  %v3559_v8 = vsel %vm3558_vm0, %v8482_v51, %v3557_v57  ;;  %v3645_v9 = vand.u32 2147483648, %v8489_v43  ;;  %vm3738_vm4 = vcmp.eq.f32.partialorder %v8494_v30, inf }
 0x40e   : > { %v3457_v56 = vmul.f32 %v5050_v54, %v3456_v41  ;;  %v3736_v60 = vmul.f32 %v5048_v53, %v3735_v26  ;;  %v3562_v34 = vsel %vm3560_vm1, %v3561_v45, %v3559_v8  ;;  %vm3740_vm5 = vcmp.eq.f32.partialorder %v8494_v30, 0.0 }
 0x40f   : > { %v3641_v3 = vmul.f32 %v3640_v63, %v8489_v43  ;;  %v3770_v12 = vadd.f32 1.0, %v3562_v34  ;;  %v4231_v18 = vand.u32 2147483647, %v8548_v27  ;;  %v3741_v44 = vand.u32 2147483648, %v8494_v30 }
 0x410   : > { %v5052_v10 = vpop.eup %5051  ;;  %v3458_v6 = vmul.f32 0.5, %v3457_v56  ;;  %v3737_v49 = vmul.f32 %v3736_v60, %v8494_v30  ;;  %v4233_v31 = vand.u32 2147483648, %v8548_v27  ;;  %vm4227_vm7 = vweird.f32 %v8548_v27 }
 0x411   : > { %v4223_v7 = vmul.f32 %v5052_v10, %v8548_v27  ;;  %v3643_v23 = vsel %vm3642_vm2, %v8489_v43, %v3641_v3  ;;  %v8572_v51 = vpop.eup %5053  ;;  %5055 = vrcp.f32 %v3770_v12  ;;  %vm4228_vm6 = vweird.f32 %v5052_v10 }
 0x412   : > { %v3646_v38 = vsel %vm3644_vm3, %v3645_v9, %v3643_v23  ;;  %v3459_v17 = vsub.f32 1.5, %v3458_v6  ;;  %v3739_v43 = vsel %vm3738_vm4, %v8494_v30, %v3737_v49  ;;  %v3744_v61 = vmul.f32 %v8572_v51, %v8550_v15  ;;  %vm4229_vm8 = vmor %vm4227_vm7, %vm4228_vm6 }
 0x413   : > { %v4224_v59 = vsub.f32 1.0, %v4223_v7  ;;  %v8579_v47 = vadd.f32 1.0, %v3646_v38  ;;  %v3742_v4 = vsel %vm3740_vm5, %v3741_v44, %v3739_v43  ;;  %v4234_v5 = vor.u32 1.1754944e-38, %v4233_v31 }
 0x414   : > { %v3460_v58 = vmul.f32 %v5050_v54, %v3459_v17  ;;  %v8586_v53 = vadd.f32 1.0, %v3742_v4  ;;  %v3745_v30 = vmul.f32 %v8572_v51, %v3744_v61  ;;  %vm4232_vm9 = vcmp.eq.f32.partialorder %v4231_v18, 8.507059e+37 }
 0x415   : > { %v4225_v36 = vmul.f32 %v5052_v10, %v4224_v59  ;;  %5057 = vrcp.f32 %v8579_v47  ;;  %vm3462_vm10 = vcmp.eq.f32.partialorder %v8527_v22, inf  ;;  %v3465_v20 = vand.u32 2147483648, %v8527_v22 }
 0x416   : > { %v3461_v25 = vmul.f32 %v3460_v58, %v8527_v22  ;;  %5059 = vrcp.f32 %v8586_v53  ;;  %vm3464_vm11 = vcmp.eq.f32.partialorder %v8527_v22, 0.0  ;;  %v3746_v21 = vmul.f32 0.5, %v3745_v30 }
 0x417   : > { %v4226_v55 = vadd.f32 %v5052_v10, %v4225_v36  ;;  %v5056_v11 = vpop.eup %5055  ;;  %v4021_v40 = vand.u32 2147483647, %v3770_v12  ;;  %v4023_v27 = vand.u32 2147483648, %v3770_v12  ;;  %vm3750_vm12 = vcmp.eq.f32.partialorder %v8550_v15, inf }
 0x418   : > { %v4013_v1 = vmul.f32 %v5056_v11, %v3770_v12  ;;  %v3463_v2 = vsel %vm3462_vm10, %v8527_v22, %v3461_v25  ;;  %vm4018_vm13 = vweird.f32 %v5056_v11  ;;  %v3747_v24 = vsub.f32 1.5, %v3746_v21 }
 0x419   : > { %v4230_v28 = vsel %vm4229_vm8, %v5052_v10, %v4226_v55  ;;  %v3466_v16 = vsel %vm3464_vm11, %v3465_v20, %v3463_v2  ;;  %vm4017_vm14 = vweird.f32 %v3770_v12  ;;  %vm3752_vm15 = vcmp.eq.f32.partialorder %v8550_v15, 0.0 }
 0x41a   : > { %v4235_v50 = vsel %vm4232_vm9, %v4234_v5, %v4230_v28  ;;  %v4014_v14 = vsub.f32 1.0, %v4013_v1  ;;  %v8598_v46 = vadd.f32 1.0, %v3466_v16  ;;  %vm4022_vm0 = vcmp.eq.f32.partialorder %v4021_v40, 8.507059e+37  ;;  %vm4019_vm1 = vmor %vm4017_vm14, %vm4018_vm13 }
 0x41b   : > { %v4236_v37 = vmul.f32 %v4235_v50, %v8034_v62  ;;  %v5058_v13 = vpop.eup %5057  ;;  %v4128_v62 = vand.u32 2147483648, %v8579_v47  ;;  %v4024_v42 = vor.u32 1.1754944e-38, %v4023_v27  ;;  %v4126_v57 = vand.u32 2147483647, %v8579_v47 }
 0x41c   : > { %v4118_v39 = vmul.f32 %v5058_v13, %v8579_v47  ;;  %v4015_v19 = vmul.f32 %v5056_v11, %v4014_v14  ;;  %v5060_v54 = vpop.eup %5059  ;;  %5061 = vrcp.f32 %v8598_v46  ;;  %vm4123_vm2 = vweird.f32 %v5058_v13 }
 0x41d   : > { %4296 = vst [vmem:[%s8095_s14 + $0xe8] sm:$0xff] %v4236_v37  ;;  %v4238_v0 = vmul.f32 %v5060_v54, %v8586_v53  ;;  %v3748_v63 = vmul.f32 %v8572_v51, %v3747_v24  ;;  %vm4122_vm3 = vweird.f32 %v8579_v47  ;;  %v4129_v45 = vor.u32 1.1754944e-38, %v4128_v62 }
 0x41e   : > { %v4119_v22 = vsub.f32 1.0, %v4118_v39  ;;  %v4016_v48 = vadd.f32 %v5056_v11, %v4015_v19  ;;  %v4248_v60 = vand.u32 2147483648, %v8586_v53  ;;  %vm4124_vm4 = vmor %vm4122_vm3, %vm4123_vm2  ;;  %vm4243_vm5 = vweird.f32 %v5060_v54 }
 0x41f   : > { %v4239_v56 = vsub.f32 1.0, %v4238_v0  ;;  %v3749_v10 = vmul.f32 %v3748_v63, %v8550_v15  ;;  %v4246_v6 = vand.u32 2147483647, %v8586_v53  ;;  %vm4127_vm6 = vcmp.eq.f32.partialorder %v4126_v57, 8.507059e+37 }
 0x420   : > { %v4120_v41 = vmul.f32 %v5058_v13, %v4119_v22  ;;  %v4020_v26 = vsel %vm4019_vm1, %v5056_v11, %v4016_v48  ;;  %v3753_v51 = vand.u32 2147483648, %v8550_v15  ;;  %vm4242_vm7 = vweird.f32 %v8586_v53 }
 0x421   : > { %v4025_v8 = vsel %vm4022_vm0, %v4024_v42, %v4020_v26  ;;  %v4240_v9 = vmul.f32 %v5060_v54, %v4239_v56  ;;  %v3751_v23 = vsel %vm3750_vm12, %v8550_v15, %v3749_v10  ;;  %vm4244_vm8 = vmor %vm4242_vm7, %vm4243_vm5  ;;  %v4249_v59 = vor.u32 1.1754944e-38, %v4248_v60 }
 0x422   : > { %v4121_v3 = vadd.f32 %v5058_v13, %v4120_v41  ;;  %v4026_v34 = vmul.f32 %v4025_v8, %v8059_v32  ;;  %v5062_v7 = vpop.eup %5061  ;;  %v3754_v18 = vsel %vm3752_vm15, %v3753_v51, %v3751_v23  ;;  %vm4247_vm9 = vcmp.eq.f32.partialorder %v4246_v6, 8.507059e+37 }
 0x423   : > { %v4241_v49 = vadd.f32 %v5060_v54, %v4240_v9  ;;  %v3893_v32 = vmul.f32 %v5062_v7, %v8598_v46  ;;  %v3786_v47 = vadd.f32 1.0, %v3754_v18  ;;  %v3901_v58 = vand.u32 2147483647, %v8598_v46 }
 0x424   : > { %v4125_v12 = vsel %vm4124_vm4, %v5058_v13, %v4121_v3  ;;  %4282 = vst [vmem:[%s8095_s14 + $0x78] sm:$0xff] %v4026_v34  ;;  %v3903_v36 = vand.u32 2147483648, %v8598_v46  ;;  %vm3898_vm10 = vweird.f32 %v5062_v7  ;;  %vm3897_vm11 = vweird.f32 %v8598_v46 }
 0x425   : > { %v4130_v38 = vsel %vm4127_vm6, %v4129_v45, %v4125_v12  ;;  %v4245_v44 = vsel %vm4244_vm8, %v5060_v54, %v4241_v49  ;;  %v3894_v31 = vsub.f32 1.0, %v3893_v32  ;;  %5063 = vrcp.f32 %v3786_v47  ;;  %vm3899_vm12 = vmor %vm3897_vm11, %vm3898_vm10 }
 0x426   : > { %v4131_v17 = vmul.f32 %v4130_v38, %v8046_v35  ;;  %v4250_v43 = vsel %vm4247_vm9, %v4249_v59, %v4245_v44  ;;  %v3904_v15 = vor.u32 1.1754944e-38, %v3903_v36  ;;  %vm3902_vm13 = vcmp.eq.f32.partialorder %v3901_v58, 8.507059e+37 }
 0x427   : > { %v4251_v4 = vmul.f32 %v4250_v43, %v8076_v52  ;;  %v3895_v35 = vmul.f32 %v5062_v7, %v3894_v31  ;;  %v4263_v52 = vand.u32 2147483648, %v3786_v47  ;;  %v4261_v50 = vand.u32 2147483647, %v3786_v47 }
 0x428   : > { %4289 = vst [vmem:[%s8095_s14 + $0xb0] sm:$0xff] %v4131_v17  ;;  %vm4257_vm15 = vweird.f32 %v3786_v47 }
 0x429   : > { %4297 = vst [vmem:[%s8095_s14 + $0xf0] sm:$0xff] %v4251_v4  ;;  %v3896_v61 = vadd.f32 %v5062_v7, %v3895_v35  ;;  %v4264_v20 = vor.u32 1.1754944e-38, %v4263_v52  ;;  %vm4262_vm1 = vcmp.eq.f32.partialorder %v4261_v50, 8.507059e+37 }
 0x42b   : > { %v3900_v55 = vsel %vm3899_vm12, %v5062_v7, %v3896_v61  ;;  %v5064_v25 = vpop.eup %5063 }
 0x42c   : > { %v3905_v53 = vsel %vm3902_vm13, %v3904_v15, %v3900_v55  ;;  %v4253_v30 = vmul.f32 %v5064_v25, %v3786_v47  ;;  %vm4258_vm14 = vweird.f32 %v5064_v25 }
 0x42d   : > { %v3906_v5 = vmul.f32 %v3905_v53, %v8068_v29  ;;  %vm4259_vm0 = vmor %vm4257_vm15, %vm4258_vm14 }
 0x42e   : > { %v4254_v11 = vsub.f32 1.0, %v4253_v30 }
 0x42f   : > { %4274 = vst [vmem:[%s8095_s14 + $0x38] sm:$0xff] %v3906_v5 }
 0x430   : > { %v4255_v28 = vmul.f32 %v5064_v25, %v4254_v11 }
 0x432   : > { %v4256_v1 = vadd.f32 %v5064_v25, %v4255_v28 }
 0x434   : > { %v4260_v37 = vsel %vm4259_vm0, %v5064_v25, %v4256_v1 }
 0x435   : > { %v4265_v2 = vsel %vm4262_vm1, %v4264_v20, %v4260_v37 }
 0x436   : > { %v4266_v21 = vmul.f32 %v4265_v2, %v8081_v33 }
 0x438   : > { %4298 = vst [vmem:[%s8095_s14 + $0xf8] sm:$0xff] %v4266_v21 }
 0x439 PF: > { %s15_s18 = sadd.s32 1, %s5080_s18  }
 0x43a   : > { %p12_p4 = scmp.ge.s32.totalorder %s15_s18, 4  }
 0x43c   :  { %14 = sbr.rel (!%p12_p4) target bundleno = 1 (0x1), region = 70 }

</bundles_post_ra>
